<compile_context>
chip_gen: v7x
topology: tpu7x:2x2x1
jax: 0.10.0
libtpu: 0.0.40
codegen_flags: <defaults>
</compile_context>

<pallas_src>
import functools

import jax
import jax.numpy as jnp
from jax.experimental import pallas as pl
from jax.experimental.pallas import tpu as pltpu

_GELU_C = 0.7978845608028654  # sqrt(2/pi)


def _default_vmem_limit():
    # Leave headroom for compiler internal scratch + BlockSpec double buffers:
    # ~48 MiB on v7x (64 MiB physical), 96 MiB on v5e/v6e (128 MiB physical).
    cap = 128 * 1024 * 1024
    try:
        cap = int(pltpu.get_tpu_info().vmem_capacity_bytes)
    except Exception:
        pass
    return min(96 * 1024 * 1024, (cap * 3) // 4)


_VMEM_LIMIT = _default_vmem_limit()


# ----------------------- fused (LN +) matmul (+ act/resid) ------------------

def _fused_linear_kernel(*refs, has_ln, has_resid, activation, eps):
    idx = 0
    x_ref = refs[idx]; idx += 1
    if has_ln:
        g_ref, bln_ref = refs[idx], refs[idx + 1]; idx += 2
    w_ref, b_ref = refs[idx], refs[idx + 1]; idx += 2
    if has_resid:
        r_ref = refs[idx]; idx += 1
    o_ref = refs[idx]; idx += 1
    xn_ref = refs[idx] if has_ln else None

    if has_ln:
        # LayerNorm over the full feature dim, computed once per row tile
        # (the x block index is constant across j); normalized bf16 rows
        # persist in VMEM scratch and are reused for every N tile.
        @pl.when(pl.program_id(1) == 0)
        def _():
            x = x_ref[...].astype(jnp.float32)
            mu = jnp.mean(x, axis=-1, keepdims=True)
            var = jnp.mean((x - mu) ** 2, axis=-1, keepdims=True)
            xn = (x - mu) * jax.lax.rsqrt(var + eps) * g_ref[...] + bln_ref[...]
            xn_ref[...] = xn.astype(jnp.bfloat16)
        lhs = xn_ref[...]
    else:
        lhs = x_ref[...].astype(jnp.bfloat16)

    y = jnp.dot(lhs, w_ref[...].astype(jnp.bfloat16),
                preferred_element_type=jnp.float32)
    y = y + b_ref[...]

    if activation == "relu":
        y = jnp.maximum(y, 0.0)
    elif activation == "gelu_new":  # GPT-2 tanh-approx GELU, f32
        y = 0.5 * y * (1.0 + jnp.tanh(_GELU_C * (y + 0.044715 * y * y * y)))

    if has_resid:
        y = y + r_ref[...].astype(jnp.float32)
    o_ref[...] = y.astype(o_ref.dtype)


def fused_linear(x, w, b, *, ln=None, resid=None, activation="none",
                 out_dtype=jnp.float32, tile_m=512, tile_n=256):
    """y = act(LN?(x) @ w + b) + resid?   (x:(M,K), w:(K,N) bf16)."""
    M, K = x.shape
    N = w.shape[1]
    tm = M if M <= tile_m else tile_m      # tile_m is a multiple of 8
    tn = N if N <= tile_n else tile_n      # tile_n is a multiple of 128
    grid = (pl.cdiv(M, tm), pl.cdiv(N, tn))
    # NOTE: if M is not a multiple of tm, the ragged last row tile relies on
    # Pallas partial-block handling; rows are independent so padded rows never
    # contaminate valid rows (only the valid region is written back).

    in_specs = [pl.BlockSpec((tm, K), lambda i, j: (i, 0))]
    inputs = [x]
    if ln is not None:
        g, bln = ln
        in_specs += [pl.BlockSpec((1, K), lambda i, j: (0, 0)),
                     pl.BlockSpec((1, K), lambda i, j: (0, 0))]
        inputs += [g.reshape(1, K), bln.reshape(1, K)]
    in_specs += [pl.BlockSpec((K, tn), lambda i, j: (0, j)),
                 pl.BlockSpec((1, tn), lambda i, j: (0, j))]
    inputs += [w, b.reshape(1, N)]
    if resid is not None:
        in_specs += [pl.BlockSpec((tm, tn), lambda i, j: (i, j))]
        inputs += [resid]

    scratch_shapes = []
    if ln is not None:
        scratch_shapes.append(pltpu.VMEM((tm, K), jnp.bfloat16))
        # j must stay a sequential sweep on one core so the j==0 LN init holds.
        semantics = ("parallel", "arbitrary")
    else:
        semantics = ("parallel", "parallel")

    return pl.pallas_call(
        functools.partial(_fused_linear_kernel, has_ln=ln is not None,
                          has_resid=resid is not None, activation=activation,
                          eps=1e-5),
        out_shape=jax.ShapeDtypeStruct((M, N), out_dtype),
        grid=grid,
        in_specs=in_specs,
        out_specs=pl.BlockSpec((tm, tn), lambda i, j: (i, j)),
        scratch_shapes=scratch_shapes,
        compiler_params=pltpu.CompilerParams(
            dimension_semantics=semantics,
            vmem_limit_bytes=_VMEM_LIMIT),
    )(*inputs)


# --------------------------- multi-head attention ---------------------------

def _attention_kernel(qkv_ref, m_ref, o_ref, *, n_head, scale):
    # qkv_ref: (1, S, 3D) bf16 (GPT-2 c_attn layout: [Q | K | V], heads
    # contiguous along the feature axis).  Output: (1, S, D) lane-dense.
    S = qkv_ref.shape[1]
    D = qkv_ref.shape[2] // 3
    Dh = D // n_head
    qkv = qkv_ref[0]                                     # (S, 3D) bf16

    # Causal + key-padding mask built in-kernel (no (B*H,S,S) bias in HBM).
    qi = jax.lax.broadcasted_iota(jnp.int32, (S, S), 0)
    ki = jax.lax.broadcasted_iota(jnp.int32, (S, S), 1)
    keep = (qi >= ki) & (m_ref[0] > 0.0)                 # (S, S)

    # Static head loop: per-head (S, S) score slab stays transient in VMEM.
    for h in range(n_head):
        q = qkv[:, h * Dh:(h + 1) * Dh]                  # (S, Dh) bf16
        k = qkv[:, D + h * Dh:D + (h + 1) * Dh]
        v = qkv[:, 2 * D + h * Dh:2 * D + (h + 1) * Dh]

        s = jnp.einsum("qd,kd->qk", q, k,
                       preferred_element_type=jnp.float32) * scale
        s = jnp.where(keep, s, -1e9)
        mx = jnp.max(s, axis=-1, keepdims=True)
        p = jnp.exp(s - mx)
        denom = jnp.sum(p, axis=-1, keepdims=True)
        p = p * pl.reciprocal(denom, approx=True)

        o = jnp.dot(p.astype(jnp.bfloat16), v,
                    preferred_element_type=jnp.float32)  # (S, Dh)
        o_ref[0, :, h * Dh:(h + 1) * Dh] = o.astype(o_ref.dtype)


def multihead_attention(qkv, mask, *, n_head):
    # qkv: (B, S, 3D) bf16; mask: (B, 1, S) f32 (1=keep key, 0=pad).
    # TODO(synk): flash-style (q_tile, kv_tile) online-softmax grid for long S
    #             so the per-head (S,S) slab never exceeds v7x's 64 MiB VMEM.
    B, S, D3 = qkv.shape
    D = D3 // 3
    Dh = D // n_head
    scale = 1.0 / float(Dh) ** 0.5
    return pl.pallas_call(
        functools.partial(_attention_kernel, n_head=n_head, scale=scale),
        out_shape=jax.ShapeDtypeStruct((B, S, D), jnp.bfloat16),
        grid=(B,),
        in_specs=[pl.BlockSpec((1, S, D3), lambda b: (b, 0, 0)),
                  pl.BlockSpec((1, 1, S), lambda b: (b, 0, 0))],
        out_specs=pl.BlockSpec((1, S, D), lambda b: (b, 0, 0)),
        compiler_params=pltpu.CompilerParams(
            dimension_semantics=("parallel",),
            vmem_limit_bytes=_VMEM_LIMIT),
    )(qkv, mask)


# -------------------- fused final LayerNorm + attention pool ----------------

def _ln_pool_kernel(x_ref, g_ref, b_ref, pw_ref, pb_ref, o_ref, *, eps):
    x = x_ref[0].astype(jnp.float32)                     # (S, D)
    mu = jnp.mean(x, axis=-1, keepdims=True)
    var = jnp.mean((x - mu) ** 2, axis=-1, keepdims=True)
    xn = (x - mu) * jax.lax.rsqrt(var + eps) * g_ref[...] + b_ref[...]
    xn_bf = xn.astype(jnp.bfloat16)

    # Pool scores + pooled vector on the MXU (lane-dense (1, D) result).
    scores = jnp.dot(xn_bf, pw_ref[...].astype(jnp.bfloat16),
                     preferred_element_type=jnp.float32) + pb_ref[...]   # (S, 1)
    m = jnp.max(scores, axis=0, keepdims=True)
    e = jnp.exp(scores - m)
    wts = e * pl.reciprocal(jnp.sum(e, axis=0, keepdims=True), approx=True)
    pooled = jnp.einsum("sq,sd->qd", wts.astype(jnp.bfloat16), xn_bf,
                        preferred_element_type=jnp.float32)              # (1, D)
    o_ref[0] = pooled.astype(o_ref.dtype)


def ln_attention_pool(x, g, b, pool_w, pool_b, eps=1e-5):
    B, S, D = x.shape
    out = pl.pallas_call(
        functools.partial(_ln_pool_kernel, eps=eps),
        out_shape=jax.ShapeDtypeStruct((B, 1, D), jnp.float32),
        grid=(B,),
        in_specs=[pl.BlockSpec((1, S, D), lambda i: (i, 0, 0)),
                  pl.BlockSpec((1, D), lambda i: (0, 0)),
                  pl.BlockSpec((1, D), lambda i: (0, 0)),
                  pl.BlockSpec((D, 1), lambda i: (0, 0)),
                  pl.BlockSpec((1, 1), lambda i: (0, 0))],
        out_specs=pl.BlockSpec((1, 1, D), lambda i: (i, 0, 0)),
        compiler_params=pltpu.CompilerParams(
            dimension_semantics=("parallel",),
            vmem_limit_bytes=_VMEM_LIMIT),
    )(x, g.reshape(1, D), b.reshape(1, D), pool_w.reshape(D, 1),
      pool_b.reshape(1, 1))
    return out.reshape(B, D)


# ------------------------ fused MLP head + MSE loss --------------------------

def _head_kernel(x_ref, *refs, n_lin):
    y = x_ref[...].astype(jnp.float32)
    for i in range(n_lin):
        w = refs[2 * i][...].astype(jnp.bfloat16)
        b = refs[2 * i + 1][...]
        y = jnp.dot(y.astype(jnp.bfloat16), w,
                    preferred_element_type=jnp.float32) + b
        if i < n_lin - 1:                       # ReLU (Dropout is identity)
            y = jnp.maximum(y, 0.0)
    labels = refs[2 * n_lin][...]
    logits_ref = refs[2 * n_lin + 1]
    loss_ref = refs[2 * n_lin + 2]
    logits_ref[...] = y
    d = y - labels
    loss_ref[...] = jnp.mean(d * d).reshape(1, 1)


def mlp_head_mse(x, layers, labels):
    B, D = x.shape
    OUT = layers[-1][0].shape[1]
    inputs = [x]
    in_specs = [pl.BlockSpec((B, D), lambda i: (0, 0))]
    for w, b in layers:
        K, N = w.shape
        inputs += [w, b.reshape(1, N)]
        in_specs += [pl.BlockSpec((K, N), lambda i: (0, 0)),
                     pl.BlockSpec((1, N), lambda i: (0, 0))]
    inputs += [labels]
    in_specs += [pl.BlockSpec((B, OUT), lambda i: (0, 0))]

    logits, loss = pl.pallas_call(
        functools.partial(_head_kernel, n_lin=len(layers)),
        out_shape=(jax.ShapeDtypeStruct((B, OUT), jnp.float32),
                   jax.ShapeDtypeStruct((1, 1), jnp.float32)),
        grid=(1,),
        in_specs=in_specs,
        out_specs=(pl.BlockSpec((B, OUT), lambda i: (0, 0)),
                   pl.BlockSpec((1, 1), lambda i: (0, 0))),
        compiler_params=pltpu.CompilerParams(vmem_limit_bytes=_VMEM_LIMIT),
    )(*inputs)
    return logits, loss[0, 0]


# ------------------------- parameter initialization -------------------------

def init_params(key, *, vocab, n_pos, d, n_layer, n_inner, hidden_dims, out_size):
    keys = iter(jax.random.split(key, 8 * n_layer + len(hidden_dims) + 16))
    std = 0.02

    def normal(shape, dtype=jnp.float32):
        return (jax.random.normal(next(keys), shape, jnp.float32) * std).astype(dtype)

    bf = jnp.bfloat16  # matmul weights stored bf16 (MXU inputs), rest f32
    params = {
        "wte": normal((vocab, d)),
        "wpe": normal((n_pos, d)),
        "blocks": [],
        "ln_f_g": jnp.ones((d,), jnp.float32),
        "ln_f_b": jnp.zeros((d,), jnp.float32),
        "pool_w": normal((d, 1)),                 # AttentionPooling: Linear(d, 1)
        "pool_b": jnp.zeros((1,), jnp.float32),
    }
    for _ in range(n_layer):
        params["blocks"].append({
            "ln1_g": jnp.ones((d,), jnp.float32), "ln1_b": jnp.zeros((d,), jnp.float32),
            "attn_w": normal((d, 3 * d), bf), "attn_b": jnp.zeros((3 * d,), jnp.float32),
            "proj_w": normal((d, d), bf), "proj_b": jnp.zeros((d,), jnp.float32),
            "ln2_g": jnp.ones((d,), jnp.float32), "ln2_b": jnp.zeros((d,), jnp.float32),
            "fc_w": normal((d, n_inner), bf), "fc_b": jnp.zeros((n_inner,), jnp.float32),
            "fc2_w": normal((n_inner, d), bf), "fc2_b": jnp.zeros((d,), jnp.float32),
        })
    mlp = []
    in_dim = d
    for hd in hidden_dims:
        mlp.append((normal((in_dim, hd), bf), jnp.zeros((hd,), jnp.float32)))
        in_dim = hd
    mlp.append((normal((in_dim, out_size), bf), jnp.zeros((out_size,), jnp.float32)))
    params["mlp_head"] = mlp
    return params


# ---------------------------------- forward ----------------------------------

def gpt2_forecaster_forward(params, input_ids, attention_mask, labels, *, n_head):
    B, S = input_ids.shape
    D = params["wte"].shape[1]

    # Embedding gather kept in plain JAX glue.
    h = jnp.take(params["wte"], input_ids, axis=0) + params["wpe"][None, :S, :]
    h = h.reshape(B * S, D).astype(jnp.float32)

    # Key-padding mask, one row per batch element (causal part built in-kernel).
    mask3 = attention_mask.reshape(B, 1, S).astype(jnp.float32)

    for blk in params["blocks"]:
        # --- attention sublayer: fused LN1 + QKV projection (bf16 slab) ---
        qkv = fused_linear(h, blk["attn_w"], blk["attn_b"],
                           ln=(blk["ln1_g"], blk["ln1_b"]),
                           out_dtype=jnp.bfloat16)                  # (B*S, 3D)
        attn = multihead_attention(qkv.reshape(B, S, 3 * D), mask3,
                                   n_head=n_head)                   # (B, S, D) bf16
        attn = attn.reshape(B * S, D)                               # no transpose
        # fused output projection + residual add (residual stream stays f32)
        h = fused_linear(attn, blk["proj_w"], blk["proj_b"], resid=h)
        # --- MLP sublayer: fused LN2 + fc + GELU (bf16), then fc2 + residual ---
        x = fused_linear(h, blk["fc_w"], blk["fc_b"],
                         ln=(blk["ln2_g"], blk["ln2_b"]),
                         activation="gelu_new", out_dtype=jnp.bfloat16,
                         tile_n=512)
        h = fused_linear(x, blk["fc2_w"], blk["fc2_b"], resid=h)

    hidden_states = h.reshape(B, S, D)

    # Fused final LayerNorm + attention pooling (pool softmax is unmasked,
    # matching the PyTorch AttentionPooling reference).
    pooled = ln_attention_pool(hidden_states, params["ln_f_g"], params["ln_f_b"],
                               params["pool_w"], params["pool_b"])   # (B, D)

    # Fused MLP head (Linear/ReLU stacks, Dropout=identity) + MSE loss.
    logits, loss = mlp_head_mse(pooled, params["mlp_head"], labels)

    # torch's output.squeeze(0): only squeezes if batch dim is size 1.
    logits = jnp.squeeze(logits, axis=0) if logits.shape[0] == 1 else logits
    return {"loss": loss, "logits": logits}


# ------------------------------------ main ------------------------------------

if __name__ == "__main__":
    # Small GPT-2-style config (shrunk from the default GPT2Config for this
    # synthetic kernel; structure matches the PyTorch forward exactly).
    VOCAB, N_POS, D, H, N_LAYER, N_INNER = 128, 32, 64, 4, 2, 256
    HIDDEN_DIMS, OUT_SIZE = [128, 64], 4
    B, S = 2, 8

    key = jax.random.PRNGKey(0)
    pkey, ikey, lkey = jax.random.split(key, 3)

    params = init_params(pkey, vocab=VOCAB, n_pos=N_POS, d=D,
                         n_layer=N_LAYER, n_inner=N_INNER,
                         hidden_dims=HIDDEN_DIMS, out_size=OUT_SIZE)

    input_ids = jax.random.randint(ikey, (B, S), 0, VOCAB, dtype=jnp.int32)
    attention_mask = jnp.array([[1] * S, [1] * (S - 2) + [0] * 2], dtype=jnp.int32)
    labels = jax.random.normal(lkey, (B, OUT_SIZE), jnp.float32)

    fwd = jax.jit(functools.partial(gpt2_forecaster_forward, n_head=H))
    result = fwd(params, input_ids, attention_mask, labels)
    jax.block_until_ready(result)

    assert result["logits"].shape == (B, OUT_SIZE)
    assert bool(jnp.isfinite(result["loss"]))
    print("KERNEL_OK")
</pallas_src>

<mosaic_0001>
module attributes {stable_mosaic.version = 11 : i64} {
  func.func @_fused_linear_kernel(%arg0: i32, %arg1: i32, %arg2: memref<16x64xbf16, #tpu.memory_space<vmem>>, %arg3: memref<64x64xbf16, #tpu.memory_space<vmem>>, %arg4: memref<1x64xf32, #tpu.memory_space<vmem>>, %arg5: memref<16x64xf32, #tpu.memory_space<vmem>>, %arg6: memref<16x64xf32, #tpu.memory_space<vmem>>) attributes {dimension_semantics = [#tpu.dimension_semantics<parallel>, #tpu.dimension_semantics<parallel>], iteration_bounds = array<i64: 1, 1>, scalar_prefetch = 0 : i64, scratch_operands = 0 : i64, tpu.core_type = #tpu.core_type<tc>, window_params = [{transform_indices = @transform_0, window_bounds = array<i64: 16, 64>}, {transform_indices = @transform_1, window_bounds = array<i64: 64, 64>}, {transform_indices = @transform_2, window_bounds = array<i64: 1, 64>}, {transform_indices = @transform_3, window_bounds = array<i64: 16, 64>}, {transform_indices = @transform_4, window_bounds = array<i64: 16, 64>}]} {
    %c0 = arith.constant 0 : index
    %c0_0 = arith.constant 0 : index
    %0 = vector.load %arg2[%c0, %c0_0] : memref<16x64xbf16, #tpu.memory_space<vmem>>, vector<16x64xbf16>
    %c0_1 = arith.constant 0 : index
    %c0_2 = arith.constant 0 : index
    %1 = vector.load %arg3[%c0_1, %c0_2] : memref<64x64xbf16, #tpu.memory_space<vmem>>, vector<64x64xbf16>
    %cst = arith.constant dense<0.000000e+00> : vector<16x64xf32>
    %2 = tpu.matmul %0, %1, %cst {dimension_numbers = #tpu.dot_dimension_numbers<[1], [0], [0], [1], [0, 0, 1, 1], [], []>} : vector<16x64xbf16>, vector<64x64xbf16>, vector<16x64xf32> -> vector<16x64xf32>
    %c0_3 = arith.constant 0 : index
    %c0_4 = arith.constant 0 : index
    %3 = vector.load %arg4[%c0_3, %c0_4] : memref<1x64xf32, #tpu.memory_space<vmem>>, vector<1x64xf32>
    %4 = vector.broadcast %3 : vector<1x64xf32> to vector<16x64xf32>
    %5 = arith.addf %2, %4 : vector<16x64xf32>
    %c0_5 = arith.constant 0 : index
    %c0_6 = arith.constant 0 : index
    %6 = vector.load %arg5[%c0_5, %c0_6] : memref<16x64xf32, #tpu.memory_space<vmem>>, vector<16x64xf32>
    %7 = arith.addf %5, %6 : vector<16x64xf32>
    %c0_7 = arith.constant 0 : index
    %c0_8 = arith.constant 0 : index
    %8 = vector.load %arg6[%c0_7, %c0_8] : memref<16x64xf32, #tpu.memory_space<vmem>>, vector<16x64xf32>
    tpu.vector_store %arg6[%c0_7, %c0_8], %7 {strides = array<i32>} : memref<16x64xf32, #tpu.memory_space<vmem>>, vector<16x64xf32>,
    return
  }
  func.func @transform_0(%arg0: i32, %arg1: i32) -> (i32, i32) {
    %c0_i32 = arith.constant 0 : i32
    %c0_i32_0 = arith.constant 0 : i32
    return %arg0, %c0_i32 : i32, i32
  }
  func.func @transform_1(%arg0: i32, %arg1: i32) -> (i32, i32) {
    %c0_i32 = arith.constant 0 : i32
    %c0_i32_0 = arith.constant 0 : i32
    return %c0_i32, %arg1 : i32, i32
  }
  func.func @transform_2(%arg0: i32, %arg1: i32) -> (i32, i32) {
    %c0_i32 = arith.constant 0 : i32
    %c0_i32_0 = arith.constant 0 : i32
    return %c0_i32, %arg1 : i32, i32
  }
  func.func @transform_3(%arg0: i32, %arg1: i32) -> (i32, i32) {
    %c0_i32 = arith.constant 0 : i32
    return %arg0, %arg1 : i32, i32
  }
  func.func @transform_4(%arg0: i32, %arg1: i32) -> (i32, i32) {
    %c0_i32 = arith.constant 0 : i32
    return %arg0, %arg1 : i32, i32
  }
}

module attributes {stable_mosaic.version = 11 : i64} {
  func.func @_attention_kernel(%arg0: i32, %arg1: memref<1x8x192xbf16, #tpu.memory_space<vmem>>, %arg2: memref<1x1x8xf32, #tpu.memory_space<vmem>>, %arg3: memref<1x8x64xbf16, #tpu.memory_space<vmem>>) attributes {dimension_semantics = [#tpu.dimension_semantics<parallel>], iteration_bounds = array<i64: 2>, scalar_prefetch = 0 : i64, scratch_operands = 0 : i64, tpu.core_type = #tpu.core_type<tc>, window_params = [{transform_indices = @transform_0, window_bounds = array<i64: 1, 8, 192>}, {transform_indices = @transform_1, window_bounds = array<i64: 1, 1, 8>}, {transform_indices = @transform_2, window_bounds = array<i64: 1, 8, 64>}]} {
    %c0 = arith.constant 0 : index
    %c0_0 = arith.constant 0 : index
    %c0_1 = arith.constant 0 : index
    %0 = vector.load %arg1[%c0, %c0_0, %c0_1] : memref<1x8x192xbf16, #tpu.memory_space<vmem>>, vector<1x8x192xbf16>
    %1 = vector.shape_cast %0 : vector<1x8x192xbf16> to vector<8x192xbf16>
    %2 = tpu.iota {dimensions = array<i32: 0>} : vector<8x8xi32>
    %3 = tpu.iota {dimensions = array<i32: 1>} : vector<8x8xi32>
    %4 = arith.cmpi sge, %2, %3 : vector<8x8xi32>
    %c0_2 = arith.constant 0 : index
    %c0_3 = arith.constant 0 : index
    %c0_4 = arith.constant 0 : index
    %5 = vector.load %arg2[%c0_2, %c0_3, %c0_4] : memref<1x1x8xf32, #tpu.memory_space<vmem>>, vector<1x1x8xf32>
    %6 = vector.shape_cast %5 : vector<1x1x8xf32> to vector<1x8xf32>
    %cst = arith.constant 0.000000e+00 : f32
    %7 = vector.broadcast %cst : f32 to vector<1x8xf32>
    %8 = arith.cmpf ogt, %6, %7 : vector<1x8xf32>
    %9 = vector.broadcast %8 : vector<1x8xi1> to vector<8x8xi1>
    %10 = arith.andi %4, %9 : vector<8x8xi1>
    %11 = vector.extract_strided_slice %1 {offsets = [0, 0], sizes = [8, 16], strides = [1, 1]} : vector<8x192xbf16> to vector<8x16xbf16>
    %12 = vector.extract_strided_slice %1 {offsets = [0, 64], sizes = [8, 16], strides = [1, 1]} : vector<8x192xbf16> to vector<8x16xbf16>
    %13 = vector.extract_strided_slice %1 {offsets = [0, 128], sizes = [8, 16], strides = [1, 1]} : vector<8x192xbf16> to vector<8x16xbf16>
    "tpu.trace_start"() <{level = 10 : i32, message = "qd,kd->qk"}> : () -> ()
    %cst_5 = arith.constant dense<0.000000e+00> : vector<8x8xf32>
    %14 = tpu.matmul %11, %12, %cst_5 {dimension_numbers = #tpu.dot_dimension_numbers<[1], [1], [0], [0], [0, 0, 1, 0], [], []>} : vector<8x16xbf16>, vector<8x16xbf16>, vector<8x8xf32> -> vector<8x8xf32>
    "tpu.trace_stop"() : () -> ()
    %cst_6 = arith.constant 2.500000e-01 : f32
    %15 = vector.broadcast %cst_6 : f32 to vector<8x8xf32>
    %16 = arith.mulf %14, %15 : vector<8x8xf32>
    %cst_7 = arith.constant -1.000000e+09 : f32
    %17 = vector.broadcast %cst_7 : f32 to vector<8x8xf32>
    %18 = arith.select %10, %16, %17 : vector<8x8xi1>, vector<8x8xf32>
    %cst_8 = arith.constant dense<0xFF800000> : vector<8xf32>
    %19 = vector.multi_reduction <maximumf>, %18, %cst_8 [1] : vector<8x8xf32> to vector<8xf32>
    %20 = vector.shape_cast %19 : vector<8xf32> to vector<8x1xf32>
    %21 = vector.broadcast %20 : vector<8x1xf32> to vector<8x8xf32>
    %22 = arith.subf %18, %21 : vector<8x8xf32>
    %23 = math.exp %22 : vector<8x8xf32>
    %cst_9 = arith.constant dense<0.000000e+00> : vector<8xf32>
    %24 = vector.multi_reduction <add>, %23, %cst_9 [1] : vector<8x8xf32> to vector<8xf32>
    %25 = vector.shape_cast %24 : vector<8xf32> to vector<8x1xf32>
    %26 = tpu.reciprocal %25 {approx = true} : vector<8x1xf32> -> vector<8x1xf32>
    %27 = vector.broadcast %26 : vector<8x1xf32> to vector<8x8xf32>
    %28 = arith.mulf %23, %27 : vector<8x8xf32>
    %29 = arith.truncf %28 : vector<8x8xf32> to vector<8x8xbf16>
    %cst_10 = arith.constant dense<0.000000e+00> : vector<8x16xf32>
    %30 = tpu.matmul %29, %13, %cst_10 {dimension_numbers = #tpu.dot_dimension_numbers<[1], [0], [0], [1], [0, 0, 1, 1], [], []>} : vector<8x8xbf16>, vector<8x16xbf16>, vector<8x16xf32> -> vector<8x16xf32>
    %31 = arith.truncf %30 : vector<8x16xf32> to vector<8x16xbf16>
    %c0_11 = arith.constant 0 : index
    %c0_12 = arith.constant 0 : index
    %c0_13 = arith.constant 0 : index
    %32 = vector.load %arg3[%c0_11, %c0_12, %c0_13] : memref<1x8x64xbf16, #tpu.memory_space<vmem>>, vector<1x8x16xbf16>
    %33 = vector.shape_cast %32 : vector<1x8x16xbf16> to vector<8x16xbf16>
    %34 = vector.shape_cast %31 : vector<8x16xbf16> to vector<1x8x16xbf16>
    tpu.vector_store %arg3[%c0_11, %c0_12, %c0_13], %34 {strides = array<i32>} : memref<1x8x64xbf16, #tpu.memory_space<vmem>>, vector<1x8x16xbf16>,
    %35 = vector.extract_strided_slice %1 {offsets = [0, 16], sizes = [8, 16], strides = [1, 1]} : vector<8x192xbf16> to vector<8x16xbf16>
    %36 = vector.extract_strided_slice %1 {offsets = [0, 80], sizes = [8, 16], strides = [1, 1]} : vector<8x192xbf16> to vector<8x16xbf16>
    %37 = vector.extract_strided_slice %1 {offsets = [0, 144], sizes = [8, 16], strides = [1, 1]} : vector<8x192xbf16> to vector<8x16xbf16>
    "tpu.trace_start"() <{level = 10 : i32, message = "qd,kd->qk"}> : () -> ()
    %cst_14 = arith.constant dense<0.000000e+00> : vector<8x8xf32>
    %38 = tpu.matmul %35, %36, %cst_14 {dimension_numbers = #tpu.dot_dimension_numbers<[1], [1], [0], [0], [0, 0, 1, 0], [], []>} : vector<8x16xbf16>, vector<8x16xbf16>, vector<8x8xf32> -> vector<8x8xf32>
    "tpu.trace_stop"() : () -> ()
    %cst_15 = arith.constant 2.500000e-01 : f32
    %39 = vector.broadcast %cst_15 : f32 to vector<8x8xf32>
    %40 = arith.mulf %38, %39 : vector<8x8xf32>
    %cst_16 = arith.constant -1.000000e+09 : f32
    %41 = vector.broadcast %cst_16 : f32 to vector<8x8xf32>
    %42 = arith.select %10, %40, %41 : vector<8x8xi1>, vector<8x8xf32>
    %cst_17 = arith.constant dense<0xFF800000> : vector<8xf32>
    %43 = vector.multi_reduction <maximumf>, %42, %cst_17 [1] : vector<8x8xf32> to vector<8xf32>
    %44 = vector.shape_cast %43 : vector<8xf32> to vector<8x1xf32>
    %45 = vector.broadcast %44 : vector<8x1xf32> to vector<8x8xf32>
    %46 = arith.subf %42, %45 : vector<8x8xf32>
    %47 = math.exp %46 : vector<8x8xf32>
    %cst_18 = arith.constant dense<0.000000e+00> : vector<8xf32>
    %48 = vector.multi_reduction <add>, %47, %cst_18 [1] : vector<8x8xf32> to vector<8xf32>
    %49 = vector.shape_cast %48 : vector<8xf32> to vector<8x1xf32>
    %50 = tpu.reciprocal %49 {approx = true} : vector<8x1xf32> -> vector<8x1xf32>
    %51 = vector.broadcast %50 : vector<8x1xf32> to vector<8x8xf32>
    %52 = arith.mulf %47, %51 : vector<8x8xf32>
    %53 = arith.truncf %52 : vector<8x8xf32> to vector<8x8xbf16>
    %cst_19 = arith.constant dense<0.000000e+00> : vector<8x16xf32>
    %54 = tpu.matmul %53, %37, %cst_19 {dimension_numbers = #tpu.dot_dimension_numbers<[1], [0], [0], [1], [0, 0, 1, 1], [], []>} : vector<8x8xbf16>, vector<8x16xbf16>, vector<8x16xf32> -> vector<8x16xf32>
    %55 = arith.truncf %54 : vector<8x16xf32> to vector<8x16xbf16>
    %c0_20 = arith.constant 0 : index
    %c0_21 = arith.constant 0 : index
    %c16 = arith.constant 16 : index
    %56 = vector.load %arg3[%c0_20, %c0_21, %c16] : memref<1x8x64xbf16, #tpu.memory_space<vmem>>, vector<1x8x16xbf16>
    %57 = vector.shape_cast %56 : vector<1x8x16xbf16> to vector<8x16xbf16>
    %58 = vector.shape_cast %55 : vector<8x16xbf16> to vector<1x8x16xbf16>
    tpu.vector_store %arg3[%c0_20, %c0_21, %c16], %58 {strides = array<i32>} : memref<1x8x64xbf16, #tpu.memory_space<vmem>>, vector<1x8x16xbf16>,
    %59 = vector.extract_strided_slice %1 {offsets = [0, 32], sizes = [8, 16], strides = [1, 1]} : vector<8x192xbf16> to vector<8x16xbf16>
    %60 = vector.extract_strided_slice %1 {offsets = [0, 96], sizes = [8, 16], strides = [1, 1]} : vector<8x192xbf16> to vector<8x16xbf16>
    %61 = vector.extract_strided_slice %1 {offsets = [0, 160], sizes = [8, 16], strides = [1, 1]} : vector<8x192xbf16> to vector<8x16xbf16>
    "tpu.trace_start"() <{level = 10 : i32, message = "qd,kd->qk"}> : () -> ()
    %cst_22 = arith.constant dense<0.000000e+00> : vector<8x8xf32>
    %62 = tpu.matmul %59, %60, %cst_22 {dimension_numbers = #tpu.dot_dimension_numbers<[1], [1], [0], [0], [0, 0, 1, 0], [], []>} : vector<8x16xbf16>, vector<8x16xbf16>, vector<8x8xf32> -> vector<8x8xf32>
    "tpu.trace_stop"() : () -> ()
    %cst_23 = arith.constant 2.500000e-01 : f32
    %63 = vector.broadcast %cst_23 : f32 to vector<8x8xf32>
    %64 = arith.mulf %62, %63 : vector<8x8xf32>
    %cst_24 = arith.constant -1.000000e+09 : f32
    %65 = vector.broadcast %cst_24 : f32 to vector<8x8xf32>
    %66 = arith.select %10, %64, %65 : vector<8x8xi1>, vector<8x8xf32>
    %cst_25 = arith.constant dense<0xFF800000> : vector<8xf32>
    %67 = vector.multi_reduction <maximumf>, %66, %cst_25 [1] : vector<8x8xf32> to vector<8xf32>
    %68 = vector.shape_cast %67 : vector<8xf32> to vector<8x1xf32>
    %69 = vector.broadcast %68 : vector<8x1xf32> to vector<8x8xf32>
    %70 = arith.subf %66, %69 : vector<8x8xf32>
    %71 = math.exp %70 : vector<8x8xf32>
    %cst_26 = arith.constant dense<0.000000e+00> : vector<8xf32>
    %72 = vector.multi_reduction <add>, %71, %cst_26 [1] : vector<8x8xf32> to vector<8xf32>
    %73 = vector.shape_cast %72 : vector<8xf32> to vector<8x1xf32>
    %74 = tpu.reciprocal %73 {approx = true} : vector<8x1xf32> -> vector<8x1xf32>
    %75 = vector.broadcast %74 : vector<8x1xf32> to vector<8x8xf32>
    %76 = arith.mulf %71, %75 : vector<8x8xf32>
    %77 = arith.truncf %76 : vector<8x8xf32> to vector<8x8xbf16>
    %cst_27 = arith.constant dense<0.000000e+00> : vector<8x16xf32>
    %78 = tpu.matmul %77, %61, %cst_27 {dimension_numbers = #tpu.dot_dimension_numbers<[1], [0], [0], [1], [0, 0, 1, 1], [], []>} : vector<8x8xbf16>, vector<8x16xbf16>, vector<8x16xf32> -> vector<8x16xf32>
    %79 = arith.truncf %78 : vector<8x16xf32> to vector<8x16xbf16>
    %c0_28 = arith.constant 0 : index
    %c0_29 = arith.constant 0 : index
    %c32 = arith.constant 32 : index
    %80 = vector.load %arg3[%c0_28, %c0_29, %c32] : memref<1x8x64xbf16, #tpu.memory_space<vmem>>, vector<1x8x16xbf16>
    %81 = vector.shape_cast %80 : vector<1x8x16xbf16> to vector<8x16xbf16>
    %82 = vector.shape_cast %79 : vector<8x16xbf16> to vector<1x8x16xbf16>
    tpu.vector_store %arg3[%c0_28, %c0_29, %c32], %82 {strides = array<i32>} : memref<1x8x64xbf16, #tpu.memory_space<vmem>>, vector<1x8x16xbf16>,
    %83 = vector.extract_strided_slice %1 {offsets = [0, 48], sizes = [8, 16], strides = [1, 1]} : vector<8x192xbf16> to vector<8x16xbf16>
    %84 = vector.extract_strided_slice %1 {offsets = [0, 112], sizes = [8, 16], strides = [1, 1]} : vector<8x192xbf16> to vector<8x16xbf16>
    %85 = vector.extract_strided_slice %1 {offsets = [0, 176], sizes = [8, 16], strides = [1, 1]} : vector<8x192xbf16> to vector<8x16xbf16>
    "tpu.trace_start"() <{level = 10 : i32, message = "qd,kd->qk"}> : () -> ()
    %cst_30 = arith.constant dense<0.000000e+00> : vector<8x8xf32>
    %86 = tpu.matmul %83, %84, %cst_30 {dimension_numbers = #tpu.dot_dimension_numbers<[1], [1], [0], [0], [0, 0, 1, 0], [], []>} : vector<8x16xbf16>, vector<8x16xbf16>, vector<8x8xf32> -> vector<8x8xf32>
    "tpu.trace_stop"() : () -> ()
    %cst_31 = arith.constant 2.500000e-01 : f32
    %87 = vector.broadcast %cst_31 : f32 to vector<8x8xf32>
    %88 = arith.mulf %86, %87 : vector<8x8xf32>
    %cst_32 = arith.constant -1.000000e+09 : f32
    %89 = vector.broadcast %cst_32 : f32 to vector<8x8xf32>
    %90 = arith.select %10, %88, %89 : vector<8x8xi1>, vector<8x8xf32>
    %cst_33 = arith.constant dense<0xFF800000> : vector<8xf32>
    %91 = vector.multi_reduction <maximumf>, %90, %cst_33 [1] : vector<8x8xf32> to vector<8xf32>
    %92 = vector.shape_cast %91 : vector<8xf32> to vector<8x1xf32>
    %93 = vector.broadcast %92 : vector<8x1xf32> to vector<8x8xf32>
    %94 = arith.subf %90, %93 : vector<8x8xf32>
    %95 = math.exp %94 : vector<8x8xf32>
    %cst_34 = arith.constant dense<0.000000e+00> : vector<8xf32>
    %96 = vector.multi_reduction <add>, %95, %cst_34 [1] : vector<8x8xf32> to vector<8xf32>
    %97 = vector.shape_cast %96 : vector<8xf32> to vector<8x1xf32>
    %98 = tpu.reciprocal %97 {approx = true} : vector<8x1xf32> -> vector<8x1xf32>
    %99 = vector.broadcast %98 : vector<8x1xf32> to vector<8x8xf32>
    %100 = arith.mulf %95, %99 : vector<8x8xf32>
    %101 = arith.truncf %100 : vector<8x8xf32> to vector<8x8xbf16>
    %cst_35 = arith.constant dense<0.000000e+00> : vector<8x16xf32>
    %102 = tpu.matmul %101, %85, %cst_35 {dimension_numbers = #tpu.dot_dimension_numbers<[1], [0], [0], [1], [0, 0, 1, 1], [], []>} : vector<8x8xbf16>, vector<8x16xbf16>, vector<8x16xf32> -> vector<8x16xf32>
    %103 = arith.truncf %102 : vector<8x16xf32> to vector<8x16xbf16>
    %c0_36 = arith.constant 0 : index
    %c0_37 = arith.constant 0 : index
    %c48 = arith.constant 48 : index
    %104 = vector.load %arg3[%c0_36, %c0_37, %c48] : memref<1x8x64xbf16, #tpu.memory_space<vmem>>, vector<1x8x16xbf16>
    %105 = vector.shape_cast %104 : vector<1x8x16xbf16> to vector<8x16xbf16>
    %106 = vector.shape_cast %103 : vector<8x16xbf16> to vector<1x8x16xbf16>
    tpu.vector_store %arg3[%c0_36, %c0_37, %c48], %106 {strides = array<i32>} : memref<1x8x64xbf16, #tpu.memory_space<vmem>>, vector<1x8x16xbf16>,
    return
  }
  func.func @transform_0(%arg0: i32) -> (i32, i32, i32) {
    %c0_i32 = arith.constant 0 : i32
    %c0_i32_0 = arith.constant 0 : i32
    %c0_i32_1 = arith.constant 0 : i32
    return %arg0, %c0_i32, %c0_i32_0 : i32, i32, i32
  }
  func.func @transform_1(%arg0: i32) -> (i32, i32, i32) {
    %c0_i32 = arith.constant 0 : i32
    %c0_i32_0 = arith.constant 0 : i32
    %c0_i32_1 = arith.constant 0 : i32
    return %arg0, %c0_i32, %c0_i32_0 : i32, i32, i32
  }
  func.func @transform_2(%arg0: i32) -> (i32, i32, i32) {
    %c0_i32 = arith.constant 0 : i32
    %c0_i32_0 = arith.constant 0 : i32
    %c0_i32_1 = arith.constant 0 : i32
    return %arg0, %c0_i32, %c0_i32_0 : i32, i32, i32
  }
}

module attributes {stable_mosaic.version = 11 : i64} {
  func.func @_fused_linear_kernel(%arg0: i32, %arg1: i32, %arg2: memref<16x64xf32, #tpu.memory_space<vmem>>, %arg3: memref<1x64xf32, #tpu.memory_space<vmem>>, %arg4: memref<1x64xf32, #tpu.memory_space<vmem>>, %arg5: memref<64x256xbf16, #tpu.memory_space<vmem>>, %arg6: memref<1x256xf32, #tpu.memory_space<vmem>>, %arg7: memref<16x256xbf16, #tpu.memory_space<vmem>>, %arg8: memref<16x64xbf16, #tpu.memory_space<vmem>>) attributes {dimension_semantics = [#tpu.dimension_semantics<parallel>, #tpu.dimension_semantics<arbitrary>], iteration_bounds = array<i64: 1, 1>, scalar_prefetch = 0 : i64, scratch_operands = 1 : i64, tpu.core_type = #tpu.core_type<tc>, window_params = [{transform_indices = @transform_0, window_bounds = array<i64: 16, 64>}, {pipeline_mode = #tpu.pipeline_mode<synchronous>, transform_indices = @transform_1, window_bounds = array<i64: 1, 64>}, {pipeline_mode = #tpu.pipeline_mode<synchronous>, transform_indices = @transform_2, window_bounds = array<i64: 1, 64>}, {transform_indices = @transform_3, window_bounds = array<i64: 64, 256>}, {transform_indices = @transform_4, window_bounds = array<i64: 1, 256>}, {transform_indices = @transform_5, window_bounds = array<i64: 16, 256>}]} {
    %c0_i32 = arith.constant 0 : i32
    %0 = arith.cmpi eq, %arg1, %c0_i32 : i32
    %1 = arith.extui %0 : i1 to i32
    %c0_i32_0 = arith.constant 0 : i32
    %2 = arith.cmpi ne, %1, %c0_i32_0 : i32
    scf.if %2 {
      %c0_12 = arith.constant 0 : index
      %c0_13 = arith.constant 0 : index
      %24 = vector.load %arg2[%c0_12, %c0_13] : memref<16x64xf32, #tpu.memory_space<vmem>>, vector<16x64xf32>
      %cst_14 = arith.constant dense<0.000000e+00> : vector<16xf32>
      %25 = vector.multi_reduction <add>, %24, %cst_14 [1] : vector<16x64xf32> to vector<16xf32>
      %26 = vector.shape_cast %25 : vector<16xf32> to vector<16x1xf32>
      %cst_15 = arith.constant 6.400000e+01 : f32
      %27 = vector.broadcast %cst_15 : f32 to vector<16x1xf32>
      %28 = arith.divf %26, %27 : vector<16x1xf32>
      %29 = vector.broadcast %28 : vector<16x1xf32> to vector<16x64xf32>
      %30 = arith.subf %24, %29 : vector<16x64xf32>
      %31 = arith.mulf %30, %30 : vector<16x64xf32>
      %cst_16 = arith.constant dense<0.000000e+00> : vector<16xf32>
      %32 = vector.multi_reduction <add>, %31, %cst_16 [1] : vector<16x64xf32> to vector<16xf32>
      %33 = vector.shape_cast %32 : vector<16xf32> to vector<16x1xf32>
      %cst_17 = arith.constant 6.400000e+01 : f32
      %34 = vector.broadcast %cst_17 : f32 to vector<16x1xf32>
      %35 = arith.divf %33, %34 : vector<16x1xf32>
      %36 = vector.broadcast %28 : vector<16x1xf32> to vector<16x64xf32>
      %37 = arith.subf %24, %36 : vector<16x64xf32>
      %cst_18 = arith.constant 9.99999974E-6 : f32
      %38 = vector.broadcast %cst_18 : f32 to vector<16x1xf32>
      %39 = arith.addf %35, %38 : vector<16x1xf32>
      %40 = math.rsqrt %39 : vector<16x1xf32>
      %41 = vector.broadcast %40 : vector<16x1xf32> to vector<16x64xf32>
      %42 = arith.mulf %37, %41 : vector<16x64xf32>
      %c0_19 = arith.constant 0 : index
      %c0_20 = arith.constant 0 : index
      %43 = vector.load %arg3[%c0_19, %c0_20] : memref<1x64xf32, #tpu.memory_space<vmem>>, vector<1x64xf32>
      %44 = vector.broadcast %43 : vector<1x64xf32> to vector<16x64xf32>
      %45 = arith.mulf %42, %44 : vector<16x64xf32>
      %c0_21 = arith.constant 0 : index
      %c0_22 = arith.constant 0 : index
      %46 = vector.load %arg4[%c0_21, %c0_22] : memref<1x64xf32, #tpu.memory_space<vmem>>, vector<1x64xf32>
      %47 = vector.broadcast %46 : vector<1x64xf32> to vector<16x64xf32>
      %48 = arith.addf %45, %47 : vector<16x64xf32>
      %49 = arith.truncf %48 : vector<16x64xf32> to vector<16x64xbf16>
      %c0_23 = arith.constant 0 : index
      %c0_24 = arith.constant 0 : index
      %50 = vector.load %arg8[%c0_23, %c0_24] : memref<16x64xbf16, #tpu.memory_space<vmem>>, vector<16x64xbf16>
      tpu.vector_store %arg8[%c0_23, %c0_24], %49 {strides = array<i32>} : memref<16x64xbf16, #tpu.memory_space<vmem>>, vector<16x64xbf16>,
    } else {
    }
    %c0 = arith.constant 0 : index
    %c0_1 = arith.constant 0 : index
    %3 = vector.load %arg8[%c0, %c0_1] : memref<16x64xbf16, #tpu.memory_space<vmem>>, vector<16x64xbf16>
    %c0_2 = arith.constant 0 : index
    %c0_3 = arith.constant 0 : index
    %4 = vector.load %arg5[%c0_2, %c0_3] : memref<64x256xbf16, #tpu.memory_space<vmem>>, vector<64x256xbf16>
    %cst = arith.constant dense<0.000000e+00> : vector<16x256xf32>
    %5 = tpu.matmul %3, %4, %cst {dimension_numbers = #tpu.dot_dimension_numbers<[1], [0], [0], [1], [0, 0, 1, 1], [], []>} : vector<16x64xbf16>, vector<64x256xbf16>, vector<16x256xf32> -> vector<16x256xf32>
    %c0_4 = arith.constant 0 : index
    %c0_5 = arith.constant 0 : index
    %6 = vector.load %arg6[%c0_4, %c0_5] : memref<1x256xf32, #tpu.memory_space<vmem>>, vector<1x256xf32>
    %7 = vector.broadcast %6 : vector<1x256xf32> to vector<16x256xf32>
    %8 = arith.addf %5, %7 : vector<16x256xf32>
    %cst_6 = arith.constant 5.000000e-01 : f32
    %9 = vector.broadcast %cst_6 : f32 to vector<16x256xf32>
    %10 = arith.mulf %9, %8 : vector<16x256xf32>
    %cst_7 = arith.constant 4.471500e-02 : f32
    %11 = vector.broadcast %cst_7 : f32 to vector<16x256xf32>
    %12 = arith.mulf %11, %8 : vector<16x256xf32>
    %13 = arith.mulf %12, %8 : vector<16x256xf32>
    %14 = arith.mulf %13, %8 : vector<16x256xf32>
    %15 = arith.addf %8, %14 : vector<16x256xf32>
    %cst_8 = arith.constant 0.797884583 : f32
    %16 = vector.broadcast %cst_8 : f32 to vector<16x256xf32>
    %17 = arith.mulf %16, %15 : vector<16x256xf32>
    %18 = math.tanh %17 : vector<16x256xf32>
    %cst_9 = arith.constant 1.000000e+00 : f32
    %19 = vector.broadcast %cst_9 : f32 to vector<16x256xf32>
    %20 = arith.addf %19, %18 : vector<16x256xf32>
    %21 = arith.mulf %10, %20 : vector<16x256xf32>
    %22 = arith.truncf %21 : vector<16x256xf32> to vector<16x256xbf16>
    %c0_10 = arith.constant 0 : index
    %c0_11 = arith.constant 0 : index
    %23 = vector.load %arg7[%c0_10, %c0_11] : memref<16x256xbf16, #tpu.memory_space<vmem>>, vector<16x256xbf16>
    tpu.vector_store %arg7[%c0_10, %c0_11], %22 {strides = array<i32>} : memref<16x256xbf16, #tpu.memory_space<vmem>>, vector<16x256xbf16>,
    return
  }
  func.func @transform_0(%arg0: i32, %arg1: i32) -> (i32, i32) {
    %c0_i32 = arith.constant 0 : i32
    %c0_i32_0 = arith.constant 0 : i32
    return %arg0, %c0_i32 : i32, i32
  }
  func.func @transform_1(%arg0: i32, %arg1: i32) -> (i32, i32) {
    %c0_i32 = arith.constant 0 : i32
    %c0_i32_0 = arith.constant 0 : i32
    %c0_i32_1 = arith.constant 0 : i32
    return %c0_i32, %c0_i32_0 : i32, i32
  }
  func.func @transform_2(%arg0: i32, %arg1: i32) -> (i32, i32) {
    %c0_i32 = arith.constant 0 : i32
    %c0_i32_0 = arith.constant 0 : i32
    %c0_i32_1 = arith.constant 0 : i32
    return %c0_i32, %c0_i32_0 : i32, i32
  }
  func.func @transform_3(%arg0: i32, %arg1: i32) -> (i32, i32) {
    %c0_i32 = arith.constant 0 : i32
    %c0_i32_0 = arith.constant 0 : i32
    return %c0_i32, %arg1 : i32, i32
  }
  func.func @transform_4(%arg0: i32, %arg1: i32) -> (i32, i32) {
    %c0_i32 = arith.constant 0 : i32
    %c0_i32_0 = arith.constant 0 : i32
    return %c0_i32, %arg1 : i32, i32
  }
  func.func @transform_5(%arg0: i32, %arg1: i32) -> (i32, i32) {
    %c0_i32 = arith.constant 0 : i32
    return %arg0, %arg1 : i32, i32
  }
}

module attributes {stable_mosaic.version = 11 : i64} {
  func.func @_fused_linear_kernel(%arg0: i32, %arg1: i32, %arg2: memref<16x64xf32, #tpu.memory_space<vmem>>, %arg3: memref<1x64xf32, #tpu.memory_space<vmem>>, %arg4: memref<1x64xf32, #tpu.memory_space<vmem>>, %arg5: memref<64x192xbf16, #tpu.memory_space<vmem>>, %arg6: memref<1x192xf32, #tpu.memory_space<vmem>>, %arg7: memref<16x192xbf16, #tpu.memory_space<vmem>>, %arg8: memref<16x64xbf16, #tpu.memory_space<vmem>>) attributes {dimension_semantics = [#tpu.dimension_semantics<parallel>, #tpu.dimension_semantics<arbitrary>], iteration_bounds = array<i64: 1, 1>, scalar_prefetch = 0 : i64, scratch_operands = 1 : i64, tpu.core_type = #tpu.core_type<tc>, window_params = [{transform_indices = @transform_0, window_bounds = array<i64: 16, 64>}, {pipeline_mode = #tpu.pipeline_mode<synchronous>, transform_indices = @transform_1, window_bounds = array<i64: 1, 64>}, {pipeline_mode = #tpu.pipeline_mode<synchronous>, transform_indices = @transform_2, window_bounds = array<i64: 1, 64>}, {transform_indices = @transform_3, window_bounds = array<i64: 64, 192>}, {transform_indices = @transform_4, window_bounds = array<i64: 1, 192>}, {transform_indices = @transform_5, window_bounds = array<i64: 16, 192>}]} {
    %c0_i32 = arith.constant 0 : i32
    %0 = arith.cmpi eq, %arg1, %c0_i32 : i32
    %1 = arith.extui %0 : i1 to i32
    %c0_i32_0 = arith.constant 0 : i32
    %2 = arith.cmpi ne, %1, %c0_i32_0 : i32
    scf.if %2 {
      %c0_8 = arith.constant 0 : index
      %c0_9 = arith.constant 0 : index
      %11 = vector.load %arg2[%c0_8, %c0_9] : memref<16x64xf32, #tpu.memory_space<vmem>>, vector<16x64xf32>
      %cst_10 = arith.constant dense<0.000000e+00> : vector<16xf32>
      %12 = vector.multi_reduction <add>, %11, %cst_10 [1] : vector<16x64xf32> to vector<16xf32>
      %13 = vector.shape_cast %12 : vector<16xf32> to vector<16x1xf32>
      %cst_11 = arith.constant 6.400000e+01 : f32
      %14 = vector.broadcast %cst_11 : f32 to vector<16x1xf32>
      %15 = arith.divf %13, %14 : vector<16x1xf32>
      %16 = vector.broadcast %15 : vector<16x1xf32> to vector<16x64xf32>
      %17 = arith.subf %11, %16 : vector<16x64xf32>
      %18 = arith.mulf %17, %17 : vector<16x64xf32>
      %cst_12 = arith.constant dense<0.000000e+00> : vector<16xf32>
      %19 = vector.multi_reduction <add>, %18, %cst_12 [1] : vector<16x64xf32> to vector<16xf32>
      %20 = vector.shape_cast %19 : vector<16xf32> to vector<16x1xf32>
      %cst_13 = arith.constant 6.400000e+01 : f32
      %21 = vector.broadcast %cst_13 : f32 to vector<16x1xf32>
      %22 = arith.divf %20, %21 : vector<16x1xf32>
      %23 = vector.broadcast %15 : vector<16x1xf32> to vector<16x64xf32>
      %24 = arith.subf %11, %23 : vector<16x64xf32>
      %cst_14 = arith.constant 9.99999974E-6 : f32
      %25 = vector.broadcast %cst_14 : f32 to vector<16x1xf32>
      %26 = arith.addf %22, %25 : vector<16x1xf32>
      %27 = math.rsqrt %26 : vector<16x1xf32>
      %28 = vector.broadcast %27 : vector<16x1xf32> to vector<16x64xf32>
      %29 = arith.mulf %24, %28 : vector<16x64xf32>
      %c0_15 = arith.constant 0 : index
      %c0_16 = arith.constant 0 : index
      %30 = vector.load %arg3[%c0_15, %c0_16] : memref<1x64xf32, #tpu.memory_space<vmem>>, vector<1x64xf32>
      %31 = vector.broadcast %30 : vector<1x64xf32> to vector<16x64xf32>
      %32 = arith.mulf %29, %31 : vector<16x64xf32>
      %c0_17 = arith.constant 0 : index
      %c0_18 = arith.constant 0 : index
      %33 = vector.load %arg4[%c0_17, %c0_18] : memref<1x64xf32, #tpu.memory_space<vmem>>, vector<1x64xf32>
      %34 = vector.broadcast %33 : vector<1x64xf32> to vector<16x64xf32>
      %35 = arith.addf %32, %34 : vector<16x64xf32>
      %36 = arith.truncf %35 : vector<16x64xf32> to vector<16x64xbf16>
      %c0_19 = arith.constant 0 : index
      %c0_20 = arith.constant 0 : index
      %37 = vector.load %arg8[%c0_19, %c0_20] : memref<16x64xbf16, #tpu.memory_space<vmem>>, vector<16x64xbf16>
      tpu.vector_store %arg8[%c0_19, %c0_20], %36 {strides = array<i32>} : memref<16x64xbf16, #tpu.memory_space<vmem>>, vector<16x64xbf16>,
    } else {
    }
    %c0 = arith.constant 0 : index
    %c0_1 = arith.constant 0 : index
    %3 = vector.load %arg8[%c0, %c0_1] : memref<16x64xbf16, #tpu.memory_space<vmem>>, vector<16x64xbf16>
    %c0_2 = arith.constant 0 : index
    %c0_3 = arith.constant 0 : index
    %4 = vector.load %arg5[%c0_2, %c0_3] : memref<64x192xbf16, #tpu.memory_space<vmem>>, vector<64x192xbf16>
    %cst = arith.constant dense<0.000000e+00> : vector<16x192xf32>
    %5 = tpu.matmul %3, %4, %cst {dimension_numbers = #tpu.dot_dimension_numbers<[1], [0], [0], [1], [0, 0, 1, 1], [], []>} : vector<16x64xbf16>, vector<64x192xbf16>, vector<16x192xf32> -> vector<16x192xf32>
    %c0_4 = arith.constant 0 : index
    %c0_5 = arith.constant 0 : index
    %6 = vector.load %arg6[%c0_4, %c0_5] : memref<1x192xf32, #tpu.memory_space<vmem>>, vector<1x192xf32>
    %7 = vector.broadcast %6 : vector<1x192xf32> to vector<16x192xf32>
    %8 = arith.addf %5, %7 : vector<16x192xf32>
    %9 = arith.truncf %8 : vector<16x192xf32> to vector<16x192xbf16>
    %c0_6 = arith.constant 0 : index
    %c0_7 = arith.constant 0 : index
    %10 = vector.load %arg7[%c0_6, %c0_7] : memref<16x192xbf16, #tpu.memory_space<vmem>>, vector<16x192xbf16>
    tpu.vector_store %arg7[%c0_6, %c0_7], %9 {strides = array<i32>} : memref<16x192xbf16, #tpu.memory_space<vmem>>, vector<16x192xbf16>,
    return
  }
  func.func @transform_0(%arg0: i32, %arg1: i32) -> (i32, i32) {
    %c0_i32 = arith.constant 0 : i32
    %c0_i32_0 = arith.constant 0 : i32
    return %arg0, %c0_i32 : i32, i32
  }
  func.func @transform_1(%arg0: i32, %arg1: i32) -> (i32, i32) {
    %c0_i32 = arith.constant 0 : i32
    %c0_i32_0 = arith.constant 0 : i32
    %c0_i32_1 = arith.constant 0 : i32
    return %c0_i32, %c0_i32_0 : i32, i32
  }
  func.func @transform_2(%arg0: i32, %arg1: i32) -> (i32, i32) {
    %c0_i32 = arith.constant 0 : i32
    %c0_i32_0 = arith.constant 0 : i32
    %c0_i32_1 = arith.constant 0 : i32
    return %c0_i32, %c0_i32_0 : i32, i32
  }
  func.func @transform_3(%arg0: i32, %arg1: i32) -> (i32, i32) {
    %c0_i32 = arith.constant 0 : i32
    %c0_i32_0 = arith.constant 0 : i32
    return %c0_i32, %arg1 : i32, i32
  }
  func.func @transform_4(%arg0: i32, %arg1: i32) -> (i32, i32) {
    %c0_i32 = arith.constant 0 : i32
    %c0_i32_0 = arith.constant 0 : i32
    return %c0_i32, %arg1 : i32, i32
  }
  func.func @transform_5(%arg0: i32, %arg1: i32) -> (i32, i32) {
    %c0_i32 = arith.constant 0 : i32
    return %arg0, %arg1 : i32, i32
  }
}

module attributes {stable_mosaic.version = 11 : i64} {
  func.func @_fused_linear_kernel(%arg0: i32, %arg1: i32, %arg2: memref<16x256xbf16, #tpu.memory_space<vmem>>, %arg3: memref<256x64xbf16, #tpu.memory_space<vmem>>, %arg4: memref<1x64xf32, #tpu.memory_space<vmem>>, %arg5: memref<16x64xf32, #tpu.memory_space<vmem>>, %arg6: memref<16x64xf32, #tpu.memory_space<vmem>>) attributes {dimension_semantics = [#tpu.dimension_semantics<parallel>, #tpu.dimension_semantics<parallel>], iteration_bounds = array<i64: 1, 1>, scalar_prefetch = 0 : i64, scratch_operands = 0 : i64, tpu.core_type = #tpu.core_type<tc>, window_params = [{transform_indices = @transform_0, window_bounds = array<i64: 16, 256>}, {transform_indices = @transform_1, window_bounds = array<i64: 256, 64>}, {transform_indices = @transform_2, window_bounds = array<i64: 1, 64>}, {transform_indices = @transform_3, window_bounds = array<i64: 16, 64>}, {transform_indices = @transform_4, window_bounds = array<i64: 16, 64>}]} {
    %c0 = arith.constant 0 : index
    %c0_0 = arith.constant 0 : index
    %0 = vector.load %arg2[%c0, %c0_0] : memref<16x256xbf16, #tpu.memory_space<vmem>>, vector<16x256xbf16>
    %c0_1 = arith.constant 0 : index
    %c0_2 = arith.constant 0 : index
    %1 = vector.load %arg3[%c0_1, %c0_2] : memref<256x64xbf16, #tpu.memory_space<vmem>>, vector<256x64xbf16>
    %cst = arith.constant dense<0.000000e+00> : vector<16x64xf32>
    %2 = tpu.matmul %0, %1, %cst {dimension_numbers = #tpu.dot_dimension_numbers<[1], [0], [0], [1], [0, 0, 1, 1], [], []>} : vector<16x256xbf16>, vector<256x64xbf16>, vector<16x64xf32> -> vector<16x64xf32>
    %c0_3 = arith.constant 0 : index
    %c0_4 = arith.constant 0 : index
    %3 = vector.load %arg4[%c0_3, %c0_4] : memref<1x64xf32, #tpu.memory_space<vmem>>, vector<1x64xf32>
    %4 = vector.broadcast %3 : vector<1x64xf32> to vector<16x64xf32>
    %5 = arith.addf %2, %4 : vector<16x64xf32>
    %c0_5 = arith.constant 0 : index
    %c0_6 = arith.constant 0 : index
    %6 = vector.load %arg5[%c0_5, %c0_6] : memref<16x64xf32, #tpu.memory_space<vmem>>, vector<16x64xf32>
    %7 = arith.addf %5, %6 : vector<16x64xf32>
    %c0_7 = arith.constant 0 : index
    %c0_8 = arith.constant 0 : index
    %8 = vector.load %arg6[%c0_7, %c0_8] : memref<16x64xf32, #tpu.memory_space<vmem>>, vector<16x64xf32>
    tpu.vector_store %arg6[%c0_7, %c0_8], %7 {strides = array<i32>} : memref<16x64xf32, #tpu.memory_space<vmem>>, vector<16x64xf32>,
    return
  }
  func.func @transform_0(%arg0: i32, %arg1: i32) -> (i32, i32) {
    %c0_i32 = arith.constant 0 : i32
    %c0_i32_0 = arith.constant 0 : i32
    return %arg0, %c0_i32 : i32, i32
  }
  func.func @transform_1(%arg0: i32, %arg1: i32) -> (i32, i32) {
    %c0_i32 = arith.constant 0 : i32
    %c0_i32_0 = arith.constant 0 : i32
    return %c0_i32, %arg1 : i32, i32
  }
  func.func @transform_2(%arg0: i32, %arg1: i32) -> (i32, i32) {
    %c0_i32 = arith.constant 0 : i32
    %c0_i32_0 = arith.constant 0 : i32
    return %c0_i32, %arg1 : i32, i32
  }
  func.func @transform_3(%arg0: i32, %arg1: i32) -> (i32, i32) {
    %c0_i32 = arith.constant 0 : i32
    return %arg0, %arg1 : i32, i32
  }
  func.func @transform_4(%arg0: i32, %arg1: i32) -> (i32, i32) {
    %c0_i32 = arith.constant 0 : i32
    return %arg0, %arg1 : i32, i32
  }
}

module attributes {stable_mosaic.version = 11 : i64} {
  func.func @_ln_pool_kernel(%arg0: i32, %arg1: memref<1x8x64xf32, #tpu.memory_space<vmem>>, %arg2: memref<1x64xf32, #tpu.memory_space<vmem>>, %arg3: memref<1x64xf32, #tpu.memory_space<vmem>>, %arg4: memref<64x1xf32, #tpu.memory_space<vmem>>, %arg5: memref<1x1xf32, #tpu.memory_space<vmem>>, %arg6: memref<1x1x64xf32, #tpu.memory_space<vmem>>) attributes {dimension_semantics = [#tpu.dimension_semantics<parallel>], iteration_bounds = array<i64: 2>, scalar_prefetch = 0 : i64, scratch_operands = 0 : i64, tpu.core_type = #tpu.core_type<tc>, window_params = [{transform_indices = @transform_0, window_bounds = array<i64: 1, 8, 64>}, {pipeline_mode = #tpu.pipeline_mode<synchronous>, transform_indices = @transform_1, window_bounds = array<i64: 1, 64>}, {pipeline_mode = #tpu.pipeline_mode<synchronous>, transform_indices = @transform_2, window_bounds = array<i64: 1, 64>}, {pipeline_mode = #tpu.pipeline_mode<synchronous>, transform_indices = @transform_3, window_bounds = array<i64: 64, 1>}, {pipeline_mode = #tpu.pipeline_mode<synchronous>, transform_indices = @transform_4, window_bounds = array<i64: 1, 1>}, {transform_indices = @transform_5, window_bounds = array<i64: 1, 1, 64>}]} {
    %c0 = arith.constant 0 : index
    %c0_0 = arith.constant 0 : index
    %c0_1 = arith.constant 0 : index
    %0 = vector.load %arg1[%c0, %c0_0, %c0_1] : memref<1x8x64xf32, #tpu.memory_space<vmem>>, vector<1x8x64xf32>
    %1 = vector.shape_cast %0 : vector<1x8x64xf32> to vector<8x64xf32>
    %cst = arith.constant dense<0.000000e+00> : vector<8xf32>
    %2 = vector.multi_reduction <add>, %1, %cst [1] : vector<8x64xf32> to vector<8xf32>
    %3 = vector.shape_cast %2 : vector<8xf32> to vector<8x1xf32>
    %cst_2 = arith.constant 6.400000e+01 : f32
    %4 = vector.broadcast %cst_2 : f32 to vector<8x1xf32>
    %5 = arith.divf %3, %4 : vector<8x1xf32>
    %6 = vector.broadcast %5 : vector<8x1xf32> to vector<8x64xf32>
    %7 = arith.subf %1, %6 : vector<8x64xf32>
    %8 = arith.mulf %7, %7 : vector<8x64xf32>
    %cst_3 = arith.constant dense<0.000000e+00> : vector<8xf32>
    %9 = vector.multi_reduction <add>, %8, %cst_3 [1] : vector<8x64xf32> to vector<8xf32>
    %10 = vector.shape_cast %9 : vector<8xf32> to vector<8x1xf32>
    %cst_4 = arith.constant 6.400000e+01 : f32
    %11 = vector.broadcast %cst_4 : f32 to vector<8x1xf32>
    %12 = arith.divf %10, %11 : vector<8x1xf32>
    %13 = vector.broadcast %5 : vector<8x1xf32> to vector<8x64xf32>
    %14 = arith.subf %1, %13 : vector<8x64xf32>
    %cst_5 = arith.constant 9.99999974E-6 : f32
    %15 = vector.broadcast %cst_5 : f32 to vector<8x1xf32>
    %16 = arith.addf %12, %15 : vector<8x1xf32>
    %17 = math.rsqrt %16 : vector<8x1xf32>
    %18 = vector.broadcast %17 : vector<8x1xf32> to vector<8x64xf32>
    %19 = arith.mulf %14, %18 : vector<8x64xf32>
    %c0_6 = arith.constant 0 : index
    %c0_7 = arith.constant 0 : index
    %20 = vector.load %arg2[%c0_6, %c0_7] : memref<1x64xf32, #tpu.memory_space<vmem>>, vector<1x64xf32>
    %21 = vector.broadcast %20 : vector<1x64xf32> to vector<8x64xf32>
    %22 = arith.mulf %19, %21 : vector<8x64xf32>
    %c0_8 = arith.constant 0 : index
    %c0_9 = arith.constant 0 : index
    %23 = vector.load %arg3[%c0_8, %c0_9] : memref<1x64xf32, #tpu.memory_space<vmem>>, vector<1x64xf32>
    %24 = vector.broadcast %23 : vector<1x64xf32> to vector<8x64xf32>
    %25 = arith.addf %22, %24 : vector<8x64xf32>
    %26 = arith.truncf %25 : vector<8x64xf32> to vector<8x64xbf16>
    %c0_10 = arith.constant 0 : index
    %c0_11 = arith.constant 0 : index
    %27 = vector.load %arg4[%c0_10, %c0_11] : memref<64x1xf32, #tpu.memory_space<vmem>>, vector<64x1xf32>
    %28 = arith.truncf %27 : vector<64x1xf32> to vector<64x1xbf16>
    %cst_12 = arith.constant dense<0.000000e+00> : vector<8x1xf32>
    %29 = tpu.matmul %26, %28, %cst_12 {dimension_numbers = #tpu.dot_dimension_numbers<[1], [0], [0], [1], [0, 0, 1, 1], [], []>} : vector<8x64xbf16>, vector<64x1xbf16>, vector<8x1xf32> -> vector<8x1xf32>
    %c0_13 = arith.constant 0 : index
    %c0_14 = arith.constant 0 : index
    %30 = vector.load %arg5[%c0_13, %c0_14] : memref<1x1xf32, #tpu.memory_space<vmem>>, vector<1x1xf32>
    %31 = vector.broadcast %30 : vector<1x1xf32> to vector<8x1xf32>
    %32 = arith.addf %29, %31 : vector<8x1xf32>
    %cst_15 = arith.constant dense<0xFF800000> : vector<1xf32>
    %33 = vector.multi_reduction <maximumf>, %32, %cst_15 [0] : vector<8x1xf32> to vector<1xf32>
    %34 = vector.shape_cast %33 : vector<1xf32> to vector<1x1xf32>
    %35 = vector.broadcast %34 : vector<1x1xf32> to vector<8x1xf32>
    %36 = arith.subf %32, %35 : vector<8x1xf32>
    %37 = math.exp %36 : vector<8x1xf32>
    %cst_16 = arith.constant dense<0.000000e+00> : vector<1xf32>
    %38 = vector.multi_reduction <add>, %37, %cst_16 [0] : vector<8x1xf32> to vector<1xf32>
    %39 = vector.shape_cast %38 : vector<1xf32> to vector<1x1xf32>
    %40 = tpu.reciprocal %39 {approx = true} : vector<1x1xf32> -> vector<1x1xf32>
    %41 = vector.broadcast %40 : vector<1x1xf32> to vector<8x1xf32>
    %42 = arith.mulf %37, %41 : vector<8x1xf32>
    %43 = arith.truncf %42 : vector<8x1xf32> to vector<8x1xbf16>
    "tpu.trace_start"() <{level = 10 : i32, message = "sq,sd->qd"}> : () -> ()
    %cst_17 = arith.constant dense<0.000000e+00> : vector<1x64xf32>
    %44 = tpu.matmul %43, %26, %cst_17 {dimension_numbers = #tpu.dot_dimension_numbers<[0], [0], [1], [1], [0, 1, 1, 1], [], []>} : vector<8x1xbf16>, vector<8x64xbf16>, vector<1x64xf32> -> vector<1x64xf32>
    "tpu.trace_stop"() : () -> ()
    %c0_18 = arith.constant 0 : index
    %c0_19 = arith.constant 0 : index
    %c0_20 = arith.constant 0 : index
    %45 = vector.load %arg6[%c0_18, %c0_19, %c0_20] : memref<1x1x64xf32, #tpu.memory_space<vmem>>, vector<1x1x64xf32>
    %46 = vector.shape_cast %45 : vector<1x1x64xf32> to vector<1x64xf32>
    %47 = vector.shape_cast %44 : vector<1x64xf32> to vector<1x1x64xf32>
    tpu.vector_store %arg6[%c0_18, %c0_19, %c0_20], %47 {strides = array<i32>} : memref<1x1x64xf32, #tpu.memory_space<vmem>>, vector<1x1x64xf32>,
    return
  }
  func.func @transform_0(%arg0: i32) -> (i32, i32, i32) {
    %c0_i32 = arith.constant 0 : i32
    %c0_i32_0 = arith.constant 0 : i32
    %c0_i32_1 = arith.constant 0 : i32
    return %arg0, %c0_i32, %c0_i32_0 : i32, i32, i32
  }
  func.func @transform_1(%arg0: i32) -> (i32, i32) {
    %c0_i32 = arith.constant 0 : i32
    %c0_i32_0 = arith.constant 0 : i32
    %c0_i32_1 = arith.constant 0 : i32
    return %c0_i32, %c0_i32_0 : i32, i32
  }
  func.func @transform_2(%arg0: i32) -> (i32, i32) {
    %c0_i32 = arith.constant 0 : i32
    %c0_i32_0 = arith.constant 0 : i32
    %c0_i32_1 = arith.constant 0 : i32
    return %c0_i32, %c0_i32_0 : i32, i32
  }
  func.func @transform_3(%arg0: i32) -> (i32, i32) {
    %c0_i32 = arith.constant 0 : i32
    %c0_i32_0 = arith.constant 0 : i32
    %c0_i32_1 = arith.constant 0 : i32
    return %c0_i32, %c0_i32_0 : i32, i32
  }
  func.func @transform_4(%arg0: i32) -> (i32, i32) {
    %c0_i32 = arith.constant 0 : i32
    %c0_i32_0 = arith.constant 0 : i32
    %c0_i32_1 = arith.constant 0 : i32
    return %c0_i32, %c0_i32_0 : i32, i32
  }
  func.func @transform_5(%arg0: i32) -> (i32, i32, i32) {
    %c0_i32 = arith.constant 0 : i32
    %c0_i32_0 = arith.constant 0 : i32
    %c0_i32_1 = arith.constant 0 : i32
    return %arg0, %c0_i32, %c0_i32_0 : i32, i32, i32
  }
}

module attributes {stable_mosaic.version = 11 : i64} {
  func.func @_head_kernel(%arg0: i32, %arg1: memref<2x64xf32, #tpu.memory_space<vmem>>, %arg2: memref<64x128xbf16, #tpu.memory_space<vmem>>, %arg3: memref<1x128xf32, #tpu.memory_space<vmem>>, %arg4: memref<128x64xbf16, #tpu.memory_space<vmem>>, %arg5: memref<1x64xf32, #tpu.memory_space<vmem>>, %arg6: memref<64x4xbf16, #tpu.memory_space<vmem>>, %arg7: memref<1x4xf32, #tpu.memory_space<vmem>>, %arg8: memref<2x4xf32, #tpu.memory_space<vmem>>, %arg9: memref<2x4xf32, #tpu.memory_space<vmem>>, %arg10: memref<1x1xf32, #tpu.memory_space<vmem>>) attributes {dimension_semantics = [#tpu.dimension_semantics<arbitrary>], iteration_bounds = array<i64: 1>, scalar_prefetch = 0 : i64, scratch_operands = 0 : i64, tpu.core_type = #tpu.core_type<tc>, window_params = [{pipeline_mode = #tpu.pipeline_mode<synchronous>, transform_indices = @transform_0, window_bounds = array<i64: 2, 64>}, {pipeline_mode = #tpu.pipeline_mode<synchronous>, transform_indices = @transform_1, window_bounds = array<i64: 64, 128>}, {pipeline_mode = #tpu.pipeline_mode<synchronous>, transform_indices = @transform_2, window_bounds = array<i64: 1, 128>}, {pipeline_mode = #tpu.pipeline_mode<synchronous>, transform_indices = @transform_3, window_bounds = array<i64: 128, 64>}, {pipeline_mode = #tpu.pipeline_mode<synchronous>, transform_indices = @transform_4, window_bounds = array<i64: 1, 64>}, {pipeline_mode = #tpu.pipeline_mode<synchronous>, transform_indices = @transform_5, window_bounds = array<i64: 64, 4>}, {pipeline_mode = #tpu.pipeline_mode<synchronous>, transform_indices = @transform_6, window_bounds = array<i64: 1, 4>}, {pipeline_mode = #tpu.pipeline_mode<synchronous>, transform_indices = @transform_7, window_bounds = array<i64: 2, 4>}, {pipeline_mode = #tpu.pipeline_mode<synchronous>, transform_indices = @transform_8, window_bounds = array<i64: 2, 4>}, {pipeline_mode = #tpu.pipeline_mode<synchronous>, transform_indices = @transform_9, window_bounds = array<i64: 1, 1>}]} {
    %c0 = arith.constant 0 : index
    %c0_0 = arith.constant 0 : index
    %0 = vector.load %arg1[%c0, %c0_0] : memref<2x64xf32, #tpu.memory_space<vmem>>, vector<2x64xf32>
    %c0_1 = arith.constant 0 : index
    %c0_2 = arith.constant 0 : index
    %1 = vector.load %arg2[%c0_1, %c0_2] : memref<64x128xbf16, #tpu.memory_space<vmem>>, vector<64x128xbf16>
    %c0_3 = arith.constant 0 : index
    %c0_4 = arith.constant 0 : index
    %2 = vector.load %arg3[%c0_3, %c0_4] : memref<1x128xf32, #tpu.memory_space<vmem>>, vector<1x128xf32>
    %3 = arith.truncf %0 : vector<2x64xf32> to vector<2x64xbf16>
    %cst = arith.constant dense<0.000000e+00> : vector<2x128xf32>
    %4 = tpu.matmul %3, %1, %cst {dimension_numbers = #tpu.dot_dimension_numbers<[1], [0], [0], [1], [0, 0, 1, 1], [], []>} : vector<2x64xbf16>, vector<64x128xbf16>, vector<2x128xf32> -> vector<2x128xf32>
    %5 = vector.broadcast %2 : vector<1x128xf32> to vector<2x128xf32>
    %6 = arith.addf %4, %5 : vector<2x128xf32>
    %cst_5 = arith.constant 0.000000e+00 : f32
    %7 = vector.broadcast %cst_5 : f32 to vector<2x128xf32>
    %8 = arith.maximumf %6, %7 : vector<2x128xf32>
    %c0_6 = arith.constant 0 : index
    %c0_7 = arith.constant 0 : index
    %9 = vector.load %arg4[%c0_6, %c0_7] : memref<128x64xbf16, #tpu.memory_space<vmem>>, vector<128x64xbf16>
    %c0_8 = arith.constant 0 : index
    %c0_9 = arith.constant 0 : index
    %10 = vector.load %arg5[%c0_8, %c0_9] : memref<1x64xf32, #tpu.memory_space<vmem>>, vector<1x64xf32>
    %11 = arith.truncf %8 : vector<2x128xf32> to vector<2x128xbf16>
    %cst_10 = arith.constant dense<0.000000e+00> : vector<2x64xf32>
    %12 = tpu.matmul %11, %9, %cst_10 {dimension_numbers = #tpu.dot_dimension_numbers<[1], [0], [0], [1], [0, 0, 1, 1], [], []>} : vector<2x128xbf16>, vector<128x64xbf16>, vector<2x64xf32> -> vector<2x64xf32>
    %13 = vector.broadcast %10 : vector<1x64xf32> to vector<2x64xf32>
    %14 = arith.addf %12, %13 : vector<2x64xf32>
    %cst_11 = arith.constant 0.000000e+00 : f32
    %15 = vector.broadcast %cst_11 : f32 to vector<2x64xf32>
    %16 = arith.maximumf %14, %15 : vector<2x64xf32>
    %c0_12 = arith.constant 0 : index
    %c0_13 = arith.constant 0 : index
    %17 = vector.load %arg6[%c0_12, %c0_13] : memref<64x4xbf16, #tpu.memory_space<vmem>>, vector<64x4xbf16>
    %c0_14 = arith.constant 0 : index
    %c0_15 = arith.constant 0 : index
    %18 = vector.load %arg7[%c0_14, %c0_15] : memref<1x4xf32, #tpu.memory_space<vmem>>, vector<1x4xf32>
    %19 = arith.truncf %16 : vector<2x64xf32> to vector<2x64xbf16>
    %cst_16 = arith.constant dense<0.000000e+00> : vector<2x4xf32>
    %20 = tpu.matmul %19, %17, %cst_16 {dimension_numbers = #tpu.dot_dimension_numbers<[1], [0], [0], [1], [0, 0, 1, 1], [], []>} : vector<2x64xbf16>, vector<64x4xbf16>, vector<2x4xf32> -> vector<2x4xf32>
    %21 = vector.broadcast %18 : vector<1x4xf32> to vector<2x4xf32>
    %22 = arith.addf %20, %21 : vector<2x4xf32>
    %c0_17 = arith.constant 0 : index
    %c0_18 = arith.constant 0 : index
    %23 = vector.load %arg8[%c0_17, %c0_18] : memref<2x4xf32, #tpu.memory_space<vmem>>, vector<2x4xf32>
    %c0_19 = arith.constant 0 : index
    %c0_20 = arith.constant 0 : index
    %24 = vector.load %arg9[%c0_19, %c0_20] : memref<2x4xf32, #tpu.memory_space<vmem>>, vector<2x4xf32>
    tpu.vector_store %arg9[%c0_19, %c0_20], %22 {strides = array<i32>} : memref<2x4xf32, #tpu.memory_space<vmem>>, vector<2x4xf32>,
    %25 = arith.subf %22, %23 : vector<2x4xf32>
    %26 = arith.mulf %25, %25 : vector<2x4xf32>
    %27 = vector.shape_cast %26 : vector<2x4xf32> to vector<1x2x4xf32>
    %cst_21 = arith.constant dense<0.000000e+00> : vector<1xf32>
    %28 = vector.multi_reduction <add>, %27, %cst_21 [1, 2] : vector<1x2x4xf32> to vector<1xf32>
    %29 = vector.shape_cast %28 : vector<1xf32> to vector<1x1x1xf32>
    %30 = vector.extract %29[0, 0, 0] : f32 from vector<1x1x1xf32>
    %cst_22 = arith.constant 8.000000e+00 : f32
    %31 = arith.divf %30, %cst_22 : f32
    %32 = vector.broadcast %31 : f32 to vector<1x1xf32>
    %c0_23 = arith.constant 0 : index
    %c0_24 = arith.constant 0 : index
    %33 = vector.load %arg10[%c0_23, %c0_24] : memref<1x1xf32, #tpu.memory_space<vmem>>, vector<1x1xf32>
    tpu.vector_store %arg10[%c0_23, %c0_24], %32 {strides = array<i32>} : memref<1x1xf32, #tpu.memory_space<vmem>>, vector<1x1xf32>,
    return
  }
  func.func @transform_0(%arg0: i32) -> (i32, i32) {
    %c0_i32 = arith.constant 0 : i32
    %c0_i32_0 = arith.constant 0 : i32
    %c0_i32_1 = arith.constant 0 : i32
    return %c0_i32, %c0_i32_0 : i32, i32
  }
  func.func @transform_1(%arg0: i32) -> (i32, i32) {
    %c0_i32 = arith.constant 0 : i32
    %c0_i32_0 = arith.constant 0 : i32
    %c0_i32_1 = arith.constant 0 : i32
    return %c0_i32, %c0_i32_0 : i32, i32
  }
  func.func @transform_2(%arg0: i32) -> (i32, i32) {
    %c0_i32 = arith.constant 0 : i32
    %c0_i32_0 = arith.constant 0 : i32
    %c0_i32_1 = arith.constant 0 : i32
    return %c0_i32, %c0_i32_0 : i32, i32
  }
  func.func @transform_3(%arg0: i32) -> (i32, i32) {
    %c0_i32 = arith.constant 0 : i32
    %c0_i32_0 = arith.constant 0 : i32
    %c0_i32_1 = arith.constant 0 : i32
    return %c0_i32, %c0_i32_0 : i32, i32
  }
  func.func @transform_4(%arg0: i32) -> (i32, i32) {
    %c0_i32 = arith.constant 0 : i32
    %c0_i32_0 = arith.constant 0 : i32
    %c0_i32_1 = arith.constant 0 : i32
    return %c0_i32, %c0_i32_0 : i32, i32
  }
  func.func @transform_5(%arg0: i32) -> (i32, i32) {
    %c0_i32 = arith.constant 0 : i32
    %c0_i32_0 = arith.constant 0 : i32
    %c0_i32_1 = arith.constant 0 : i32
    return %c0_i32, %c0_i32_0 : i32, i32
  }
  func.func @transform_6(%arg0: i32) -> (i32, i32) {
    %c0_i32 = arith.constant 0 : i32
    %c0_i32_0 = arith.constant 0 : i32
    %c0_i32_1 = arith.constant 0 : i32
    return %c0_i32, %c0_i32_0 : i32, i32
  }
  func.func @transform_7(%arg0: i32) -> (i32, i32) {
    %c0_i32 = arith.constant 0 : i32
    %c0_i32_0 = arith.constant 0 : i32
    %c0_i32_1 = arith.constant 0 : i32
    return %c0_i32, %c0_i32_0 : i32, i32
  }
  func.func @transform_8(%arg0: i32) -> (i32, i32) {
    %c0_i32 = arith.constant 0 : i32
    %c0_i32_0 = arith.constant 0 : i32
    %c0_i32_1 = arith.constant 0 : i32
    return %c0_i32, %c0_i32_0 : i32, i32
  }
  func.func @transform_9(%arg0: i32) -> (i32, i32) {
    %c0_i32 = arith.constant 0 : i32
    %c0_i32_0 = arith.constant 0 : i32
    %c0_i32_1 = arith.constant 0 : i32
    return %c0_i32, %c0_i32_0 : i32, i32
  }
}

</mosaic_0001>

<bundles_post_ra>
// kernel: gpt2_forecaster_forward.12
= control target key start
LH: loop header
LB: loop body
LE: loop exit
PB: predicated region body
PF: predicated region fallthrough
CT: control target
= control target key end

     0   :  { %10 = vsyncpa [#allocation4], 0  ;;  %s588_s0 = inlined_call_operand.hbm [shape: f32[16,64], index: 0, kind: input, shape index: {}]   ;;  %s589_s1 = inlined_call_operand.hbm [shape: f32[1,64], index: 1, kind: input, shape index: {}]   ;;  %s590_s2 = inlined_call_operand.hbm [shape: f32[1,64], index: 2, kind: input, shape index: {}]   ;;  %s591_s3 = inlined_call_operand.hbm [shape: bf16[64,192], index: 3, kind: input, shape index: {}]   ;;  %s592_s4 = inlined_call_operand.hbm [shape: f32[1,192], index: 4, kind: input, shape index: {}]   ;;  %s593_s5 = inlined_call_operand.hbm [shape: bf16[16,192], index: 5, kind: output, shape index: {}]  }
   0x1   :  { %11 = vsyncpa [#allocation7], 0 }
   0x2   :  { %12 = vsyncpa [#allocation10], 0 }
   0x3   :  { %13 = vsyncpa [#allocation5], 0  ;;  %s462_s18 = smov [#allocation6]   ;;  %s322_s22 = scalar_lea.hbm %s589_s1, 16 }
   0x4   :  { %s32_s19 = sshll.u32 %s462_s18, 4  ;;  %p323_p0 = scmp.ne.s32.totalorder %s589_s1, %s322_s22  ;;  %s33_s19 = int_to_ptr.vmem [resolvable:$true] %s32_s19 }
   0x5   :  { %p326_p1 = scmp.lt.u32.totalorder %s322_s22, %s589_s1 }
   0x7   :  { %p328_p2 = pnand %p326_p1, %p323_p0 }
   0x9   :  { %331 = shalt.err (!%p328_p2)
}
   0xa   :  { %s332_s27 = scalar_lea.vmem %s33_s19, 16  ;;  %s336_s28 = scalar_lea.vmem %s33_s19, 32 }
   0xb   :  { %p333_p3 = scmp.ne.s32.totalorder %s33_s19, %s332_s27  ;;  %p337_p4 = scmp.lt.s32.totalorder %s33_s19, %s33_s19 }
   0xc   :  { %p338_p5 = scmp.lt.s32.totalorder %s336_s28, %s332_s27 }
   0xe   :  { %p339_p6 = por %p338_p5, %p337_p4 }
  0x10   :  { %p340_p7 = pnand %p339_p6, %p333_p3 }
  0x12   :  { %343 = shalt.err (!%p340_p7)
}
  0x13   :  { %35 = dma.hbm_to_vmem [thread:$0]  %s589_s1, 16, %s33_s19, [#allocation7]  }
  0x14   :  { %s463_s6 = smov [#allocation9]   ;;  %s464_s8 = smov [#allocation3]  }
  0x15   :  { %s51_s7 = sshll.u32 %s463_s6, 4  ;;  %s19_s9 = sshll.u32 %s464_s8, 4  ;;  %s52_s7 = int_to_ptr.vmem [resolvable:$true] %s51_s7  ;;  %s20_s9 = int_to_ptr.vmem [resolvable:$true] %s19_s9 }
  0x16   :  { %s344_s12 = scalar_lea.hbm %s591_s3, 1024 }
  0x17   :  { %p345_p8 = scmp.ne.s32.totalorder %s591_s3, %s344_s12  ;;  %p348_p9 = scmp.lt.u32.totalorder %s344_s12, %s591_s3 }
  0x19   :  { %p350_p10 = pnand %p348_p9, %p345_p8 }
  0x1b   :  { %353 = shalt.err (!%p350_p10)
}
  0x1c   :  { %s354_s1 = scalar_lea.vmem %s52_s7, 1024  ;;  %p359_p12 = scmp.lt.s32.totalorder %s52_s7, %s52_s7 }
  0x1d   :  { %p355_p11 = scmp.ne.s32.totalorder %s52_s7, %s354_s1  ;;  %p360_p13 = scmp.lt.s32.totalorder %s354_s1, %s354_s1 }
  0x1f   :  { %p361_p0 = por %p360_p13, %p359_p12 }
  0x21   :  { %p362_p1 = pnand %p361_p0, %p355_p11 }
  0x23   :  { %365 = shalt.err (!%p362_p1)
}
  0x24   :  { %s465_s17 = smov 128   ;;  %s466_s18 = smov 8  }
  0x25   :  { %57 = dma.hbm_to_vmem [thread:$0]  %s591_s3, 1024, %s52_s7, [#allocation10], %s465_s17, %s465_s17, %s466_s18  }
  0x26   :  { %s366_s23 = scalar_lea.hbm %s588_s0, 256 }
  0x27   :  { %p367_p2 = scmp.ne.s32.totalorder %s588_s0, %s366_s23  ;;  %p370_p3 = scmp.lt.u32.totalorder %s366_s23, %s588_s0 }
  0x29   :  { %p372_p4 = pnand %p370_p3, %p367_p2 }
  0x2b   :  { %375 = shalt.err (!%p372_p4)
}
  0x2c   :  { %s376_s28 = scalar_lea.vmem %s20_s9, 256  ;;  %p381_p6 = scmp.lt.s32.totalorder %s20_s9, %s20_s9 }
  0x2d   :  { %p377_p5 = scmp.ne.s32.totalorder %s20_s9, %s376_s28  ;;  %p382_p7 = scmp.lt.s32.totalorder %s376_s28, %s376_s28 }
  0x2f   :  { %p383_p8 = por %p382_p7, %p381_p6 }
  0x31   :  { %p384_p9 = pnand %p383_p8, %p377_p5 }
  0x33   :  { %387 = shalt.err (!%p384_p9)
}
  0x34   :  { %25 = dma.hbm_to_vmem [thread:$0]  %s588_s0, 256, %s20_s9, [#allocation4], %s465_s17, %s465_s17, %s466_s18  }
  0x35   :  { %s467_s30 = smov [#allocation8]   ;;  %s468_s7 = smov [#allocation11]  }
  0x36   :  { %s42_s6 = sshll.u32 %s467_s30, 4  ;;  %s64_s8 = sshll.u32 %s468_s7, 4  ;;  %s43_s6 = int_to_ptr.vmem [resolvable:$true] %s42_s6  ;;  %s65_s8 = int_to_ptr.vmem [resolvable:$true] %s64_s8 }
  0x37   :  { %s388_s12 = scalar_lea.hbm %s590_s2, 16 }
  0x38   :  { %p389_p10 = scmp.ne.s32.totalorder %s590_s2, %s388_s12  ;;  %p392_p11 = scmp.lt.u32.totalorder %s388_s12, %s590_s2 }
  0x3a   :  { %p394_p12 = pnand %p392_p11, %p389_p10 }
  0x3c   :  { %397 = shalt.err (!%p394_p12)
}
  0x3d   :  { %s398_s0 = scalar_lea.vmem %s43_s6, 16  ;;  %s402_s9 = scalar_lea.vmem %s43_s6, 32 }
  0x3e   :  { %p399_p13 = scmp.ne.s32.totalorder %s43_s6, %s398_s0  ;;  %p403_p0 = scmp.lt.s32.totalorder %s43_s6, %s43_s6 }
  0x3f   :  { %p404_p1 = scmp.lt.s32.totalorder %s402_s9, %s398_s0 }
  0x41   :  { %p405_p2 = por %p404_p1, %p403_p0 }
  0x43   :  { %p406_p3 = pnand %p405_p2, %p399_p13 }
  0x45   :  { %409 = shalt.err (!%p406_p3)
}
  0x46   :  { %45 = dma.hbm_to_vmem [thread:$0]  %s590_s2, 16, %s43_s6, [#allocation7]  }
  0x47   :  { %s410_s22 = scalar_lea.hbm %s592_s4, 32 }
  0x48   :  { %p411_p4 = scmp.ne.s32.totalorder %s592_s4, %s410_s22  ;;  %p414_p5 = scmp.lt.u32.totalorder %s410_s22, %s592_s4 }
  0x4a   :  { %p416_p6 = pnand %p414_p5, %p411_p4 }
  0x4c   :  { %419 = shalt.err (!%p416_p6)
}
  0x4d   :  { %s420_s27 = scalar_lea.vmem %s65_s8, 32  ;;  %p425_p8 = scmp.lt.s32.totalorder %s65_s8, %s65_s8 }
  0x4e   :  { %p421_p7 = scmp.ne.s32.totalorder %s65_s8, %s420_s27  ;;  %p426_p9 = scmp.lt.s32.totalorder %s420_s27, %s420_s27 }
  0x50   :  { %p427_p10 = por %p426_p9, %p425_p8 }
  0x52   :  { %p428_p11 = pnand %p427_p10, %p421_p7 }
  0x54   :  { %431 = shalt.err (!%p428_p11)
}
  0x55   :  { %67 = dma.hbm_to_vmem [thread:$0]  %s592_s4, 32, %s65_s8, [#allocation10]  }
  0x56   :  { %454 = dma.done.wait [#allocation4], 256  }
  0x57   :  { %455 = vsyncadd [#allocation4], 4294967040 }
  0x58   :  { %456 = dma.done.wait [#allocation7], 32  }
  0x59   :  { %457 = vsyncadd [#allocation7], 4294967264 }
  0x5a   :  { %458 = dma.done.wait [#allocation10], 1056  }
  0x5b   :  { %459 = vsyncadd [#allocation10], 4294966240  ;;  %vm90_vm0 = vcmask 523264   ;;  %v88_v0 = vld [vmem:[#allocation3] sm:$0xff]  ;;  %v89_v1 = vld [vmem:[#allocation3 + $0x8] sm:$0xff]  ;;  %v469_v22 = vmov 0   ;;  %v149_v41 = vlaneseq }
  0x5c   :  { %v91_v2 = vsel %vm90_vm0, %v88_v0, 0.0  ;;  %v94_v3 = vsel %vm90_vm0, %v89_v1, 0.0  ;;  %v306_v14 = vld [vmem:[#allocation9 + $0x4] ss:$8 sps:$4 sm:$0xff]   ;;  %v308_v15 = vld [vmem:[#allocation9] ss:$8 sps:$4 sm:$0xff]   ;;  %235 = vmatprep.mubr.bf16.mxu0 %v469_v22 }
  0x5d   :  { %92 = vadd.xlane.f32.xlu0 %v91_v2  ;;  %203 = vmatprep.subr.bf16.mxu0 %v306_v14  ;;  %v309_v16 = vld [vmem:[#allocation9 + $0x14] ss:$8 sps:$4 sm:$0xff]   ;;  %v311_v17 = vld [vmem:[#allocation9 + $0x10] ss:$8 sps:$4 sm:$0xff]   ;;  %v312_v18 = vld [vmem:[#allocation9 + $0x24] ss:$8 sps:$4 sm:$0xff]  }
  0x5e   :  { %204 = vmatpush1.bf16.msra.mxu0 %v308_v15  ;;  %v314_v19 = vld [vmem:[#allocation9 + $0x20] ss:$8 sps:$4 sm:$0xff]   ;;  %v315_v20 = vld [vmem:[#allocation9 + $0x34] ss:$8 sps:$4 sm:$0xff]   ;;  %v317_v21 = vld [vmem:[#allocation9 + $0x30] ss:$8 sps:$4 sm:$0xff]  }
  0x5f   :  { %205 = vmatprep.subr.bf16.mxu0 %v309_v16  ;;  %v282_v31 = vld [vmem:[#allocation6] ss:$0 sm:$0xff]  ;;  %v283_v35 = vld [vmem:[#allocation8] ss:$0 sm:$0xff]  ;;  %v150_v42 = vshrl.u32 %v149_v41, 7  ;;  %vm258_vm1 = vcmask 1043456  }
  0x60   :  { %v147_v44 = vld [vmem:[#allocation11] sm:$0x3]  ;;  %vm259_vm2 = vcmask 523268   ;;  %s470_s4 = smov [#allocation12]  }
  0x61   :  { %95 = vadd.xlane.f32.xlu0 %v94_v3  ;;  %v151_v43 = vsub.s32 0, %v150_v42  ;;  %v155_v45 = vsub.s32 1, %v150_v42  ;;  %vm260_vm3 = vmor %vm259_vm2, %vm258_vm1  ;;  %s268_s3 = sshll.u32 %s470_s4, 4  ;;  %s269_s3 = int_to_ptr.vmem [resolvable:$true] %s268_s3 }
  0x62   :  { %206 = vmatpush1.bf16.msra.mxu0 %v311_v17  ;;  %s432_s29 = scalar_lea.vmem %s269_s3, 256  ;;  %p437_p13 = scmp.lt.s32.totalorder %s269_s3, %s269_s3 }
  0x63   :  { %207 = vmatprep.subr.bf16.mxu0 %v312_v18  ;;  %v152_v46 = vrot.slane %v147_v44, %v151_v43  ;;  %v156_v47 = vrot.slane %v147_v44, %v155_v45  ;;  %p433_p12 = scmp.ne.s32.totalorder %s269_s3, %s432_s29  ;;  %p438_p0 = scmp.lt.s32.totalorder %s432_s29, %s432_s29 }
  0x65   :  { %p439_p1 = por %p438_p0, %p437_p13 }
  0x66   :  { %208 = vmatpush1.bf16.msra.mxu0 %v314_v19 }
  0x67   :  { %209 = vmatprep.subr.bf16.mxu0 %v315_v20  ;;  %p440_p2 = pnand %p439_p1, %p433_p12 }
  0x6a   :  { %210 = vmatpush1.bf16.msra.mxu0 %v317_v21 }
  0xea   :  { %v93_v4 = vpop.xlane.xlu0 %92 }
  0xeb   :  { %v98_v5 = vmul.f32 0.015625, %v93_v4 }
  0xed   :  { %v100_v6 = vsub.f32 %v88_v0, %v98_v5 }
  0xee   :  { %v96_v7 = vpop.xlane.xlu0 %95 }
  0xef   :  { %v99_v8 = vmul.f32 0.015625, %v96_v7  ;;  %v102_v9 = vmul.f32 %v100_v6, %v100_v6 }
  0xf1   :  { %v101_v10 = vsub.f32 %v89_v1, %v99_v8  ;;  %v104_v11 = vsel %vm90_vm0, %v102_v9, 0.0 }
  0xf2   :  { %105 = vadd.xlane.f32.xlu1 %v104_v11 }
  0xf3   :  { %v103_v12 = vmul.f32 %v101_v10, %v101_v10 }
  0xf5   :  { %v107_v13 = vsel %vm90_vm0, %v103_v12, 0.0 }
  0xf6   :  { %108 = vadd.xlane.f32.xlu1 %v107_v13 }
 0x17f   :  { %v106_v23 = vpop.xlane.xlu1 %105 }
 0x180   :  { %v110_v24 = vmul.f32 0.015625, %v106_v23 }
 0x182   :  { %v112_v25 = vadd.f32 1e-05, %v110_v24 }
 0x183   :  { %v109_v26 = vpop.xlane.xlu1 %108 }
 0x184   :  { %318 = vrsqrt.f32 %v112_v25  ;;  %v111_v27 = vmul.f32 0.015625, %v109_v26 }
 0x186   :  { %v113_v28 = vadd.f32 1e-05, %v111_v27 }
 0x188   :  { %320 = vrsqrt.f32 %v113_v28 }
 0x18e   :  { %v319_v29 = vpop.eup %318 }
 0x18f   :  { %v116_v30 = vmul.f32 %v319_v29, %v100_v6 }
 0x191   :  { %v125_v33 = vmul.f32 %v282_v31, %v116_v30 }
 0x192   :  { %v321_v32 = vpop.eup %320 }
 0x193   :  { %v117_v34 = vmul.f32 %v321_v32, %v101_v10  ;;  %v134_v37 = vadd.f32 %v283_v35, %v125_v33 }
 0x195   :  { %v126_v36 = vmul.f32 %v282_v31, %v117_v34 }
 0x197   :  { %v135_v38 = vadd.f32 %v283_v35, %v126_v36 }
 0x199   :  { %v136_v39 = vpack.c.bf16 %v135_v38, %v134_v37 }
 0x19b   :  { %137 = vst.msk [vmem:[#allocation2] sm:$0xff] %vm90_vm0, %v136_v39 }
 0x1a2   :  { %v138_v40 = vld [vmem:[#allocation2] sm:$0xff] }
 0x1a3   :  { %292 = vmatmul.mubr.msk.bf16.vlgmr.msra.gmra.mrb[0].mxu0 %vm90_vm0, %v138_v40 }
 0x276   :  { %v237_v48 = vpop.f32.mrb[0].mxu0 }
 0x277   :  { %v238_v49 = vadd.f32 %v237_v48, %v152_v46  ;;  %v239_v50 = vpop.f32.mrb[1].mxu0 }
 0x278   :  { %v240_v51 = vadd.f32 %v239_v50, %v156_v47  ;;  %v241_v52 = vpop.f32.mrb[2].mxu0 }
 0x279   :  { %v242_v53 = vadd.f32 %v241_v52, %v152_v46  ;;  %v243_v54 = vpop.f32.mrb[3].mxu0 }
 0x27a   :  { %v295_v55 = vpack.c.bf16 %v240_v51, %v238_v49  ;;  %v244_v56 = vadd.f32 %v243_v54, %v156_v47 }
 0x27c   :  { %v296_v57 = vpack.c.bf16 %v244_v56, %v242_v53  ;;  %261 = vst.msk [vmem:[#allocation12] sm:$0xff] %vm260_vm3, %v295_v55 }
 0x27e   :  { %262 = vst.msk [vmem:[#allocation12 + $0x8] sm:$0xff] %vm260_vm3, %v296_v57 }
 0x27f   :  { %443 = shalt.err (!%p440_p2)
}
 0x280   :  { %s444_s7 = scalar_lea.hbm %s593_s5, 256 }
 0x281   :  { %p445_p3 = scmp.ne.s32.totalorder %s593_s5, %s444_s7  ;;  %p448_p4 = scmp.lt.u32.totalorder %s444_s7, %s593_s5 }
 0x283   :  { %p450_p5 = pnand %p448_p4, %p445_p3 }
 0x285   :  { %453 = shalt.err (!%p450_p5)
}
 0x286   :  { %274 = dma.vmem_to_hbm [thread:$0]  %s269_s3, 256, %s593_s5, [#allocation5], %s465_s17, %s465_s17, %s466_s18  }
 0x287   :  { %460 = dma.done.wait [#allocation5], 256  }
 0x288   :  { %461 = vsyncadd [#allocation5], 4294967040 }
 0x289   :  { %278 = vsyncpa [#allocation4], 1 }
 0x28a   :  { %279 = vsyncpa [#allocation7], 1 }
 0x28b   :  { %280 = vsyncpa [#allocation10], 1 }
 0x28c   :  { %281 = vsyncpa [#allocation5], 1 }

// kernel: gpt2_forecaster_forward.14
= control target key start
LH: loop header
LB: loop body
LE: loop exit
PB: predicated region body
PF: predicated region fallthrough
CT: control target
= control target key end

     0   :  { %9 = vsyncpa [#allocation3], 0  ;;  %s465_s0 = inlined_call_operand.hbm [shape: bf16[16,64], index: 0, kind: input, shape index: {}]   ;;  %s466_s1 = inlined_call_operand.hbm [shape: bf16[64,64], index: 1, kind: input, shape index: {}]   ;;  %s467_s2 = inlined_call_operand.hbm [shape: f32[1,64], index: 2, kind: input, shape index: {}]   ;;  %s468_s3 = inlined_call_operand.hbm [shape: f32[16,64], index: 3, kind: input, shape index: {}]   ;;  %s469_s4 = inlined_call_operand.hbm [shape: f32[16,64], index: 4, kind: output, shape index: {}]  }
   0x1   :  { %10 = vsyncpa [#allocation6], 0 }
   0x2   :  { %11 = vsyncpa [#allocation9], 0 }
   0x3   :  { %12 = vsyncpa [#allocation4], 0  ;;  %s346_s15 = smov [#allocation5]   ;;  %s347_s17 = smov [#allocation2]  }
   0x4   :  { %s30_s16 = sshll.u32 %s346_s15, 4  ;;  %s18_s18 = sshll.u32 %s347_s17, 4  ;;  %s31_s16 = int_to_ptr.vmem [resolvable:$true] %s30_s16  ;;  %s382_s18 = int_to_ptr.vmem [resolvable:$true] %s18_s18 }
   0x5   :  { %s228_s21 = scalar_lea.hbm %s466_s1, 512 }
   0x6   :  { %p229_p0 = scmp.ne.s32.totalorder %s466_s1, %s228_s21  ;;  %p232_p1 = scmp.lt.u32.totalorder %s228_s21, %s466_s1 }
   0x8   :  { %p234_p2 = pnand %p232_p1, %p229_p0 }
   0xa   :  { %237 = shalt.err (!%p234_p2)
}
   0xb   :  { %s238_s26 = scalar_lea.vmem %s31_s16, 512  ;;  %p243_p4 = scmp.lt.s32.totalorder %s31_s16, %s31_s16 }
   0xc   :  { %p239_p3 = scmp.ne.s32.totalorder %s31_s16, %s238_s26  ;;  %p244_p5 = scmp.lt.s32.totalorder %s238_s26, %s238_s26 }
   0xe   :  { %p245_p6 = por %p244_p5, %p243_p4 }
  0x10   :  { %p246_p7 = pnand %p245_p6, %p239_p3 }
  0x12   :  { %249 = shalt.err (!%p246_p7)
}
  0x13   :  { %s348_s27 = smov 64   ;;  %s349_s28 = smov 4  }
  0x14   :  { %36 = dma.hbm_to_vmem [thread:$0]  %s466_s1, 512, %s31_s16, [#allocation6], %s348_s27, %s348_s27, %s349_s28  }
  0x15   :  { %s250_s7 = scalar_lea.hbm %s465_s0, 128 }
  0x16   :  { %p251_p8 = scmp.ne.s32.totalorder %s465_s0, %s250_s7  ;;  %p254_p9 = scmp.lt.u32.totalorder %s250_s7, %s465_s0 }
  0x18   :  { %p256_p10 = pnand %p254_p9, %p251_p8 }
  0x1a   :  { %259 = shalt.err (!%p256_p10)
}
  0x1b   :  { %s260_s12 = scalar_lea.vmem %s382_s18, 128  ;;  %p265_p12 = scmp.lt.s32.totalorder %s382_s18, %s382_s18 }
  0x1c   :  { %p261_p11 = scmp.ne.s32.totalorder %s382_s18, %s260_s12  ;;  %p266_p13 = scmp.lt.s32.totalorder %s260_s12, %s260_s12 }
  0x1e   :  { %p267_p0 = por %p266_p13, %p265_p12 }
  0x20   :  { %p268_p1 = pnand %p267_p0, %p261_p11 }
  0x22   :  { %271 = shalt.err (!%p268_p1)
}
  0x23   :  { %24 = dma.hbm_to_vmem [thread:$0]  %s465_s0, 128, %s382_s18, [#allocation3], %s348_s27, %s348_s27, %s349_s28  }
  0x24   :  { %s350_s14 = smov [#allocation7]   ;;  %s351_s16 = smov [#allocation8]  }
  0x25   :  { %s43_s15 = sshll.u32 %s350_s14, 4  ;;  %s52_s17 = sshll.u32 %s351_s16, 4  ;;  %s44_s15 = int_to_ptr.vmem [resolvable:$true] %s43_s15  ;;  %s413_s17 = int_to_ptr.vmem [resolvable:$true] %s52_s17 }
  0x26   :  { %s272_s21 = scalar_lea.hbm %s467_s2, 16 }
  0x27   :  { %p273_p2 = scmp.ne.s32.totalorder %s467_s2, %s272_s21  ;;  %p276_p3 = scmp.lt.u32.totalorder %s272_s21, %s467_s2 }
  0x29   :  { %p278_p4 = pnand %p276_p3, %p273_p2 }
  0x2b   :  { %281 = shalt.err (!%p278_p4)
}
  0x2c   :  { %s282_s0 = scalar_lea.vmem %s44_s15, 16  ;;  %s286_s18 = scalar_lea.vmem %s44_s15, 32 }
  0x2d   :  { %p283_p5 = scmp.ne.s32.totalorder %s44_s15, %s282_s0  ;;  %p287_p6 = scmp.lt.s32.totalorder %s44_s15, %s44_s15 }
  0x2e   :  { %p288_p7 = scmp.lt.s32.totalorder %s286_s18, %s282_s0 }
  0x30   :  { %p289_p8 = por %p288_p7, %p287_p6 }
  0x32   :  { %p290_p9 = pnand %p289_p8, %p283_p5 }
  0x34   :  { %293 = shalt.err (!%p290_p9)
}
  0x35   :  { %46 = dma.hbm_to_vmem [thread:$0]  %s467_s2, 16, %s44_s15, [#allocation6]  }
  0x36   :  { %s294_s30 = scalar_lea.hbm %s468_s3, 256 }
  0x37   :  { %p295_p10 = scmp.ne.s32.totalorder %s468_s3, %s294_s30  ;;  %p298_p11 = scmp.lt.u32.totalorder %s294_s30, %s468_s3 }
  0x39   :  { %p300_p12 = pnand %p298_p11, %p295_p10 }
  0x3b   :  { %303 = shalt.err (!%p300_p12)
}
  0x3c   :  { %s304_s9 = scalar_lea.vmem %s413_s17, 256  ;;  %p309_p0 = scmp.lt.s32.totalorder %s413_s17, %s413_s17 }
  0x3d   :  { %p305_p13 = scmp.ne.s32.totalorder %s413_s17, %s304_s9  ;;  %p310_p1 = scmp.lt.s32.totalorder %s304_s9, %s304_s9 }
  0x3f   :  { %p311_p2 = por %p310_p1, %p309_p0 }
  0x41   :  { %p312_p3 = pnand %p311_p2, %p305_p13 }
  0x43   :  { %315 = shalt.err (!%p312_p3)
}
  0x44   :  { %s352_s2 = smov 128   ;;  %s353_s10 = smov 8  }
  0x45   :  { %58 = dma.hbm_to_vmem [thread:$0]  %s468_s3, 256, %s413_s17, [#allocation9], %s352_s2, %s352_s2, %s353_s10  }
  0x46   :  { %338 = dma.done.wait [#allocation3], 128  }
  0x47   :  { %339 = vsyncadd [#allocation3], 4294967168 }
  0x48   :  { %340 = dma.done.wait [#allocation6], 528  }
  0x49   :  { %341 = vsyncadd [#allocation6], 4294966768 }
  0x4a   :  { %342 = dma.done.wait [#allocation9], 256  }
  0x4b   :  { %343 = vsyncadd [#allocation9], 4294967040  ;;  %v354_v0 = vmov 0.0   ;;  %vm355_vm0 = vmmov 0   ;;  %v223_v1 = vld [vmem:[#allocation5] sm:$0xff]   ;;  %v224_v2 = vld [vmem:[#allocation5 + $0x8] sm:$0xff]  }
  0x4c   :  { %200 = vmatprep.subr.bf16.mxu0 %v354_v0  ;;  %208 = vmatprep.mubr.msk.bf16.mxu0 %vm355_vm0, %v354_v0  ;;  %v225_v3 = vld [vmem:[#allocation5 + $0x10] sm:$0xff]   ;;  %v226_v4 = vld [vmem:[#allocation5 + $0x18] sm:$0xff]   ;;  %vm118_vm1 = vcmask 523264   ;;  %v188_v6 = vld [vmem:[#allocation7] ss:$0 sm:$0xff]  ;;  %s356_s3 = smov [#allocation10]  }
  0x4d   :  { %201 = vmatpush3.bf16.msra.mxu0 %v223_v1  ;;  %v227_v5 = vld [vmem:[#allocation2] sm:$0xff]   ;;  %v163_v8 = vld [vmem:[#allocation8] sm:$0xff]  ;;  %v164_v12 = vld [vmem:[#allocation8 + $0x8] sm:$0xff]  ;;  %s174_s1 = sshll.u32 %s356_s3, 4  ;;  %s175_s1 = int_to_ptr.vmem [resolvable:$true] %s174_s1 }
  0x4e   :  { %202 = vmatprep.subr.bf16.mxu0 %v354_v0  ;;  %s316_s13 = scalar_lea.vmem %s175_s1, 256  ;;  %p321_p5 = scmp.lt.s32.totalorder %s175_s1, %s175_s1 }
  0x4f   :  { %p317_p4 = scmp.ne.s32.totalorder %s175_s1, %s316_s13  ;;  %p322_p6 = scmp.lt.s32.totalorder %s316_s13, %s316_s13 }
  0x51   :  { %203 = vmatpush3.bf16.msra.mxu0 %v224_v2  ;;  %p323_p7 = por %p322_p6, %p321_p5 }
  0x52   :  { %204 = vmatprep.subr.bf16.mxu0 %v354_v0 }
  0x53   :  { %p324_p8 = pnand %p323_p7, %p317_p4 }
  0x55   :  { %205 = vmatpush3.bf16.msra.mxu0 %v225_v3 }
  0x56   :  { %206 = vmatprep.subr.bf16.mxu0 %v354_v0 }
  0x59   :  { %207 = vmatpush3.bf16.msra.mxu0 %v226_v4 }
  0x5c   :  { %209 = vmatmul.mubr.msk.bf16.vlgmr.msra.gmra.mrb[0].mxu0 %vm118_vm1, %v227_v5 }
 0x12f   :  { %v156_v7 = vpop.f32.mrb[0].mxu0 }
 0x130   :  { %v157_v9 = vadd.f32 %v188_v6, %v156_v7  ;;  %v210_v10 = vpop.f32.mrb[1].mxu0 }
 0x131   :  { %v159_v11 = vpop.f32.mrb[2].mxu0 }
 0x132   :  { %v165_v13 = vadd.f32 %v163_v8, %v157_v9  ;;  %v160_v14 = vadd.f32 %v188_v6, %v159_v11  ;;  %v211_v15 = vpop.f32.mrb[3].mxu0 }
 0x134   :  { %167 = vst.msk [vmem:[#allocation10] sm:$0xff] %vm118_vm1, %v165_v13  ;;  %v166_v16 = vadd.f32 %v164_v12, %v160_v14 }
 0x136   :  { %168 = vst.msk [vmem:[#allocation10 + $0x8] sm:$0xff] %vm118_vm1, %v166_v16 }
 0x137   :  { %327 = shalt.err (!%p324_p8)
}
 0x138   :  { %s328_s16 = scalar_lea.hbm %s469_s4, 256 }
 0x139   :  { %p329_p9 = scmp.ne.s32.totalorder %s469_s4, %s328_s16  ;;  %p332_p10 = scmp.lt.u32.totalorder %s328_s16, %s469_s4 }
 0x13b   :  { %p334_p11 = pnand %p332_p10, %p329_p9 }
 0x13d   :  { %337 = shalt.err (!%p334_p11)
}
 0x13e   :  { %180 = dma.vmem_to_hbm [thread:$0]  %s175_s1, 256, %s469_s4, [#allocation4], %s352_s2, %s352_s2, %s353_s10  }
 0x13f   :  { %344 = dma.done.wait [#allocation4], 256  }
 0x140   :  { %345 = vsyncadd [#allocation4], 4294967040 }
 0x141   :  { %184 = vsyncpa [#allocation3], 1 }
 0x142   :  { %185 = vsyncpa [#allocation6], 1 }
 0x143   :  { %186 = vsyncpa [#allocation9], 1 }
 0x144   :  { %187 = vsyncpa [#allocation4], 1 }

// kernel: gpt2_forecaster_forward.15
= control target key start
LH: loop header
LB: loop body
LE: loop exit
PB: predicated region body
PF: predicated region fallthrough
CT: control target
= control target key end

     0   :  { %10 = vsyncpa [#allocation4], 0  ;;  %s629_s0 = inlined_call_operand.hbm [shape: f32[16,64], index: 0, kind: input, shape index: {}]   ;;  %s630_s1 = inlined_call_operand.hbm [shape: f32[1,64], index: 1, kind: input, shape index: {}]   ;;  %s631_s2 = inlined_call_operand.hbm [shape: f32[1,64], index: 2, kind: input, shape index: {}]   ;;  %s632_s3 = inlined_call_operand.hbm [shape: bf16[64,256], index: 3, kind: input, shape index: {}]   ;;  %s633_s4 = inlined_call_operand.hbm [shape: f32[1,256], index: 4, kind: input, shape index: {}]   ;;  %s634_s5 = inlined_call_operand.hbm [shape: bf16[16,256], index: 5, kind: output, shape index: {}]  }
   0x1   :  { %11 = vsyncpa [#allocation7], 0 }
   0x2   :  { %12 = vsyncpa [#allocation10], 0 }
   0x3   :  { %13 = vsyncpa [#allocation5], 0  ;;  %s503_s18 = smov [#allocation6]   ;;  %s363_s22 = scalar_lea.hbm %s630_s1, 16 }
   0x4   :  { %s32_s19 = sshll.u32 %s503_s18, 4  ;;  %p364_p0 = scmp.ne.s32.totalorder %s630_s1, %s363_s22  ;;  %s33_s19 = int_to_ptr.vmem [resolvable:$true] %s32_s19 }
   0x5   :  { %p367_p1 = scmp.lt.u32.totalorder %s363_s22, %s630_s1 }
   0x7   :  { %p369_p2 = pnand %p367_p1, %p364_p0 }
   0x9   :  { %372 = shalt.err (!%p369_p2)
}
   0xa   :  { %s373_s27 = scalar_lea.vmem %s33_s19, 16  ;;  %s377_s28 = scalar_lea.vmem %s33_s19, 32 }
   0xb   :  { %p374_p3 = scmp.ne.s32.totalorder %s33_s19, %s373_s27  ;;  %p378_p4 = scmp.lt.s32.totalorder %s33_s19, %s33_s19 }
   0xc   :  { %p379_p5 = scmp.lt.s32.totalorder %s377_s28, %s373_s27 }
   0xe   :  { %p380_p6 = por %p379_p5, %p378_p4 }
  0x10   :  { %p381_p7 = pnand %p380_p6, %p374_p3 }
  0x12   :  { %384 = shalt.err (!%p381_p7)
}
  0x13   :  { %35 = dma.hbm_to_vmem [thread:$0]  %s630_s1, 16, %s33_s19, [#allocation7]  }
  0x14   :  { %s504_s6 = smov [#allocation9]   ;;  %s505_s8 = smov [#allocation3]  }
  0x15   :  { %s51_s7 = sshll.u32 %s504_s6, 4  ;;  %s19_s9 = sshll.u32 %s505_s8, 4  ;;  %s52_s7 = int_to_ptr.vmem [resolvable:$true] %s51_s7  ;;  %s20_s9 = int_to_ptr.vmem [resolvable:$true] %s19_s9 }
  0x16   :  { %s385_s12 = scalar_lea.hbm %s632_s3, 1024 }
  0x17   :  { %p386_p8 = scmp.ne.s32.totalorder %s632_s3, %s385_s12  ;;  %p389_p9 = scmp.lt.u32.totalorder %s385_s12, %s632_s3 }
  0x19   :  { %p391_p10 = pnand %p389_p9, %p386_p8 }
  0x1b   :  { %394 = shalt.err (!%p391_p10)
}
  0x1c   :  { %s395_s1 = scalar_lea.vmem %s52_s7, 1024  ;;  %p400_p12 = scmp.lt.s32.totalorder %s52_s7, %s52_s7 }
  0x1d   :  { %p396_p11 = scmp.ne.s32.totalorder %s52_s7, %s395_s1  ;;  %p401_p13 = scmp.lt.s32.totalorder %s395_s1, %s395_s1 }
  0x1f   :  { %p402_p0 = por %p401_p13, %p400_p12 }
  0x21   :  { %p403_p1 = pnand %p402_p0, %p396_p11 }
  0x23   :  { %406 = shalt.err (!%p403_p1)
}
  0x24   :  { %s506_s17 = smov 128   ;;  %s507_s18 = smov 8  }
  0x25   :  { %57 = dma.hbm_to_vmem [thread:$0]  %s632_s3, 1024, %s52_s7, [#allocation10], %s506_s17, %s506_s17, %s507_s18  }
  0x26   :  { %s407_s23 = scalar_lea.hbm %s629_s0, 256 }
  0x27   :  { %p408_p2 = scmp.ne.s32.totalorder %s629_s0, %s407_s23  ;;  %p411_p3 = scmp.lt.u32.totalorder %s407_s23, %s629_s0 }
  0x29   :  { %p413_p4 = pnand %p411_p3, %p408_p2 }
  0x2b   :  { %416 = shalt.err (!%p413_p4)
}
  0x2c   :  { %s417_s28 = scalar_lea.vmem %s20_s9, 256  ;;  %p422_p6 = scmp.lt.s32.totalorder %s20_s9, %s20_s9 }
  0x2d   :  { %p418_p5 = scmp.ne.s32.totalorder %s20_s9, %s417_s28  ;;  %p423_p7 = scmp.lt.s32.totalorder %s417_s28, %s417_s28 }
  0x2f   :  { %p424_p8 = por %p423_p7, %p422_p6 }
  0x31   :  { %p425_p9 = pnand %p424_p8, %p418_p5 }
  0x33   :  { %428 = shalt.err (!%p425_p9)
}
  0x34   :  { %25 = dma.hbm_to_vmem [thread:$0]  %s629_s0, 256, %s20_s9, [#allocation4], %s506_s17, %s506_s17, %s507_s18  }
  0x35   :  { %s508_s30 = smov [#allocation8]   ;;  %s509_s7 = smov [#allocation11]  }
  0x36   :  { %s42_s6 = sshll.u32 %s508_s30, 4  ;;  %s64_s8 = sshll.u32 %s509_s7, 4  ;;  %s43_s6 = int_to_ptr.vmem [resolvable:$true] %s42_s6  ;;  %s65_s8 = int_to_ptr.vmem [resolvable:$true] %s64_s8 }
  0x37   :  { %s429_s12 = scalar_lea.hbm %s631_s2, 16 }
  0x38   :  { %p430_p10 = scmp.ne.s32.totalorder %s631_s2, %s429_s12  ;;  %p433_p11 = scmp.lt.u32.totalorder %s429_s12, %s631_s2 }
  0x3a   :  { %p435_p12 = pnand %p433_p11, %p430_p10 }
  0x3c   :  { %438 = shalt.err (!%p435_p12)
}
  0x3d   :  { %s439_s0 = scalar_lea.vmem %s43_s6, 16  ;;  %s443_s9 = scalar_lea.vmem %s43_s6, 32 }
  0x3e   :  { %p440_p13 = scmp.ne.s32.totalorder %s43_s6, %s439_s0  ;;  %p444_p0 = scmp.lt.s32.totalorder %s43_s6, %s43_s6 }
  0x3f   :  { %p445_p1 = scmp.lt.s32.totalorder %s443_s9, %s439_s0 }
  0x41   :  { %p446_p2 = por %p445_p1, %p444_p0 }
  0x43   :  { %p447_p3 = pnand %p446_p2, %p440_p13 }
  0x45   :  { %450 = shalt.err (!%p447_p3)
}
  0x46   :  { %45 = dma.hbm_to_vmem [thread:$0]  %s631_s2, 16, %s43_s6, [#allocation7]  }
  0x47   :  { %s451_s22 = scalar_lea.hbm %s633_s4, 32 }
  0x48   :  { %p452_p4 = scmp.ne.s32.totalorder %s633_s4, %s451_s22  ;;  %p455_p5 = scmp.lt.u32.totalorder %s451_s22, %s633_s4 }
  0x4a   :  { %p457_p6 = pnand %p455_p5, %p452_p4 }
  0x4c   :  { %460 = shalt.err (!%p457_p6)
}
  0x4d   :  { %s461_s27 = scalar_lea.vmem %s65_s8, 32  ;;  %p466_p8 = scmp.lt.s32.totalorder %s65_s8, %s65_s8 }
  0x4e   :  { %p462_p7 = scmp.ne.s32.totalorder %s65_s8, %s461_s27  ;;  %p467_p9 = scmp.lt.s32.totalorder %s461_s27, %s461_s27 }
  0x50   :  { %p468_p10 = por %p467_p9, %p466_p8 }
  0x52   :  { %p469_p11 = pnand %p468_p10, %p462_p7 }
  0x54   :  { %472 = shalt.err (!%p469_p11)
}
  0x55   :  { %67 = dma.hbm_to_vmem [thread:$0]  %s633_s4, 32, %s65_s8, [#allocation10]  }
  0x56   :  { %495 = dma.done.wait [#allocation4], 256  }
  0x57   :  { %496 = vsyncadd [#allocation4], 4294967040 }
  0x58   :  { %497 = dma.done.wait [#allocation7], 32  }
  0x59   :  { %498 = vsyncadd [#allocation7], 4294967264 }
  0x5a   :  { %499 = dma.done.wait [#allocation10], 1056  }
  0x5b   :  { %500 = vsyncadd [#allocation10], 4294966240  ;;  %vm90_vm0 = vcmask 523264   ;;  %v88_v0 = vld [vmem:[#allocation3] sm:$0xff]  ;;  %v89_v1 = vld [vmem:[#allocation3 + $0x8] sm:$0xff]  ;;  %v510_v22 = vmov 0   ;;  %v149_v41 = vlaneseq }
  0x5c   :  { %v91_v2 = vsel %vm90_vm0, %v88_v0, 0.0  ;;  %v94_v3 = vsel %vm90_vm0, %v89_v1, 0.0  ;;  %v339_v14 = vld [vmem:[#allocation9 + $0x4] ss:$8 sps:$4 sm:$0xff]   ;;  %v341_v15 = vld [vmem:[#allocation9] ss:$8 sps:$4 sm:$0xff]   ;;  %235 = vmatprep.mubr.bf16.mxu0 %v510_v22 }
  0x5d   :  { %92 = vadd.xlane.f32.xlu0 %v91_v2  ;;  %203 = vmatprep.subr.bf16.mxu0 %v339_v14  ;;  %v342_v16 = vld [vmem:[#allocation9 + $0x14] ss:$8 sps:$4 sm:$0xff]   ;;  %v344_v17 = vld [vmem:[#allocation9 + $0x10] ss:$8 sps:$4 sm:$0xff]   ;;  %v345_v18 = vld [vmem:[#allocation9 + $0x24] ss:$8 sps:$4 sm:$0xff]  }
  0x5e   :  { %204 = vmatpush1.bf16.msra.mxu0 %v341_v15  ;;  %v347_v19 = vld [vmem:[#allocation9 + $0x20] ss:$8 sps:$4 sm:$0xff]   ;;  %v348_v20 = vld [vmem:[#allocation9 + $0x34] ss:$8 sps:$4 sm:$0xff]   ;;  %v350_v21 = vld [vmem:[#allocation9 + $0x30] ss:$8 sps:$4 sm:$0xff]  }
  0x5f   :  { %205 = vmatprep.subr.bf16.mxu0 %v342_v16  ;;  %v315_v31 = vld [vmem:[#allocation6] ss:$0 sm:$0xff]  ;;  %v316_v35 = vld [vmem:[#allocation8] ss:$0 sm:$0xff]  ;;  %v150_v42 = vshrl.u32 %v149_v41, 7  ;;  %s511_s4 = smov [#allocation12]  }
  0x60   :  { %v147_v44 = vld [vmem:[#allocation11] sm:$0x3]  ;;  %s301_s3 = sshll.u32 %s511_s4, 4  ;;  %s302_s3 = int_to_ptr.vmem [resolvable:$true] %s301_s3 }
  0x61   :  { %95 = vadd.xlane.f32.xlu0 %v94_v3  ;;  %v151_v43 = vsub.s32 0, %v150_v42  ;;  %v155_v45 = vsub.s32 1, %v150_v42  ;;  %s473_s29 = scalar_lea.vmem %s302_s3, 256  ;;  %p478_p13 = scmp.lt.s32.totalorder %s302_s3, %s302_s3 }
  0x62   :  { %206 = vmatpush1.bf16.msra.mxu0 %v344_v17  ;;  %p474_p12 = scmp.ne.s32.totalorder %s302_s3, %s473_s29  ;;  %p479_p0 = scmp.lt.s32.totalorder %s473_s29, %s473_s29 }
  0x63   :  { %207 = vmatprep.subr.bf16.mxu0 %v345_v18  ;;  %v152_v46 = vrot.slane %v147_v44, %v151_v43  ;;  %v156_v47 = vrot.slane %v147_v44, %v155_v45 }
  0x64   :  { %p480_p1 = por %p479_p0, %p478_p13 }
  0x66   :  { %208 = vmatpush1.bf16.msra.mxu0 %v347_v19  ;;  %p481_p2 = pnand %p480_p1, %p474_p12 }
  0x67   :  { %209 = vmatprep.subr.bf16.mxu0 %v348_v20 }
  0x6a   :  { %210 = vmatpush1.bf16.msra.mxu0 %v350_v21 }
  0xea   :  { %v93_v4 = vpop.xlane.xlu0 %92 }
  0xeb   :  { %v98_v5 = vmul.f32 0.015625, %v93_v4 }
  0xed   :  { %v100_v6 = vsub.f32 %v88_v0, %v98_v5 }
  0xee   :  { %v96_v7 = vpop.xlane.xlu0 %95 }
  0xef   :  { %v99_v8 = vmul.f32 0.015625, %v96_v7  ;;  %v102_v9 = vmul.f32 %v100_v6, %v100_v6 }
  0xf1   :  { %v101_v10 = vsub.f32 %v89_v1, %v99_v8  ;;  %v104_v11 = vsel %vm90_vm0, %v102_v9, 0.0 }
  0xf2   :  { %105 = vadd.xlane.f32.xlu1 %v104_v11 }
  0xf3   :  { %v103_v12 = vmul.f32 %v101_v10, %v101_v10 }
  0xf5   :  { %v107_v13 = vsel %vm90_vm0, %v103_v12, 0.0 }
  0xf6   :  { %108 = vadd.xlane.f32.xlu1 %v107_v13 }
 0x17f   :  { %v106_v23 = vpop.xlane.xlu1 %105 }
 0x180   :  { %v110_v24 = vmul.f32 0.015625, %v106_v23 }
 0x182   :  { %v112_v25 = vadd.f32 1e-05, %v110_v24 }
 0x183   :  { %v109_v26 = vpop.xlane.xlu1 %108 }
 0x184   :  { %351 = vrsqrt.f32 %v112_v25  ;;  %v111_v27 = vmul.f32 0.015625, %v109_v26 }
 0x186   :  { %v113_v28 = vadd.f32 1e-05, %v111_v27 }
 0x188   :  { %353 = vrsqrt.f32 %v113_v28 }
 0x18e   :  { %v352_v29 = vpop.eup %351 }
 0x18f   :  { %v116_v30 = vmul.f32 %v352_v29, %v100_v6 }
 0x191   :  { %v125_v33 = vmul.f32 %v315_v31, %v116_v30 }
 0x192   :  { %v354_v32 = vpop.eup %353 }
 0x193   :  { %v117_v34 = vmul.f32 %v354_v32, %v101_v10  ;;  %v134_v37 = vadd.f32 %v316_v35, %v125_v33 }
 0x195   :  { %v126_v36 = vmul.f32 %v315_v31, %v117_v34 }
 0x197   :  { %v135_v38 = vadd.f32 %v316_v35, %v126_v36 }
 0x199   :  { %v136_v39 = vpack.c.bf16 %v135_v38, %v134_v37 }
 0x19b   :  { %137 = vst.msk [vmem:[#allocation2] sm:$0xff] %vm90_vm0, %v136_v39 }
 0x1a2   :  { %v138_v40 = vld [vmem:[#allocation2] sm:$0xff] }
 0x1a3   :  { %325 = vmatmul.mubr.msk.bf16.vlgmr.msra.gmra.mrb[0].mxu0 %vm90_vm0, %v138_v40 }
 0x276   :  { %v237_v48 = vpop.f32.mrb[0].mxu0 }
 0x277   :  { %v238_v49 = vadd.f32 %v237_v48, %v152_v46  ;;  %v239_v50 = vpop.f32.mrb[1].mxu0 }
 0x278   :  { %v240_v51 = vadd.f32 %v239_v50, %v156_v47  ;;  %v241_v52 = vpop.f32.mrb[2].mxu0 }
 0x279   :  { %v250_v53 = vmul.f32 0.044715, %v238_v49  ;;  %v242_v54 = vadd.f32 %v241_v52, %v152_v46  ;;  %v243_v55 = vpop.f32.mrb[3].mxu0  ;;  %v246_v14 = vmul.f32 0.5, %v238_v49 }
 0x27a   :  { %v251_v56 = vmul.f32 0.044715, %v240_v51  ;;  %v244_v57 = vadd.f32 %v243_v55, %v156_v47  ;;  %v247_v17 = vmul.f32 0.5, %v240_v51 }
 0x27b   :  { %v254_v58 = vmul.f32 %v250_v53, %v238_v49  ;;  %v252_v59 = vmul.f32 0.044715, %v242_v54  ;;  %v248_v20 = vmul.f32 0.5, %v242_v54 }
 0x27c   :  { %v255_v60 = vmul.f32 %v251_v56, %v240_v51  ;;  %v253_v61 = vmul.f32 0.044715, %v244_v57  ;;  %v249_v23 = vmul.f32 0.5, %v244_v57 }
 0x27d   :  { %v258_v62 = vmul.f32 %v254_v58, %v238_v49  ;;  %v256_v63 = vmul.f32 %v252_v59, %v242_v54 }
 0x27e   :  { %v259_v0 = vmul.f32 %v255_v60, %v240_v51  ;;  %v257_v1 = vmul.f32 %v253_v61, %v244_v57 }
 0x27f   :  { %v262_v2 = vadd.f32 %v258_v62, %v238_v49  ;;  %v260_v3 = vmul.f32 %v256_v63, %v242_v54 }
 0x280   :  { %v263_v4 = vadd.f32 %v259_v0, %v240_v51  ;;  %v261_v5 = vmul.f32 %v257_v1, %v244_v57 }
 0x281   :  { %v264_v6 = vadd.f32 %v260_v3, %v242_v54  ;;  %v266_v7 = vmul.f32 0.7978846, %v262_v2 }
 0x282   :  { %v265_v8 = vadd.f32 %v261_v5, %v244_v57  ;;  %v267_v9 = vmul.f32 0.7978846, %v263_v4 }
 0x283   :  { %v268_v10 = vmul.f32 0.7978846, %v264_v6  ;;  %355 = vtanh.f32 %v266_v7 }
 0x284   :  { %v269_v11 = vmul.f32 0.7978846, %v265_v8  ;;  %357 = vtanh.f32 %v267_v9 }
 0x285   :  { %359 = vtanh.f32 %v268_v10 }
 0x286   :  { %361 = vtanh.f32 %v269_v11 }
 0x28d   :  { %v356_v12 = vpop.eup %355 }
 0x28e   :  { %v358_v13 = vpop.eup %357  ;;  %v274_v15 = vadd.f32 1.0, %v356_v12 }
 0x28f   :  { %v360_v16 = vpop.eup %359  ;;  %v275_v18 = vadd.f32 1.0, %v358_v13 }
 0x290   :  { %v362_v19 = vpop.eup %361  ;;  %v276_v21 = vadd.f32 1.0, %v360_v16  ;;  %v278_v22 = vmul.f32 %v274_v15, %v246_v14 }
 0x291   :  { %v277_v24 = vadd.f32 1.0, %v362_v19  ;;  %v279_v25 = vmul.f32 %v275_v18, %v247_v17 }
 0x292   :  { %v280_v26 = vmul.f32 %v276_v21, %v248_v20 }
 0x293   :  { %v281_v27 = vmul.f32 %v277_v24, %v249_v23  ;;  %v328_v28 = vpack.c.bf16 %v279_v25, %v278_v22 }
 0x295   :  { %v329_v29 = vpack.c.bf16 %v281_v27, %v280_v26  ;;  %294 = vst [vmem:[#allocation12] sm:$0xff] %v328_v28 }
 0x297   :  { %295 = vst [vmem:[#allocation12 + $0x8] sm:$0xff] %v329_v29 }
 0x298   :  { %484 = shalt.err (!%p481_p2)
}
 0x299   :  { %s485_s7 = scalar_lea.hbm %s634_s5, 256 }
 0x29a   :  { %p486_p3 = scmp.ne.s32.totalorder %s634_s5, %s485_s7  ;;  %p489_p4 = scmp.lt.u32.totalorder %s485_s7, %s634_s5 }
 0x29c   :  { %p491_p5 = pnand %p489_p4, %p486_p3 }
 0x29e   :  { %494 = shalt.err (!%p491_p5)
}
 0x29f   :  { %307 = dma.vmem_to_hbm [thread:$0]  %s302_s3, 256, %s634_s5, [#allocation5], %s506_s17, %s506_s17, %s507_s18  }
 0x2a0   :  { %501 = dma.done.wait [#allocation5], 256  }
 0x2a1   :  { %502 = vsyncadd [#allocation5], 4294967040 }
 0x2a2   :  { %311 = vsyncpa [#allocation4], 1 }
 0x2a3   :  { %312 = vsyncpa [#allocation7], 1 }
 0x2a4   :  { %313 = vsyncpa [#allocation10], 1 }
 0x2a5   :  { %314 = vsyncpa [#allocation5], 1 }

// kernel: gpt2_forecaster_forward.13
= control target key start
LH: loop header
LB: loop body
LE: loop exit
PB: predicated region body
PF: predicated region fallthrough
CT: control target
= control target key end

     0   :  { %7 = vsyncpa [#allocation3], 0  ;;  %s1420_s0 = inlined_call_operand.hbm [shape: bf16[2,8,192], index: 0, kind: input, shape index: {}]   ;;  %s1421_s1 = inlined_call_operand.hbm [shape: f32[2,1,8], index: 1, kind: input, shape index: {}]   ;;  %s1422_s2 = inlined_call_operand.hbm [shape: bf16[2,8,64], index: 2, kind: output, shape index: {}]  }
   0x1   :  { %9 = vsyncpa [#allocation3 + $0x1], 0 }
   0x2   :  { %10 = vsyncpa [#allocation6], 0 }
   0x3   :  { %12 = vsyncpa [#allocation6 + $0x1], 0 }
   0x4   :  { %13 = vsyncpa [#allocation4], 0 }
   0x5   :  { %15 = vsyncpa [#allocation4 + $0x1], 0  ;;  %s1130_s9 = smov 0   ;;  %s1132_s10 = smov 0  }
   0x6   :  { %s1134_s11 = smov 0   ;;  %s1136_s12 = smov 0  }
   0x7 LB: > { %s1151_s13 = sadd.s32 4294967295, %s1100_s12   ;;  %s796_s14 = sadd.s32 4294967294, %s1100_s12   ;;  %s1100_s12 = sphi %s1136_s12, %s1443_s12   ;;  %s1096_s11 = sphi %s1134_s11, %s1442_s11   ;;  %s1092_s10 = sphi %s1132_s10, %s1441_s10   ;;  %s1088_s9 = sphi %s1130_s9, %s1440_s9  }
   0x8   : > { %s1155_s15 = sadd.s32 1, %s1100_s12   ;;  %s28_s16 = sadd.s32 1, %s1096_s11 }
   0x9   : > { %s25_s17 = ssub.s32 %s1100_s12, %s1155_s15  ;;  %p35_p0 = scmp.ne.s32.totalorder %s1096_s11, %s1092_s10 }
   0xa   : > { %p26_p1 = scmp.eq.s32.totalorder %s25_s17, 0  ;;  %p36_p2 = scmp.eq.s32.totalorder %s1100_s12, 0 }
   0xb   : > { %p41_p3 = scmp.ne.s32.totalorder %s1092_s10, %s1088_s9  ;;  %p42_p4 = scmp.eq.s32.totalorder %s1151_s13, 0 }
   0xc   : > { %s1167_s18 = scalar_select %p26_p1, %s1096_s11, %s28_s16  }
   0xd   : > { %p1169_p5 = por %p36_p2, %p35_p0  ;;  %p1173_p6 = por %p42_p4, %p41_p3 }
   0xe   : > { %p91_p7 = scmp.eq.s32.totalorder %s1151_s13, 1  ;;  %p97_p8 = scmp.eq.s32.totalorder %s796_s14, 1 }
   0xf   : > { %s1426_s20 = scalar_select %p1173_p6, 1, 0 }
  0x10   : > { %p908_p10 = scmp.lt.s32.totalorder %s1100_s12, 2  ;;  %p1180_p11 = por %p91_p7, %p35_p0 }
  0x11   : > { %p1184_p12 = por %p97_p8, %p41_p3  ;;  %s1189_s23 = sand.u32 1, %s1096_s11  }
  0x12   : > { %s1427_s21 = scalar_select %p1180_p11, 1, 0 }
  0x13   : > { %s1428_s22 = scalar_select %p1184_p12, 1, 0 }
  0x14   : > { %s823_s24 = sshll.u32 %s1100_s12, 7  ;;  %s799_s25 = sshll.u32 %s1189_s23, 3 }
  0x15   : > { %s1196_s28 = scalar_lea.hbm %s1420_s0, %s823_s24  ;;  %s121_s29 = scalar_lea.vmem [#allocation2], %s799_s25 }
  0x16   : > { %s129_s30 = sshll.u32 %s121_s29, 4  ;;  %p1200_p13 = pnand %p908_p10, %p1169_p5  ;;  %s1204_s30 = int_to_ptr.vmem [resolvable:$true] %s129_s30 }
  0x17   : > { %s118_s4 = scalar_lea.sflag [#allocation3], %s1189_s23  ;;  %s970_s5 = scalar_lea.hbm %s1196_s28, 128 }
  0x18   : > { %p971_p2 = scmp.ne.s32.totalorder %s1196_s28, %s970_s5  ;;  %p972_p3 = pneg %p1200_p13 }
  0x19   : > { %s975_s8 = scalar_lea.hbm %s1420_s0, 256  ;;  %p976_p5 = scmp.lt.u32.totalorder %s1196_s28, %s1420_s0 }
  0x1a   : > { %p973_p4 = pnand %p972_p3, %p971_p2  ;;  %p977_p8 = scmp.lt.u32.totalorder %s975_s8, %s970_s5 }
  0x1b   : > { %p979_p9 = scmp.lt.u32.totalorder %s970_s5, %s1196_s28 }
  0x1c   : > { %p974_p7 = pneg %p973_p4  ;;  %p978_p10 = por %p977_p8, %p976_p5 }
  0x1e   : > { %p980_p0 = por %p979_p9, %p978_p10 }
  0x20   : > { %p981_p1 = pnand %p980_p0, %p974_p7 }
  0x22   : > { %984 = shalt.err (!%p981_p1)
}
  0x23   : > { %s985_s17 = scalar_lea.vmem %s1204_s30, 128  ;;  %s1102_s19 = smov [#allocation2]  }
  0x24   : > { %p986_p2 = scmp.ne.s32.totalorder %s1204_s30, %s985_s17  ;;  %s990_s24 = sshll.u32 %s1102_s19, 4  ;;  %s991_s24 = int_to_ptr.vmem [resolvable:$false] %s990_s24 }
  0x25   : > { %s992_s25 = scalar_lea.vmem %s991_s24, 256  ;;  %p993_p11 = scmp.lt.s32.totalorder %s1204_s30, %s991_s24 }
  0x26   : > { %p988_p4 = pnand %p986_p2, %p972_p3  ;;  %p994_p5 = scmp.lt.s32.totalorder %s992_s25, %s985_s17 }
  0x28   : > { %p989_p12 = pneg %p988_p4  ;;  %p995_p8 = por %p994_p5, %p993_p11 }
  0x2a   : > { %p996_p9 = pnand %p995_p8, %p989_p12 }
  0x2c   : > { %999 = shalt.err (!%p996_p9)
}
  0x2d   : > { %900 = dma.hbm_to_vmem [thread:$0]  (!%p1200_p13), %s1196_s28, 128, %s1204_s30, %s118_s4  }
  0x2e   : > { %p1430_p0 = scmp.lt.s32.totalorder %s1100_s12, 3  ;;  %p1431_p1 = scmp.ge.s32.totalorder %s1100_s12, 1 }
  0x2f   : > { %s802_s27 = sshll.u32 %s1100_s12, 4  ;;  %s139_s7 = scalar_lea.vmem [#allocation5], %s1189_s23 }
  0x30   : > { %p1238_p7 = pnand %p1431_p1, %p1430_p0  ;;  %s1246_s6 = scalar_lea.hbm %s1421_s1, %s802_s27 }
  0x31   : > { %s146_s8 = sshll.u32 %s139_s7, 4  ;;  %s137_s28 = scalar_lea.sflag [#allocation6], %s1189_s23  ;;  %s147_s8 = int_to_ptr.vmem [resolvable:$true] %s146_s8 }
  0x32   : > { %s1432_s26 = scalar_select %p1238_p7, 1, 0 }
  0x33   : > { %s1000_s30 = scalar_lea.hbm %s1246_s6, 16  ;;  %s1005_s16 = scalar_lea.hbm %s1421_s1, 32 }
  0x34   : > { %p1001_p11 = scmp.ne.s32.totalorder %s1246_s6, %s1000_s30  ;;  %p1006_p2 = scmp.lt.u32.totalorder %s1246_s6, %s1421_s1 }
  0x35   : > { %p1007_p4 = scmp.lt.u32.totalorder %s1005_s16, %s1000_s30  ;;  %p1009_p8 = scmp.lt.u32.totalorder %s1000_s30, %s1246_s6 }
  0x36   : > { %p1003_p12 = pnand %p1001_p11, %p972_p3 }
  0x37   : > { %p1008_p5 = por %p1007_p4, %p1006_p2 }
  0x38   : > { %p1004_p10 = pneg %p1003_p12 }
  0x39   : > { %p1010_p9 = por %p1009_p8, %p1008_p5 }
  0x3b   : > { %p1011_p0 = pnand %p1010_p9, %p1004_p10 }
  0x3d   : > { %1014 = shalt.err (!%p1011_p0)
}
  0x3e   : > { %s1015_s23 = scalar_lea.vmem %s147_s8, 16  ;;  %s1103_s24 = smov [#allocation5]  }
  0x3f   : > { %p1016_p1 = scmp.ne.s32.totalorder %s147_s8, %s1015_s23  ;;  %s1020_s25 = sshll.u32 %s1103_s24, 4  ;;  %s1021_s25 = int_to_ptr.vmem [resolvable:$false] %s1020_s25 }
  0x40   : > { %s1022_s27 = scalar_lea.vmem %s1021_s25, 32  ;;  %p1023_p6 = scmp.lt.s32.totalorder %s147_s8, %s1021_s25 }
  0x41   : > { %p1018_p11 = pnand %p1016_p1, %p972_p3  ;;  %p1024_p7 = scmp.lt.s32.totalorder %s1022_s27, %s1015_s23 }
  0x43   : > { %p1019_p12 = pneg %p1018_p11  ;;  %p1025_p2 = por %p1024_p7, %p1023_p6 }
  0x45   : > { %p1026_p4 = pnand %p1025_p2, %p1019_p12 }
  0x47   : > { %1029 = shalt.err (!%p1026_p4)
}
  0x48   : > { %903 = dma.hbm_to_vmem [thread:$0]  (!%p1200_p13), %s1246_s6, 16, %s147_s8, %s137_s28  }
  0x49   : > { %p1433_p10 = scmp.ne.s32.totalorder %s1432_s26, 0 }
  0x4a   : > { %s1272_s29 = sand.u32 (!%p1433_p10), 1, %s1092_s10   ;;  %p1434_p3 = scmp.ne.s32.totalorder (!%p1433_p10), %s1426_s20, 0 }
  0x4b   : > { %155 = sbr.rel (%p1433_p10) target bundleno = 1640 (0x668), region = 28  ;;  %s804_s5 = sshll.u32 (!%p1433_p10), %s1272_s29, 3 }
  0x4c   : > { %s158_s7 = scalar_lea.sflag (!%p1433_p10), [#allocation3], %s1272_s29  ;;  %s161_s30 = scalar_lea.vmem (!%p1433_p10), [#allocation2], %s804_s5 }
  0x52   : > { %1075 = dma.done.wait (%p1434_p3), %s158_s7, 128  }
  0x53   : > { %1077 = vsyncadd (%p1434_p3), %s158_s7, 4294967168  ;;  %s167_s3 = scalar_lea.sflag [#allocation6], %s1272_s29  ;;  %s169_s26 = scalar_lea.vmem [#allocation5], %s1272_s29 }
  0x54   : > { %1079 = dma.done.wait (%p1434_p3), %s167_s3, 16  }
  0x55   : > { %1081 = vsyncadd (%p1434_p3), %s167_s3, 4294967280  ;;  %v1104_v0 = vmov 0.0   ;;  %vm1105_vm0 = vmmov 0   ;;  %v195_v1 = vld [vmem:[%s161_s30] sm:$0xff]  ;;  %s1106_s6 = smov 64   ;;  %vm215_vm1 = vcmask 130048   ;;  %v196_v5 = vlaneseq }
  0x56   : > { %843 = vmatprep.subr.bf16.mxu0 %v1104_v0  ;;  %845 = vmatprep.mubr.msk.bf16.mxu0 %vm1105_vm0, %v1104_v0  ;;  %v806_v2 = vcombine.low %v195_v1, %v195_v1  ;;  %s1107_s20 = smov 48   ;;  %v201_v6 = vld [vmem:[%s169_s26] sm:$0x1]  ;;  %v1108_v9 = vmov 0   ;;  %vm264_vm6 = vcmask 64512   ;;  %s1109_s8 = smov 80   ;;  %v1307_v26 = vcombine.high %v195_v1, %v195_v1 }
  0x57   : > { %849 = vmatprep.subr.bf16.mxu1 %v1104_v0  ;;  %851 = vmatprep.mubr.msk.bf16.mxu1 %vm1105_vm0, %v1104_v0  ;;  %v197_v7 = vshrl.u32 %v196_v5, 7  ;;  %vm202_vm2 = vcmp.gt.f32.partialorder %v201_v6, 0.0  ;;  %v199_v11 = vand.u32 127, %v196_v5  ;;  %vm282_vm7 = vcmask 1043456   ;;  %s1110_s28 = smov 112   ;;  %s1111_s4 = smov 32  }
  0x58   : > { %213 = vrot.lane.b32.xlu0 %v806_v2, %s1106_s6  ;;  %331 = vrot.lane.b32.xlu1 %v806_v2, %s1107_s20  ;;  %v203_v10 = vsel %vm202_vm2, 1, %v1108_v9  ;;  %v284_v27 = vsel %vm282_vm7, %v1307_v26, 0  ;;  %s1112_s14 = smov 96   ;;  %s1113_s16 = smov 16   ;;  %vm327_vm8 = vcmask 125952   ;;  %vm448_vm9 = vcmask 257152  }
  0x59   : > { %v206_v8 = vsub.s32 0, %v197_v7  ;;  %vm200_vm3 = vcmp.ge.s32.totalorder %v197_v7, %v199_v11  ;;  %850 = vmatpush3.bf16.msra.mxu1 %v284_v27  ;;  %s805_s17 = sshll.u32 %s1272_s29, 2  ;;  %vm569_vm10 = vcmask 388352   ;;  %s820_s23 = sshll.u32 %s1151_s13, 6  ;;  %vm690_vm11 = vcmask 519552  }
  0x5a   : > { %855 = vmatprep.subr.bf16.mxu1 %v1104_v0  ;;  %s1332_s19 = scalar_lea.vmem [#allocation7], %s805_s17  ;;  %s1375_s5 = scalar_lea.hbm %s1422_s2, %s820_s23 }
  0x5b   : > { %v207_v12 = vrot.slane %v203_v10, %v206_v8  ;;  %s706_s24 = sshll.u32 %s1332_s19, 4  ;;  %s693_s7 = scalar_lea.sflag [#allocation4], %s1272_s29  ;;  %s1377_s24 = int_to_ptr.vmem [resolvable:$true] %s706_s24 }
  0x5c   : > { %s1030_s30 = scalar_lea.vmem %s1377_s24, 64  ;;  %p1437_p13 = scmp.ne.s32.totalorder %s1427_s21, 0 }
  0x5d   : > { %vm208_vm4 = vcmp.eq.s32.totalorder %v207_v12, 1  ;;  %p1031_p6 = scmp.ne.s32.totalorder %s1377_s24, %s1030_s30  ;;  %s1114_s13 = smov [#allocation7]  }
  0x5e   : > { %vm1298_vm5 = vmand %vm200_vm3, %vm208_vm4  ;;  %s1034_s3 = sshll.u32 %s1114_s13, 4  ;;  %s1035_s3 = int_to_ptr.vmem [resolvable:$false] %s1034_s3 }
  0x5f   : > { %p1032_p7 = pnand %p1031_p6, %p1437_p13  ;;  %s1036_s26 = scalar_lea.vmem %s1035_s3, 128 }
  0x60   : > { %p1037_p8 = scmp.lt.s32.totalorder %s1377_s24, %s1035_s3  ;;  %p1038_p9 = scmp.lt.s32.totalorder %s1036_s26, %s1030_s30 }
  0x61   : > { %p1033_p5 = pneg %p1032_p7 }
  0x62   : > { %p1039_p0 = por %p1038_p9, %p1037_p8 }
  0x64   : > { %p1040_p1 = pnand %p1039_p0, %p1033_p5 }
  0xca   : > { %v214_v3 = vpop.permute.xlu0 %213  ;;  %v332_v28 = vpop.permute.xlu1 %331 }
  0xcb   : > { %v220_v4 = vsel %vm215_vm1, %v214_v3, 0  ;;  %v337_v35 = vsel %vm215_vm1, %v332_v28, 0 }
  0xcc   : > { %844 = vmatpush3.bf16.xpose.msra.mxu0 %v220_v4 }
  0xcd   : > { %861 = vmatprep.subr.bf16.mxu0 %v1104_v0 }
  0xd3   : > { %846 = vmatmul.mubr.msk.bf16.vlgmr.msra.gmra.mrb[0].mxu0 %vm215_vm1, %v195_v1 }
  0xd4   : > { %863 = vmatprep.mubr.msk.bf16.mxu0 %vm1105_vm0, %v1104_v0 }
 0x1a6   : > { %v256_v13 = vpop.f32.mrb[0].mxu0 }
 0x1a7   : > { %v262_v15 = vmul.f32 0.25, %v256_v13  ;;  %v847_v16 = vpop.f32.mrb[1].mxu0 }
 0x1a8   : > { %v259_v17 = vpop.f32.mrb[2].mxu0 }
 0x1a9   : > { %v848_v18 = vpop.f32.mrb[3].mxu0  ;;  %v263_v19 = vsel %vm1298_vm5, %v262_v15, -1e+09 }
 0x1aa   : > { %v265_v20 = vsel %vm264_vm6, %v263_v19, -inf }
 0x1ab   : > { %266 = vmax.xlane.f32.xlu0 %v265_v20 }
 0x1c1   : > { %571 = vrot.lane.b32.xlu0 %v806_v2, %s1109_s8 }
 0x238   : > { %v267_v21 = vpop.xlane.xlu0 %266 }
 0x239   : > { %v268_v22 = vsub.f32 %v263_v19, %v267_v21 }
 0x23b   : > { %v269_v23 = vmul.f32 1.442695, %v268_v22 }
 0x23c   : > { %v572_v40 = vpop.permute.xlu0 %571 }
 0x23d   : > { %954 = vpow2.f32 %v269_v23 }
 0x247   : > { %v955_v24 = vpop.eup %954 }
 0x248   : > { %v271_v25 = vsel %vm264_vm6, %v955_v24, 0.0 }
 0x249   : > { %272 = vadd.xlane.f32.xlu1 %v271_v25 }
 0x25a   : > { %329 = vrot.lane.b32.xlu1 %v806_v2, %s1110_s28 }
 0x25e   : > { %452 = vrot.lane.b32.xlu1 %v806_v2, %s1111_s4 }
 0x262   : > { %450 = vrot.lane.b32.xlu1 %v806_v2, %s1112_s14 }
 0x266   : > { %573 = vrot.lane.b32.xlu1 %v806_v2, %s1113_s16 }
 0x2d6   : > { %v273_v29 = vpop.xlane.xlu1 %272 }
 0x2d7   : > { %956 = vrcp.f32 %v273_v29 }
 0x2da   : > { %v330_v30 = vpop.permute.xlu1 %329 }
 0x2de   : > { %v453_v34 = vpop.permute.xlu1 %452 }
 0x2df   : > { %v458_v37 = vsel %vm215_vm1, %v453_v34, 0 }
 0x2e1   : > { %v957_v31 = vpop.eup %956 }
 0x2e2   : > { %v275_v32 = vmul.f32 %v957_v31, %v955_v24  ;;  %v451_v36 = vpop.permute.xlu1 %450 }
 0x2e4   : > { %v276_v33 = vpack.c.bf16 %v275_v32, %v275_v32 }
 0x2e6   : > { %852 = vmatmul.mubr.msk.bf16.vlgmr.msra.gmra.mrb[0].mxu1 %vm264_vm6, %v276_v33  ;;  %v574_v38 = vpop.permute.xlu1 %573 }
 0x2e7   : > { %856 = vmatpush3.bf16.xpose.msra.mxu1 %v337_v35  ;;  %857 = vmatprep.mubr.msk.bf16.mxu1 %vm1105_vm0, %v1104_v0  ;;  %v579_v39 = vsel %vm215_vm1, %v574_v38, 0 }
 0x2e8   : > { %867 = vmatprep.subr.bf16.mxu1 %v1104_v0 }
 0x2ee   : > { %858 = vmatmul.mubr.msk.bf16.vlgmr.msra.gmra.mrb[4].mxu1 %vm215_vm1, %v330_v30 }
 0x2ef   : > { %868 = vmatpush3.bf16.xpose.msra.mxu1 %v458_v37  ;;  %869 = vmatprep.mubr.msk.bf16.mxu1 %vm1105_vm0, %v1104_v0 }
 0x2f0   : > { %879 = vmatprep.subr.bf16.mxu1 %v1104_v0 }
 0x2f6   : > { %870 = vmatmul.mubr.msk.bf16.vlgmr.msra.gmra.mrb[8].mxu1 %vm215_vm1, %v451_v36 }
 0x2f7   : > { %880 = vmatpush3.bf16.xpose.msra.mxu1 %v579_v39  ;;  %881 = vmatprep.mubr.msk.bf16.mxu1 %vm1105_vm0, %v1104_v0 }
 0x2fe   : > { %882 = vmatmul.mubr.msk.bf16.vlgmr.msra.gmra.mrb[12].mxu1 %vm215_vm1, %v572_v40 }
 0x3b9   : > { %v320_v41 = vpop.f32.mrb[0].mxu1 }
 0x3ba   : > { %v326_v42 = vpack.c.bf16 %v320_v41, %v320_v41  ;;  %v853_v43 = vpop.f32.mrb[1].mxu1 }
 0x3bb   : > { %v323_v44 = vpop.f32.mrb[2].mxu1 }
 0x3bc   : > { %328 = vst.msk [vmem:[%s1332_s19] sm:$0xf] %vm327_vm8, %v326_v42  ;;  %v854_v45 = vpop.f32.mrb[3].mxu1 }
 0x3c1   : > { %v373_v46 = vpop.f32.mrb[4].mxu1 }
 0x3c2   : > { %v379_v47 = vmul.f32 0.25, %v373_v46  ;;  %v859_v48 = vpop.f32.mrb[5].mxu1 }
 0x3c3   : > { %v376_v49 = vpop.f32.mrb[6].mxu1 }
 0x3c4   : > { %v860_v50 = vpop.f32.mrb[7].mxu1  ;;  %v380_v51 = vsel %vm1298_vm5, %v379_v47, -1e+09 }
 0x3c5   : > { %v381_v52 = vsel %vm264_vm6, %v380_v51, -inf }
 0x3c6   : > { %382 = vmax.xlane.f32.xlu1 %v381_v52 }
 0x3c9   : > { %v494_v53 = vpop.f32.mrb[8].mxu1 }
 0x3ca   : > { %v500_v54 = vmul.f32 0.25, %v494_v53  ;;  %v871_v55 = vpop.f32.mrb[9].mxu1 }
 0x3cb   : > { %v497_v56 = vpop.f32.mrb[10].mxu1 }
 0x3cc   : > { %v872_v57 = vpop.f32.mrb[11].mxu1  ;;  %v501_v58 = vsel %vm1298_vm5, %v500_v54, -1e+09 }
 0x3cd   : > { %v502_v59 = vsel %vm264_vm6, %v501_v58, -inf }
 0x3ce   : > { %503 = vmax.xlane.f32.xlu0 %v502_v59 }
 0x3d1   : > { %v615_v60 = vpop.f32.mrb[12].mxu1 }
 0x3d2   : > { %v621_v61 = vmul.f32 0.25, %v615_v60  ;;  %v883_v62 = vpop.f32.mrb[13].mxu1 }
 0x3d3   : > { %v618_v63 = vpop.f32.mrb[14].mxu1 }
 0x3d4   : > { %v884_v1 = vpop.f32.mrb[15].mxu1  ;;  %v622_v2 = vsel %vm1298_vm5, %v621_v61, -1e+09 }
 0x3d5   : > { %v623_v3 = vsel %vm264_vm6, %v622_v2, -inf }
 0x3d6   : > { %624 = vmax.xlane.f32.xlu1 %v623_v3 }
 0x3e4   : > { %393 = vrot.lane.b32.xlu0 %v1307_v26, %s1110_s28 }
 0x3e7   : > { %514 = vrot.lane.b32.xlu1 %v1307_v26, %s1112_s14 }
 0x453   : > { %v383_v4 = vpop.xlane.xlu1 %382 }
 0x454   : > { %v384_v5 = vsub.f32 %v380_v51, %v383_v4 }
 0x456   : > { %v385_v6 = vmul.f32 1.442695, %v384_v5 }
 0x458   : > { %958 = vpow2.f32 %v385_v6 }
 0x45b   : > { %v504_v7 = vpop.xlane.xlu0 %503 }
 0x45c   : > { %v505_v8 = vsub.f32 %v501_v58, %v504_v7 }
 0x45e   : > { %v506_v9 = vmul.f32 1.442695, %v505_v8 }
 0x45f   : > { %v394_v19 = vpop.permute.xlu0 %393 }
 0x460   : > { %960 = vpow2.f32 %v506_v9  ;;  %v399_v20 = vsel %vm282_vm7, %v394_v19, 0 }
 0x461   : > { %862 = vmatpush3.bf16.msra.mxu0 %v399_v20 }
 0x462   : > { %v959_v10 = vpop.eup %958  ;;  %873 = vmatprep.subr.bf16.mxu0 %v1104_v0 }
 0x463   : > { %v625_v11 = vpop.xlane.xlu1 %624  ;;  %v387_v12 = vsel %vm264_vm6, %v959_v10, 0.0 }
 0x464   : > { %v626_v13 = vsub.f32 %v622_v2, %v625_v11  ;;  %388 = vadd.xlane.f32.xlu1 %v387_v12 }
 0x466   : > { %v627_v14 = vmul.f32 1.442695, %v626_v13 }
 0x467   : > { %v515_v21 = vpop.permute.xlu1 %514 }
 0x468   : > { %962 = vpow2.f32 %v627_v14  ;;  %v520_v28 = vsel %vm282_vm7, %v515_v21, 0 }
 0x46a   : > { %v961_v15 = vpop.eup %960 }
 0x46b   : > { %v508_v16 = vsel %vm264_vm6, %v961_v15, 0.0 }
 0x46c   : > { %509 = vadd.xlane.f32.xlu1 %v508_v16 }
 0x472   : > { %v963_v17 = vpop.eup %962 }
 0x473   : > { %v629_v18 = vsel %vm264_vm6, %v963_v17, 0.0 }
 0x474   : > { %630 = vadd.xlane.f32.xlu1 %v629_v18 }
 0x485   : > { %635 = vrot.lane.b32.xlu1 %v1307_v26, %s1109_s8 }
 0x4f1   : > { %v389_v22 = vpop.xlane.xlu1 %388 }
 0x4f2   : > { %964 = vrcp.f32 %v389_v22 }
 0x4f9   : > { %v510_v23 = vpop.xlane.xlu1 %509 }
 0x4fa   : > { %966 = vrcp.f32 %v510_v23 }
 0x4fc   : > { %v965_v24 = vpop.eup %964 }
 0x4fd   : > { %v391_v25 = vmul.f32 %v965_v24, %v959_v10 }
 0x4ff   : > { %v392_v27 = vpack.c.bf16 %v391_v25, %v391_v25 }
 0x501   : > { %v631_v29 = vpop.xlane.xlu1 %630  ;;  %864 = vmatmul.mubr.msk.bf16.vlgmr.msra.gmra.mrb[4].mxu0 %vm264_vm6, %v392_v27 }
 0x502   : > { %968 = vrcp.f32 %v631_v29  ;;  %874 = vmatpush3.bf16.msra.mxu0 %v520_v28  ;;  %875 = vmatprep.mubr.msk.bf16.mxu0 %vm1105_vm0, %v1104_v0 }
 0x503   : > { %885 = vmatprep.subr.bf16.mxu0 %v1104_v0 }
 0x504   : > { %v967_v26 = vpop.eup %966 }
 0x505   : > { %v512_v30 = vmul.f32 %v967_v26, %v961_v15  ;;  %v636_v31 = vpop.permute.xlu1 %635 }
 0x506   : > { %v641_v32 = vsel %vm282_vm7, %v636_v31, 0 }
 0x507   : > { %v513_v33 = vpack.c.bf16 %v512_v30, %v512_v30 }
 0x509   : > { %876 = vmatmul.mubr.msk.bf16.vlgmr.msra.gmra.mrb[8].mxu0 %vm264_vm6, %v513_v33 }
 0x50a   : > { %886 = vmatpush3.bf16.msra.mxu0 %v641_v32  ;;  %887 = vmatprep.mubr.msk.bf16.mxu0 %vm1105_vm0, %v1104_v0 }
 0x50c   : > { %v969_v34 = vpop.eup %968 }
 0x50d   : > { %v633_v35 = vmul.f32 %v969_v34, %v963_v17 }
 0x50f   : > { %v634_v36 = vpack.c.bf16 %v633_v35, %v633_v35 }
 0x511   : > { %888 = vmatmul.mubr.msk.bf16.vlgmr.msra.gmra.mrb[12].mxu0 %vm264_vm6, %v634_v36 }
 0x5d4   : > { %v435_v37 = vpop.f32.mrb[4].mxu0 }
 0x5d5   : > { %v824_v38 = vpack.c.bf16 %v435_v37, %v435_v37  ;;  %v865_v39 = vpop.f32.mrb[5].mxu0 }
 0x5d6   : > { %v438_v40 = vpop.f32.mrb[6].mxu0 }
 0x5d7   : > { %445 = vrot.lane.b32.xlu0 %v824_v38, %s1113_s16  ;;  %v866_v41 = vpop.f32.mrb[7].mxu0 }
 0x5dc   : > { %v556_v42 = vpop.f32.mrb[8].mxu0 }
 0x5dd   : > { %v825_v43 = vpack.c.bf16 %v556_v42, %v556_v42  ;;  %v877_v44 = vpop.f32.mrb[9].mxu0 }
 0x5de   : > { %v559_v45 = vpop.f32.mrb[10].mxu0 }
 0x5df   : > { %566 = vrot.lane.b32.xlu1 %v825_v43, %s1111_s4  ;;  %v878_v0 = vpop.f32.mrb[11].mxu0 }
 0x5e4   : > { %v677_v46 = vpop.f32.mrb[12].mxu0 }
 0x5e5   : > { %v826_v47 = vpack.c.bf16 %v677_v46, %v677_v46  ;;  %v889_v48 = vpop.f32.mrb[13].mxu0 }
 0x5e6   : > { %v680_v49 = vpop.f32.mrb[14].mxu0 }
 0x5e7   : > { %687 = vrot.lane.b32.xlu0 %v826_v47, %s1107_s20  ;;  %v890_v50 = vpop.f32.mrb[15].mxu0 }
 0x649   : > { %v446_v51 = vpop.permute.xlu0 %445 }
 0x64a   : > { %449 = vst.msk [vmem:[%s1332_s19] sm:$0xf] %vm448_vm9, %v446_v51 }
 0x651   : > { %v567_v52 = vpop.permute.xlu1 %566 }
 0x652   : > { %570 = vst.msk [vmem:[%s1332_s19] sm:$0xf] %vm569_vm10, %v567_v52 }
 0x659   : > { %v688_v53 = vpop.permute.xlu0 %687 }
 0x65a   : > { %691 = vst.msk [vmem:[%s1332_s19] sm:$0xf] %vm690_vm11, %v688_v53 }
 0x65b   : > { %1043 = shalt.err (!%p1040_p1)
}
 0x65c   : > { %s1044_s29 = scalar_lea.hbm %s1375_s5, 64  ;;  %s1048_s8 = scalar_lea.hbm %s1422_s2, 128 }
 0x65d   : > { %p1045_p11 = scmp.ne.s32.totalorder %s1375_s5, %s1044_s29  ;;  %p1049_p4 = scmp.lt.u32.totalorder %s1375_s5, %s1422_s2 }
 0x65e   : > { %p1050_p10 = scmp.lt.u32.totalorder %s1048_s8, %s1044_s29  ;;  %p1052_p6 = scmp.lt.u32.totalorder %s1044_s29, %s1375_s5 }
 0x65f   : > { %p1046_p12 = pnand %p1045_p11, %p1437_p13 }
 0x660   : > { %p1051_p3 = por %p1050_p10, %p1049_p4 }
 0x661   : > { %p1047_p2 = pneg %p1046_p12 }
 0x662   : > { %p1053_p7 = por %p1052_p6, %p1051_p3 }
 0x664   : > { %p1054_p5 = pnand %p1053_p7, %p1047_p2 }
 0x666   : > { %1057 = shalt.err (!%p1054_p5)
}
 0x667   : > { %895 = dma.vmem_to_hbm [thread:$0]  (%p1437_p13), %s1377_s24, 64, %s1375_s5, %s693_s7  }
 0x668 PF: > { %s718_s14 = sand.u32 1, %s1088_s9   ;;  %p1438_p8 = scmp.ne.s32.totalorder %s1428_s22, 0 }
 0x669   : > { %p1439_p9 = scmp.ge.s32.totalorder %s1100_s12, 2  ;;  %s719_s16 = scalar_lea.sflag [#allocation4], %s718_s14 }
 0x66b   : > { %p905_p0 = pnand %p1439_p9, %p1438_p8 }
 0x66d   : > { %1083 = dma.done.wait (!%p905_p0), %s719_s16, 64  }
 0x66e   : > { %1085 = vsyncadd (!%p905_p0), %s719_s16, 4294967232  ;;  %p18_p1 = scmp.ge.s32.totalorder %s1155_s15, 4   ;;  %s1440_s9 = smov %s1092_s10 }
 0x66f   : > { %s1441_s10 = smov %s1096_s11  ;;  %s1442_s11 = smov %s1167_s18 }
 0x670   : > { %s1443_s12 = smov %s1155_s15  ;;  %20 = sbr.rel (!%p18_p1) target bundleno = 7 (0x7), region = 86 }
 0x677   :  { %724 = vsyncpa [#allocation3], 1 }
 0x678   :  { %726 = vsyncpa [#allocation3 + $0x1], 1 }
 0x679   :  { %727 = vsyncpa [#allocation6], 1 }
 0x67a   :  { %729 = vsyncpa [#allocation6 + $0x1], 1 }
 0x67b   :  { %730 = vsyncpa [#allocation4], 1 }
 0x67c   :  { %732 = vsyncpa [#allocation4 + $0x1], 1 }

// kernel: gpt2_forecaster_forward.16
= control target key start
LH: loop header
LB: loop body
LE: loop exit
PB: predicated region body
PF: predicated region fallthrough
CT: control target
= control target key end

     0   :  { %9 = vsyncpa [#allocation3], 0  ;;  %s583_s0 = inlined_call_operand.hbm [shape: bf16[16,256], index: 0, kind: input, shape index: {}]   ;;  %s584_s1 = inlined_call_operand.hbm [shape: bf16[256,64], index: 1, kind: input, shape index: {}]   ;;  %s585_s2 = inlined_call_operand.hbm [shape: f32[1,64], index: 2, kind: input, shape index: {}]   ;;  %s586_s3 = inlined_call_operand.hbm [shape: f32[16,64], index: 3, kind: input, shape index: {}]   ;;  %s587_s4 = inlined_call_operand.hbm [shape: f32[16,64], index: 4, kind: output, shape index: {}]  }
   0x1   :  { %10 = vsyncpa [#allocation6], 0 }
   0x2   :  { %11 = vsyncpa [#allocation9], 0 }
   0x3   :  { %12 = vsyncpa [#allocation4], 0  ;;  %s473_s15 = smov [#allocation5]   ;;  %s355_s19 = scalar_lea.hbm %s584_s1, 2048 }
   0x4   :  { %s30_s16 = sshll.u32 %s473_s15, 4  ;;  %p356_p0 = scmp.ne.s32.totalorder %s584_s1, %s355_s19  ;;  %s31_s16 = int_to_ptr.vmem [resolvable:$true] %s30_s16 }
   0x5   :  { %p359_p1 = scmp.lt.u32.totalorder %s355_s19, %s584_s1 }
   0x7   :  { %p361_p2 = pnand %p359_p1, %p356_p0 }
   0x9   :  { %364 = shalt.err (!%p361_p2)
}
   0xa   :  { %s365_s24 = scalar_lea.vmem %s31_s16, 2048  ;;  %p370_p4 = scmp.lt.s32.totalorder %s31_s16, %s31_s16 }
   0xb   :  { %p366_p3 = scmp.ne.s32.totalorder %s31_s16, %s365_s24  ;;  %p371_p5 = scmp.lt.s32.totalorder %s365_s24, %s365_s24 }
   0xd   :  { %p372_p6 = por %p371_p5, %p370_p4 }
   0xf   :  { %p373_p7 = pnand %p372_p6, %p366_p3 }
  0x11   :  { %376 = shalt.err (!%p373_p7)
}
  0x12   :  { %s474_s25 = smov 64   ;;  %s475_s26 = smov 4  }
  0x13   :  { %36 = dma.hbm_to_vmem [thread:$0]  %s584_s1, 2048, %s31_s16, [#allocation6], %s474_s25, %s474_s25, %s475_s26  }
  0x14   :  { %s476_s29 = smov [#allocation2]   ;;  %s377_s7 = scalar_lea.hbm %s583_s0, 256 }
  0x15   :  { %s18_s30 = sshll.u32 %s476_s29, 4  ;;  %p378_p8 = scmp.ne.s32.totalorder %s583_s0, %s377_s7  ;;  %s19_s30 = int_to_ptr.vmem [resolvable:$true] %s18_s30 }
  0x16   :  { %p381_p9 = scmp.lt.u32.totalorder %s377_s7, %s583_s0 }
  0x18   :  { %p383_p10 = pnand %p381_p9, %p378_p8 }
  0x1a   :  { %386 = shalt.err (!%p383_p10)
}
  0x1b   :  { %s387_s12 = scalar_lea.vmem %s19_s30, 256  ;;  %p392_p12 = scmp.lt.s32.totalorder %s19_s30, %s19_s30 }
  0x1c   :  { %p388_p11 = scmp.ne.s32.totalorder %s19_s30, %s387_s12  ;;  %p393_p13 = scmp.lt.s32.totalorder %s387_s12, %s387_s12 }
  0x1e   :  { %p394_p0 = por %p393_p13, %p392_p12 }
  0x20   :  { %p395_p1 = pnand %p394_p0, %p388_p11 }
  0x22   :  { %398 = shalt.err (!%p395_p1)
}
  0x23   :  { %s477_s1 = smov 128   ;;  %s478_s13 = smov 8  }
  0x24   :  { %24 = dma.hbm_to_vmem [thread:$0]  %s583_s0, 256, %s19_s30, [#allocation3], %s477_s1, %s477_s1, %s478_s13  }
  0x25   :  { %s479_s16 = smov [#allocation7]   ;;  %s480_s18 = smov [#allocation8]  }
  0x26   :  { %s43_s17 = sshll.u32 %s479_s16, 4  ;;  %s52_s19 = sshll.u32 %s480_s18, 4  ;;  %s44_s17 = int_to_ptr.vmem [resolvable:$true] %s43_s17  ;;  %s534_s19 = int_to_ptr.vmem [resolvable:$true] %s52_s19 }
  0x27   :  { %s399_s22 = scalar_lea.hbm %s585_s2, 16 }
  0x28   :  { %p400_p2 = scmp.ne.s32.totalorder %s585_s2, %s399_s22  ;;  %p403_p3 = scmp.lt.u32.totalorder %s399_s22, %s585_s2 }
  0x2a   :  { %p405_p4 = pnand %p403_p3, %p400_p2 }
  0x2c   :  { %408 = shalt.err (!%p405_p4)
}
  0x2d   :  { %s409_s0 = scalar_lea.vmem %s44_s17, 16  ;;  %s413_s27 = scalar_lea.vmem %s44_s17, 32 }
  0x2e   :  { %p410_p5 = scmp.ne.s32.totalorder %s44_s17, %s409_s0  ;;  %p414_p6 = scmp.lt.s32.totalorder %s44_s17, %s44_s17 }
  0x2f   :  { %p415_p7 = scmp.lt.s32.totalorder %s413_s27, %s409_s0 }
  0x31   :  { %p416_p8 = por %p415_p7, %p414_p6 }
  0x33   :  { %p417_p9 = pnand %p416_p8, %p410_p5 }
  0x35   :  { %420 = shalt.err (!%p417_p9)
}
  0x36   :  { %46 = dma.hbm_to_vmem [thread:$0]  %s585_s2, 16, %s44_s17, [#allocation6]  }
  0x37   :  { %s421_s6 = scalar_lea.hbm %s586_s3, 256 }
  0x38   :  { %p422_p10 = scmp.ne.s32.totalorder %s586_s3, %s421_s6  ;;  %p425_p11 = scmp.lt.u32.totalorder %s421_s6, %s586_s3 }
  0x3a   :  { %p427_p12 = pnand %p425_p11, %p422_p10 }
  0x3c   :  { %430 = shalt.err (!%p427_p12)
}
  0x3d   :  { %s431_s11 = scalar_lea.vmem %s534_s19, 256  ;;  %p436_p0 = scmp.lt.s32.totalorder %s534_s19, %s534_s19 }
  0x3e   :  { %p432_p13 = scmp.ne.s32.totalorder %s534_s19, %s431_s11  ;;  %p437_p1 = scmp.lt.s32.totalorder %s431_s11, %s431_s11 }
  0x40   :  { %p438_p2 = por %p437_p1, %p436_p0 }
  0x42   :  { %p439_p3 = pnand %p438_p2, %p432_p13 }
  0x44   :  { %442 = shalt.err (!%p439_p3)
}
  0x45   :  { %58 = dma.hbm_to_vmem [thread:$0]  %s586_s3, 256, %s534_s19, [#allocation9], %s477_s1, %s477_s1, %s478_s13  }
  0x46   :  { %465 = dma.done.wait [#allocation3], 256  }
  0x47   :  { %466 = vsyncadd [#allocation3], 4294967040 }
  0x48   :  { %467 = dma.done.wait [#allocation6], 2064  }
  0x49   :  { %468 = vsyncadd [#allocation6], 4294965232 }
  0x4a   :  { %469 = dma.done.wait [#allocation9], 256  }
  0x4b   :  { %470 = vsyncadd [#allocation9], 4294967040  ;;  %v336_v0 = vld [vmem:[#allocation5 + $0x40] sm:$0xff]   ;;  %v338_v2 = vld [vmem:[#allocation5 + $0x48] sm:$0xff]   ;;  %vm264_vm0 = vcmask 523264   ;;  %s481_s3 = smov [#allocation10]  }
  0x4c   :  { %v337_v1 = vld [vmem:[#allocation5] sm:$0xff]   ;;  %305 = vmatprep.subr.bf16.mxu0 %v336_v0  ;;  %v339_v3 = vld [vmem:[#allocation5 + $0x8] sm:$0xff]   ;;  %v340_v4 = vld [vmem:[#allocation5 + $0x50] sm:$0xff]   ;;  %s272_s14 = sshll.u32 %s481_s3, 4  ;;  %s273_s14 = int_to_ptr.vmem [resolvable:$true] %s272_s14 }
  0x4d   :  { %306 = vmatpush3.bf16.msra.mxu0 %v337_v1  ;;  %v341_v5 = vld [vmem:[#allocation5 + $0x10] sm:$0xff]   ;;  %v342_v6 = vld [vmem:[#allocation5 + $0x58] sm:$0xff]   ;;  %v344_v8 = vld [vmem:[#allocation5 + $0x60] sm:$0xff]   ;;  %s443_s15 = scalar_lea.vmem %s273_s14, 256  ;;  %p448_p5 = scmp.lt.s32.totalorder %s273_s14, %s273_s14 }
  0x4e   :  { %307 = vmatprep.subr.bf16.mxu0 %v338_v2  ;;  %v343_v7 = vld [vmem:[#allocation5 + $0x18] sm:$0xff]   ;;  %v345_v9 = vld [vmem:[#allocation5 + $0x20] sm:$0xff]   ;;  %v346_v10 = vld [vmem:[#allocation5 + $0x68] sm:$0xff]   ;;  %p444_p4 = scmp.ne.s32.totalorder %s273_s14, %s443_s15  ;;  %p449_p6 = scmp.lt.s32.totalorder %s443_s15, %s443_s15 }
  0x4f   :  { %v354_v11 = vld [vmem:[#allocation2 + $0x4] ss:$8 sps:$4 sm:$0xff]   ;;  %v347_v12 = vld [vmem:[#allocation5 + $0x28] sm:$0xff]   ;;  %v352_v17 = vld [vmem:[#allocation2] ss:$8 sps:$4 sm:$0xff]  }
  0x50   :  { %251 = vmatprep.mubr.bf16.mxu0 %v354_v11  ;;  %v348_v13 = vld [vmem:[#allocation5 + $0x70] sm:$0xff]   ;;  %v350_v15 = vld [vmem:[#allocation5 + $0x78] sm:$0xff]   ;;  %v286_v19 = vld [vmem:[#allocation7] ss:$0 sm:$0xff]  ;;  %p450_p7 = por %p449_p6, %p448_p5 }
  0x51   :  { %308 = vmatpush3.bf16.msra.mxu0 %v339_v3  ;;  %v349_v14 = vld [vmem:[#allocation5 + $0x30] sm:$0xff]   ;;  %v351_v16 = vld [vmem:[#allocation5 + $0x38] sm:$0xff]   ;;  %v260_v23 = vld [vmem:[#allocation8] sm:$0xff] }
  0x52   :  { %309 = vmatprep.subr.bf16.mxu0 %v340_v4  ;;  %v261_v27 = vld [vmem:[#allocation8 + $0x8] sm:$0xff]  ;;  %p451_p8 = pnand %p450_p7, %p444_p4 }
  0x55   :  { %310 = vmatpush3.bf16.msra.mxu0 %v341_v5 }
  0x56   :  { %311 = vmatprep.subr.bf16.mxu0 %v342_v6 }
  0x59   :  { %312 = vmatpush3.bf16.msra.mxu0 %v343_v7 }
  0x5a   :  { %313 = vmatprep.subr.bf16.mxu0 %v344_v8 }
  0x5d   :  { %314 = vmatpush3.bf16.msra.mxu0 %v345_v9 }
  0x5e   :  { %315 = vmatprep.subr.bf16.mxu0 %v346_v10 }
  0x61   :  { %316 = vmatpush3.bf16.msra.mxu0 %v347_v12 }
  0x62   :  { %317 = vmatprep.subr.bf16.mxu0 %v348_v13 }
  0x65   :  { %318 = vmatpush3.bf16.msra.mxu0 %v349_v14 }
  0x66   :  { %319 = vmatprep.subr.bf16.mxu0 %v350_v15 }
  0x69   :  { %320 = vmatpush3.bf16.msra.mxu0 %v351_v16 }
  0x6c   :  { %252 = vmatmul.mubr.bf16.vlgmr.msra.gmra.mrb[0].mxu0 %v352_v17 }
 0x13f   :  { %v321_v18 = vpop.f32.mrb[0].mxu0 }
 0x140   :  { %v322_v20 = vpop.f32.mrb[1].mxu0 }
 0x141   :  { %v323_v21 = vadd.f32 %v322_v20, %v321_v18  ;;  %v324_v22 = vpop.f32.mrb[2].mxu0 }
 0x142   :  { %v325_v24 = vpop.f32.mrb[3].mxu0 }
 0x143   :  { %v254_v25 = vadd.f32 %v323_v21, %v286_v19  ;;  %v326_v26 = vadd.f32 %v325_v24, %v324_v22 }
 0x145   :  { %v262_v28 = vadd.f32 %v260_v23, %v254_v25  ;;  %v257_v29 = vadd.f32 %v326_v26, %v286_v19 }
 0x147   :  { %v263_v30 = vadd.f32 %v261_v27, %v257_v29  ;;  %265 = vst.msk [vmem:[#allocation10] sm:$0xff] %vm264_vm0, %v262_v28 }
 0x149   :  { %266 = vst.msk [vmem:[#allocation10 + $0x8] sm:$0xff] %vm264_vm0, %v263_v30 }
 0x14a   :  { %454 = shalt.err (!%p451_p8)
}
 0x14b   :  { %s455_s18 = scalar_lea.hbm %s587_s4, 256 }
 0x14c   :  { %p456_p9 = scmp.ne.s32.totalorder %s587_s4, %s455_s18  ;;  %p459_p10 = scmp.lt.u32.totalorder %s455_s18, %s587_s4 }
 0x14e   :  { %p461_p11 = pnand %p459_p10, %p456_p9 }
 0x150   :  { %464 = shalt.err (!%p461_p11)
}
 0x151   :  { %278 = dma.vmem_to_hbm [thread:$0]  %s273_s14, 256, %s587_s4, [#allocation4], %s477_s1, %s477_s1, %s478_s13  }
 0x152   :  { %471 = dma.done.wait [#allocation4], 256  }
 0x153   :  { %472 = vsyncadd [#allocation4], 4294967040 }
 0x154   :  { %282 = vsyncpa [#allocation3], 1 }
 0x155   :  { %283 = vsyncpa [#allocation6], 1 }
 0x156   :  { %284 = vsyncpa [#allocation9], 1 }
 0x157   :  { %285 = vsyncpa [#allocation4], 1 }

// kernel: gpt2_forecaster_forward.22
= control target key start
LH: loop header
LB: loop body
LE: loop exit
PB: predicated region body
PF: predicated region fallthrough
CT: control target
= control target key end

     0   :  { %s1195_s0 = inlined_call_operand.hbm [shape: f32[2,8,64], index: 0, kind: input, shape index: {}]   ;;  %s1196_s1 = inlined_call_operand.hbm [shape: f32[1,64], index: 1, kind: input, shape index: {}]   ;;  %s1197_s2 = inlined_call_operand.hbm [shape: f32[1,64], index: 2, kind: input, shape index: {}]   ;;  %s1198_s3 = inlined_call_operand.hbm [shape: f32[64,1], index: 3, kind: input, shape index: {}]   ;;  %s1199_s4 = inlined_call_operand.<no memory space> [shape: f32[1,1], index: 4, kind: input, shape index: {}]   ;;  %s1200_s5 = inlined_call_operand.hbm [shape: f32[2,1,64], index: 5, kind: output, shape index: {}]  }
   0x1   :  { %v10_v0 = vstv %s1199_s4 }
   0x2   :  { %11 = vst [vmem:[#allocation2] sm:$0x1] %v10_v0 }
   0x3   :  { %12 = vsyncpa [#allocation4], 0 }
   0x4   :  { %14 = vsyncpa [#allocation4 + $0x1], 0 }
   0x5   :  { %15 = vsyncpa [#allocation7], 0 }
   0x6   :  { %16 = vsyncpa [#allocation10], 0 }
   0x7   :  { %17 = vsyncpa [#allocation5], 0 }
   0x8   :  { %19 = vsyncpa [#allocation5 + $0x1], 0  ;;  %s937_s20 = smov 0   ;;  %s939_s21 = smov 0  }
   0x9   :  { %s941_s22 = smov 0   ;;  %s943_s23 = smov 0  }
   0xa LB: > { %s958_s4 = sadd.s32 4294967295, %s893_s23   ;;  %s571_s24 = sadd.s32 4294967294, %s893_s23   ;;  %s893_s23 = sphi %s943_s23, %s1223_s23   ;;  %s889_s22 = sphi %s941_s22, %s1222_s22   ;;  %s885_s21 = sphi %s939_s21, %s1221_s21   ;;  %s881_s20 = sphi %s937_s20, %s1220_s20  }
   0xb   : > { %p45_p0 = scmp.ne.s32.totalorder %s885_s21, %s881_s20  ;;  %p1201_p1 = scmp.eq.s32.totalorder %s958_s4, 0 }
   0xc   : > { %p159_p3 = scmp.eq.s32.totalorder %s571_s24, 1  ;;  %p572_p5 = scmp.ge.s32.totalorder %s893_s23, 1 }
   0xd   : > { %p967_p4 = por %p1201_p1, %p45_p0  ;;  %p166_p7 = scmp.lt.s32.totalorder %s893_s23, 3 }
   0xe   : > { %p972_p6 = por %p159_p3, %p45_p0  ;;  %s895_s28 = smov [#allocation6]  }
   0xf   : > { %s1204_s25 = scalar_select %p967_p4, 1, 0 }
  0x10   : > { %s1205_s26 = scalar_select %p972_p6, 1, 0 }
  0x11   : > { %p977_p8 = pnand %p572_p5, %p166_p7  ;;  %s179_s29 = sshll.u32 %s895_s28, 4  ;;  %s180_s29 = int_to_ptr.vmem [resolvable:$true] %s179_s29 }
  0x12   : > { %s896_s30 = smov [#allocation8]   ;;  %s897_s8 = smov [#allocation9]  }
  0x13   : > { %s1206_s27 = scalar_select %p977_p8, 1, 0 }
  0x14   : > { %p633_p10 = pneg %p977_p8  ;;  %s190_s6 = sshll.u32 %s896_s30, 4  ;;  %s990_s6 = int_to_ptr.vmem [resolvable:$true] %s190_s6 }
  0x15   : > { %s200_s9 = sshll.u32 %s897_s8, 4  ;;  %s705_s12 = scalar_lea.hbm %s1196_s1, 16  ;;  %s992_s9 = int_to_ptr.vmem [resolvable:$true] %s200_s9 }
  0x16   : > { %p986_p11 = pnand %p633_p10, %p1201_p1  ;;  %p706_p12 = scmp.ne.s32.totalorder %s1196_s1, %s705_s12 }
  0x17   : > { %p712_p5 = scmp.lt.u32.totalorder %s705_s12, %s1196_s1 }
  0x18   : > { %p1002_p13 = pneg %p986_p11 }
  0x1a   : > { %p708_p0 = pnand %p1002_p13, %p706_p12 }
  0x1c   : > { %p709_p3 = pneg %p708_p0 }
  0x1e   : > { %p714_p7 = pnand %p712_p5, %p709_p3 }
  0x20   : > { %717 = shalt.err (!%p714_p7)
}
  0x21   : > { %s718_s18 = scalar_lea.vmem %s180_s29, 16  ;;  %s725_s19 = scalar_lea.vmem %s180_s29, 32 }
  0x22   : > { %p719_p10 = scmp.ne.s32.totalorder %s180_s29, %s718_s18  ;;  %p726_p2 = scmp.lt.s32.totalorder %s180_s29, %s180_s29 }
  0x23   : > { %p727_p6 = scmp.lt.s32.totalorder %s725_s19, %s718_s18 }
  0x24   : > { %p721_p9 = pnand %p719_p10, %p1002_p13 }
  0x25   : > { %p728_p4 = por %p727_p6, %p726_p2 }
  0x26   : > { %p722_p1 = pneg %p721_p9 }
  0x28   : > { %p729_p8 = pnand %p728_p4, %p722_p1 }
  0x2a   : > { %732 = shalt.err (!%p729_p8)
}
  0x2b   : > { %636 = dma.hbm_to_vmem [thread:$0]  (!%p986_p11), %s1196_s1, 16, %s180_s29, [#allocation7]  }
  0x2c   : > { %s733_s10 = scalar_lea.hbm %s1197_s2, 16 }
  0x2d   : > { %p734_p9 = scmp.ne.s32.totalorder %s1197_s2, %s733_s10  ;;  %p740_p1 = scmp.lt.u32.totalorder %s733_s10, %s1197_s2 }
  0x2f   : > { %p736_p12 = pnand %p734_p9, %p1002_p13 }
  0x31   : > { %p737_p2 = pneg %p736_p12 }
  0x33   : > { %p742_p4 = pnand %p740_p1, %p737_p2 }
  0x35   : > { %745 = shalt.err (!%p742_p4)
}
  0x36   : > { %s746_s29 = scalar_lea.vmem %s990_s6, 16  ;;  %s753_s16 = scalar_lea.vmem %s990_s6, 32 }
  0x37   : > { %p747_p6 = scmp.ne.s32.totalorder %s990_s6, %s746_s29  ;;  %p754_p3 = scmp.lt.s32.totalorder %s990_s6, %s990_s6 }
  0x38   : > { %p755_p5 = scmp.lt.s32.totalorder %s753_s16, %s746_s29 }
  0x39   : > { %p749_p8 = pnand %p747_p6, %p1002_p13 }
  0x3a   : > { %p756_p7 = por %p755_p5, %p754_p3 }
  0x3b   : > { %p750_p0 = pneg %p749_p8 }
  0x3d   : > { %p757_p10 = pnand %p756_p7, %p750_p0 }
  0x3f   : > { %760 = shalt.err (!%p757_p10)
}
  0x40   : > { %639 = dma.hbm_to_vmem [thread:$0]  (!%p986_p11), %s1197_s2, 16, %s990_s6, [#allocation7]  }
  0x41   : > { %s761_s28 = scalar_lea.hbm %s1198_s3, 1024 }
  0x42   : > { %p762_p9 = scmp.ne.s32.totalorder %s1198_s3, %s761_s28  ;;  %p768_p1 = scmp.lt.u32.totalorder %s761_s28, %s1198_s3 }
  0x44   : > { %p764_p12 = pnand %p762_p9, %p1002_p13 }
  0x46   : > { %p765_p2 = pneg %p764_p12 }
  0x48   : > { %p770_p4 = pnand %p768_p1, %p765_p2 }
  0x4a   : > { %773 = shalt.err (!%p770_p4)
}
  0x4b   : > { %s774_s6 = scalar_lea.vmem %s992_s9, 1024  ;;  %p782_p3 = scmp.lt.s32.totalorder %s992_s9, %s992_s9 }
  0x4c   : > { %p775_p6 = scmp.ne.s32.totalorder %s992_s9, %s774_s6  ;;  %p783_p5 = scmp.lt.s32.totalorder %s774_s6, %s774_s6 }
  0x4e   : > { %p777_p8 = pnand %p775_p6, %p1002_p13  ;;  %p784_p7 = por %p783_p5, %p782_p3 }
  0x50   : > { %p778_p0 = pneg %p777_p8 }
  0x52   : > { %p785_p10 = pnand %p784_p7, %p778_p0 }
  0x54   : > { %788 = shalt.err (!%p785_p10)
}
  0x55   : > { %s898_s12 = smov 128   ;;  %s899_s15 = smov 8  }
  0x56   : > { %642 = dma.hbm_to_vmem [thread:$0]  (!%p986_p11), %s1198_s3, 1024, %s992_s9, [#allocation10], %s898_s12, %s898_s12, %s899_s15  }
  0x57   : > { %s1066_s29 = sadd.s32 1, %s893_s23   ;;  %s32_s17 = sadd.s32 1, %s889_s22 }
  0x58   : > { %s29_s16 = ssub.s32 %s893_s23, %s1066_s29  ;;  %p39_p9 = scmp.ne.s32.totalorder %s889_s22, %s885_s21 }
  0x59   : > { %p30_p13 = scmp.eq.s32.totalorder %s29_s16, 0  ;;  %p40_p12 = scmp.eq.s32.totalorder %s893_s23, 0 }
  0x5a   : > { %p654_p2 = scmp.lt.s32.totalorder %s893_s23, 2  ;;  %p1209_p4 = scmp.eq.s32.totalorder %s958_s4, 1 }
  0x5b   : > { %s1076_s18 = scalar_select %p30_p13, %s889_s22, %s32_s17  }
  0x5c   : > { %p41_p1 = por %p40_p12, %p39_p9  ;;  %p1080_p6 = por %p1209_p4, %p39_p9 }
  0x5d   : > { %s217_s7 = sand.u32 1, %s889_s22   ;;  %s578_s24 = sshll.u32 %s893_s23, 7 }
  0x5e   : > { %s577_s9 = sshll.u32 %s217_s7, 3  ;;  %s1089_s8 = scalar_lea.hbm %s1195_s0, %s578_s24 }
  0x5f   : > { %s221_s10 = scalar_lea.vmem [#allocation3], %s577_s9  ;;  %p1091_p11 = pnand %p654_p2, %p41_p1 }
  0x60   : > { %s228_s11 = sshll.u32 %s221_s10, 4  ;;  %s218_s12 = scalar_lea.sflag [#allocation4], %s217_s7  ;;  %s1095_s11 = int_to_ptr.vmem [resolvable:$true] %s228_s11 }
  0x61   : > { %s789_s15 = scalar_lea.hbm %s1089_s8, 128  ;;  %p791_p0 = pneg %p1091_p11 }
  0x62   : > { %p790_p8 = scmp.ne.s32.totalorder %s1089_s8, %s789_s15  ;;  %s794_s16 = scalar_lea.hbm %s1195_s0, 256 }
  0x63   : > { %p795_p7 = scmp.lt.u32.totalorder %s1089_s8, %s1195_s0  ;;  %p796_p10 = scmp.lt.u32.totalorder %s794_s16, %s789_s15 }
  0x64   : > { %p792_p3 = pnand %p791_p0, %p790_p8  ;;  %p798_p9 = scmp.lt.u32.totalorder %s789_s15, %s1089_s8 }
  0x65   : > { %p797_p13 = por %p796_p10, %p795_p7 }
  0x66   : > { %p793_p5 = pneg %p792_p3 }
  0x67   : > { %p799_p12 = por %p798_p9, %p797_p13 }
  0x69   : > { %p800_p2 = pnand %p799_p12, %p793_p5 }
  0x6b   : > { %803 = shalt.err (!%p800_p2)
}
  0x6c   : > { %s804_s7 = scalar_lea.vmem %s1095_s11, 128  ;;  %s900_s9 = smov [#allocation3]  }
  0x6d   : > { %p805_p1 = scmp.ne.s32.totalorder %s1095_s11, %s804_s7  ;;  %s809_s28 = sshll.u32 %s900_s9, 4  ;;  %s810_s28 = int_to_ptr.vmem [resolvable:$false] %s809_s28 }
  0x6e   : > { %s811_s30 = scalar_lea.vmem %s810_s28, 256  ;;  %p812_p3 = scmp.lt.s32.totalorder %s1095_s11, %s810_s28 }
  0x6f   : > { %p807_p4 = pnand %p805_p1, %p791_p0  ;;  %p813_p7 = scmp.lt.s32.totalorder %s811_s30, %s804_s7 }
  0x71   : > { %p808_p8 = pneg %p807_p4  ;;  %p814_p10 = por %p813_p7, %p812_p3 }
  0x73   : > { %p815_p13 = pnand %p814_p10, %p808_p8 }
  0x75   : > { %818 = shalt.err (!%p815_p13)
}
  0x76   : > { %646 = dma.hbm_to_vmem [thread:$0]  (!%p1091_p11), %s1089_s8, 128, %s1095_s11, %s218_s12  }
  0x77   : > { %p1212_p5 = scmp.ne.s32.totalorder %s1206_s27, 0 }
  0x78   : > { %s1125_s10 = sand.u32 (!%p1212_p5), 1, %s885_s21   ;;  %p1213_p0 = scmp.ne.s32.totalorder (!%p1212_p5), %s1204_s25, 0 }
  0x79   : > { %237 = sbr.rel (%p1212_p5) target bundleno = 1051 (0x41b), region = 40  ;;  %s580_s15 = sshll.u32 (!%p1212_p5), %s1125_s10, 3 }
  0x7a   : > { %s240_s13 = scalar_lea.sflag (!%p1212_p5), [#allocation4], %s1125_s10  ;;  %s243_s14 = scalar_lea.vmem (!%p1212_p5), [#allocation3], %s580_s15 }
  0x80   : > { %864 = dma.done.wait (%p1213_p0), %s240_s13, 128  }
  0x81   : > { %866 = vsyncadd (%p1213_p0), %s240_s13, 4294967168  ;;  %p1214_p9 = scmp.eq.s32.totalorder %s958_s4, 0 }
  0x83   : > { %868 = dma.done.wait (%p1214_p9), [#allocation7], 32   ;;  %p1215_p11 = pmov %p1214_p9 }
  0x84   : > { %p1216_p12 = pmov %p1214_p9 }
  0x85   : > { %870 = vsyncadd (%p1215_p11), [#allocation7], 4294967264 }
  0x86   : > { %872 = dma.done.wait (%p1216_p12), [#allocation10], 1024   ;;  %p1217_p2 = pmov %p1214_p9 }
  0x87   : > { %vm283_vm0 = vcmask 523264   ;;  %v282_v1 = vld [vmem:[%s243_s14] sm:$0xff]  ;;  %v315_v8 = vld [vmem:[#allocation9] sm:$0xff]  ;;  %v901_v11 = vmov 0.0   ;;  %vm902_vm1 = vmmov 0   ;;  %vm418_vm2 = vcmask 1043456  }
  0x88   : > { %874 = vsyncadd (%p1217_p2), [#allocation10], 4294966272  ;;  %v284_v2 = vsel %vm283_vm0, %v282_v1, 0.0  ;;  %v316_v9 = vld [vmem:[#allocation9 + $0x8] sm:$0xff]  ;;  %599 = vmatprep.subr.bf16.mxu0 %v901_v11  ;;  %611 = vmatprep.subr.bf16.mxu1 %v901_v11  ;;  %v317_v12 = vld [vmem:[#allocation9 + $0x10] sm:$0xff]  ;;  %vm377_vm3 = vcmask 7168  }
  0x89   : > { %285 = vadd.xlane.f32.xlu0 %v284_v2  ;;  %v323_v10 = vpack.c.bf16 %v316_v9, %v315_v8  ;;  %v318_v13 = vld [vmem:[#allocation9 + $0x18] sm:$0xff]  ;;  %v319_v15 = vld [vmem:[#allocation9 + $0x20] sm:$0xff]  ;;  %v320_v16 = vld [vmem:[#allocation9 + $0x28] sm:$0xff]  ;;  %607 = vmatprep.mubr.msk.bf16.mxu0 %vm902_vm1, %v901_v11  ;;  %vm414_vm4 = vcmask 64512   ;;  %s589_s25 = sshll.u32 %s958_s4, 4  ;;  %s280_s27 = scalar_lea.vmem [#allocation11], %s1125_s10 }
  0x8a   : > { %v324_v14 = vpack.c.bf16 %v318_v13, %v317_v12  ;;  %v325_v17 = vpack.c.bf16 %v320_v16, %v319_v15  ;;  %v321_v18 = vld [vmem:[#allocation9 + $0x30] sm:$0xff]  ;;  %v322_v19 = vld [vmem:[#allocation9 + $0x38] sm:$0xff]  ;;  %613 = vmatprep.mubr.msk.bf16.mxu1 %vm902_vm1, %v901_v11  ;;  %v586_v32 = vld [vmem:[#allocation2] ss:$0 sm:$0xff]  ;;  %s476_s8 = sshll.u32 %s280_s27, 4  ;;  %vm461_vm5 = vcmask 516096   ;;  %s1151_s12 = scalar_lea.hbm %s1200_s5, %s589_s25  ;;  %s1153_s8 = int_to_ptr.vmem [resolvable:$true] %s476_s8 }
  0x8b   : > { %600 = vmatpush3.bf16.msra.mxu0 %v323_v10  ;;  %v326_v20 = vpack.c.bf16 %v322_v19, %v321_v18  ;;  %v584_v25 = vld [vmem:[#allocation6] ss:$0 sm:$0xff]  ;;  %v585_v27 = vld [vmem:[#allocation8] ss:$0 sm:$0xff]  ;;  %s464_s16 = scalar_lea.sflag [#allocation5], %s1125_s10  ;;  %s819_s17 = scalar_lea.vmem %s1153_s8, 16 }
  0x8c   : > { %601 = vmatprep.subr.bf16.mxu0 %v901_v11  ;;  %p820_p1 = scmp.ne.s32.totalorder %s1153_s8, %s819_s17  ;;  %s903_s4 = smov [#allocation11]  }
  0x8d   : > { %s823_s24 = sshll.u32 %s903_s4, 4  ;;  %s824_s24 = int_to_ptr.vmem [resolvable:$false] %s823_s24 }
  0x8e   : > { %p821_p4 = pnand %p820_p1, %p1080_p6  ;;  %s825_s7 = scalar_lea.vmem %s824_s24, 32 }
  0x8f   : > { %602 = vmatpush3.bf16.msra.mxu0 %v324_v14  ;;  %p826_p3 = scmp.lt.s32.totalorder %s1153_s8, %s824_s24  ;;  %p827_p7 = scmp.lt.s32.totalorder %s825_s7, %s819_s17 }
  0x90   : > { %603 = vmatprep.subr.bf16.mxu0 %v901_v11  ;;  %p822_p8 = pneg %p821_p4 }
  0x91   : > { %p828_p10 = por %p827_p7, %p826_p3 }
  0x93   : > { %604 = vmatpush3.bf16.msra.mxu0 %v325_v17  ;;  %p829_p13 = pnand %p828_p10, %p822_p8 }
  0x94   : > { %605 = vmatprep.subr.bf16.mxu0 %v901_v11 }
  0x97   : > { %606 = vmatpush3.bf16.msra.mxu0 %v326_v20 }
 0x116   : > { %v286_v3 = vpop.xlane.xlu0 %285 }
 0x117   : > { %v288_v4 = vmul.f32 0.015625, %v286_v3 }
 0x119   : > { %v289_v5 = vsub.f32 %v282_v1, %v288_v4 }
 0x11b   : > { %v290_v6 = vmul.f32 %v289_v5, %v289_v5 }
 0x11d   : > { %v291_v7 = vsel %vm283_vm0, %v290_v6, 0.0 }
 0x11e   : > { %292 = vadd.xlane.f32.xlu0 %v291_v7 }
 0x1ab   : > { %v293_v21 = vpop.xlane.xlu0 %292 }
 0x1ac   : > { %v294_v22 = vmul.f32 0.015625, %v293_v21 }
 0x1ae   : > { %v295_v23 = vadd.f32 1e-05, %v294_v22 }
 0x1b0   : > { %699 = vrsqrt.f32 %v295_v23 }
 0x1ba   : > { %v700_v24 = vpop.eup %699 }
 0x1bb   : > { %v297_v26 = vmul.f32 %v700_v24, %v289_v5 }
 0x1bd   : > { %v305_v28 = vmul.f32 %v584_v25, %v297_v26 }
 0x1bf   : > { %v313_v29 = vadd.f32 %v585_v27, %v305_v28 }
 0x1c1   : > { %v314_v30 = vpack.c.bf16 %v313_v29, %v313_v29 }
 0x1c3   : > { %608 = vmatmul.mubr.msk.bf16.vlgmr.msra.gmra.mrb[0].mxu0 %vm283_vm0, %v314_v30  ;;  %v419_v31 = vsel %vm418_vm2, %v314_v30, 0 }
 0x1c4   : > { %612 = vmatpush3.bf16.msra.mxu1 %v419_v31 }
 0x296   : > { %v371_v33 = vpop.f32.mrb[0].mxu0 }
 0x297   : > { %v372_v34 = vadd.f32 %v586_v32, %v371_v33  ;;  %v609_v35 = vpop.f32.mrb[1].mxu0 }
 0x298   : > { %v374_v36 = vpop.f32.mrb[2].mxu0 }
 0x299   : > { %v378_v37 = vsel %vm377_vm3, %v372_v34, -inf  ;;  %v610_v38 = vpop.f32.mrb[3].mxu0 }
 0x29a   : > { %v379_v39 = vrot.slane %v378_v37, 4 }
 0x29c   : > { %v380_v40 = vmax.f32 %v378_v37, %v379_v39 }
 0x29e   : > { %v381_v41 = vrot.slane %v380_v40, 2 }
 0x2a0   : > { %v382_v42 = vmax.f32 %v380_v40, %v381_v41 }
 0x2a2   : > { %v383_v43 = vrot.slane %v382_v42, 1 }
 0x2a4   : > { %v384_v44 = vmax.f32 %v382_v42, %v383_v43 }
 0x2a6   : > { %v385_v45 = vsub.f32 %v372_v34, %v384_v44 }
 0x2a8   : > { %v386_v46 = vmul.f32 1.442695, %v385_v45 }
 0x2aa   : > { %701 = vpow2.f32 %v386_v46 }
 0x2b4   : > { %v702_v47 = vpop.eup %701 }
 0x2b5   : > { %v388_v48 = vsel %vm377_vm3, %v702_v47, 0.0 }
 0x2b6   : > { %v389_v49 = vrot.slane %v388_v48, 4 }
 0x2b8   : > { %v390_v50 = vadd.f32 %v389_v49, %v388_v48 }
 0x2ba   : > { %v391_v51 = vrot.slane %v390_v50, 2 }
 0x2bc   : > { %v392_v52 = vadd.f32 %v391_v51, %v390_v50 }
 0x2be   : > { %v393_v53 = vrot.slane %v392_v52, 1 }
 0x2c0   : > { %v394_v54 = vadd.f32 %v393_v53, %v392_v52 }
 0x2c2   : > { %703 = vrcp.f32 %v394_v54 }
 0x2cc   : > { %v704_v55 = vpop.eup %703 }
 0x2cd   : > { %v396_v56 = vmul.f32 %v704_v55, %v702_v47 }
 0x2cf   : > { %v397_v57 = vpack.c.bf16 %v396_v56, %v396_v56 }
 0x2d1   : > { %398 = vxpose.xlu1.c.b16.start.end [1/1] (short) (narrow) %v397_v57, 16 }
 0x337   : > { %v406_v58 = vpop.trf.xlu1 }
 0x338   : > { %614 = vmatmul.mubr.msk.bf16.vlgmr.msra.gmra.mrb[0].mxu1 %vm414_vm4, %v406_v58 }
 0x40b   : > { %v455_v59 = vpop.f32.mrb[0].mxu1 }
 0x40c   : > { %462 = vst.msk [vmem:[%s280_s27] sm:$0x1] %vm461_vm5, %v455_v59  ;;  %v615_v60 = vpop.f32.mrb[1].mxu1 }
 0x40d   : > { %v458_v61 = vpop.f32.mrb[2].mxu1 }
 0x40e   : > { %832 = shalt.err (!%p829_p13)
}
 0x40f   : > { %s833_s9 = scalar_lea.hbm %s1151_s12, 16  ;;  %s837_s10 = scalar_lea.hbm %s1200_s5, 32 }
 0x410   : > { %p834_p5 = scmp.ne.s32.totalorder %s1151_s12, %s833_s9  ;;  %p838_p11 = scmp.lt.u32.totalorder %s1151_s12, %s1200_s5 }
 0x411   : > { %p839_p12 = scmp.lt.u32.totalorder %s837_s10, %s833_s9  ;;  %p841_p1 = scmp.lt.u32.totalorder %s833_s9, %s1151_s12 }
 0x412   : > { %p835_p0 = pnand %p834_p5, %p1080_p6 }
 0x413   : > { %p840_p2 = por %p839_p12, %p838_p11 }
 0x414   : > { %p836_p9 = pneg %p835_p0 }
 0x415   : > { %p842_p4 = por %p841_p1, %p840_p2 }
 0x417   : > { %p843_p8 = pnand %p842_p4, %p836_p9 }
 0x419   : > { %846 = shalt.err (!%p843_p8)
}
 0x41a   : > { %631 = dma.vmem_to_hbm [thread:$0]  (%p1080_p6), %s1153_s8, 16, %s1151_s12, %s464_s16   ;;  %v616_v62 = vpop.f32.mrb[3].mxu1 }
 0x41b PF: > { %s488_s14 = sand.u32 1, %s881_s20   ;;  %p1218_p3 = scmp.ne.s32.totalorder %s1205_s26, 0 }
 0x41c   : > { %p1219_p7 = scmp.ge.s32.totalorder %s893_s23, 2  ;;  %s489_s25 = scalar_lea.sflag [#allocation5], %s488_s14 }
 0x41e   : > { %p648_p10 = pnand %p1219_p7, %p1218_p3 }
 0x420   : > { %876 = dma.done.wait (!%p648_p10), %s489_s25, 16  }
 0x421   : > { %878 = vsyncadd (!%p648_p10), %s489_s25, 4294967280  ;;  %p22_p13 = scmp.ge.s32.totalorder %s1066_s29, 4   ;;  %s1220_s20 = smov %s885_s21 }
 0x422   : > { %s1221_s21 = smov %s889_s22  ;;  %s1222_s22 = smov %s1076_s18 }
 0x423   : > { %s1223_s23 = smov %s1066_s29  ;;  %24 = sbr.rel (!%p22_p13) target bundleno = 10 (0xa), region = 97 }
 0x42a   :  { %493 = vsyncpa [#allocation4], 1 }
 0x42b   :  { %495 = vsyncpa [#allocation4 + $0x1], 1 }
 0x42c   :  { %496 = vsyncpa [#allocation7], 1 }
 0x42d   :  { %497 = vsyncpa [#allocation10], 1 }
 0x42e   :  { %498 = vsyncpa [#allocation5], 1 }
 0x42f   :  { %500 = vsyncpa [#allocation5 + $0x1], 1 }

// kernel: gpt2_forecaster_forward.23
= control target key start
LH: loop header
LB: loop body
LE: loop exit
PB: predicated region body
PF: predicated region fallthrough
CT: control target
= control target key end

     0   :  { %15 = vsyncpa [#allocation3], 0  ;;  %s1017_s0 = inlined_call_operand.hbm [shape: f32[2,64], index: 0, kind: input, shape index: {}]   ;;  %s1018_s1 = inlined_call_operand.hbm [shape: bf16[64,128], index: 1, kind: input, shape index: {}]   ;;  %s1019_s2 = inlined_call_operand.hbm [shape: f32[1,128], index: 2, kind: input, shape index: {}]   ;;  %s1020_s3 = inlined_call_operand.hbm [shape: bf16[128,64], index: 3, kind: input, shape index: {}]   ;;  %s1021_s4 = inlined_call_operand.hbm [shape: f32[1,64], index: 4, kind: input, shape index: {}]   ;;  %s1022_s5 = inlined_call_operand.hbm [shape: bf16[64,4], index: 5, kind: input, shape index: {}]   ;;  %s1023_s6 = inlined_call_operand.hbm [shape: f32[1,4], index: 6, kind: input, shape index: {}]   ;;  %s1024_s7 = inlined_call_operand.hbm [shape: f32[2,4], index: 7, kind: input, shape index: {}]   ;;  %s1025_s8 = inlined_call_operand.hbm [shape: f32[2,4], index: 8, kind: output, shape index: {0}]   ;;  %s1026_s9 = inlined_call_operand.hbm [shape: f32[1,1], index: 9, kind: output, shape index: {1}]  }
   0x1   :  { %16 = vsyncpa [#allocation6], 0 }
   0x2   :  { %17 = vsyncpa [#allocation9], 0 }
   0x3   :  { %18 = vsyncpa [#allocation12], 0 }
   0x4   :  { %19 = vsyncpa [#allocation15], 0 }
   0x5   :  { %20 = vsyncpa [#allocation4], 0 }
   0x6   :  { %21 = vsyncpa [#allocation18], 0  ;;  %s819_s30 = smov [#allocation5]   ;;  %s585_s13 = scalar_lea.hbm %s1018_s1, 512 }
   0x7   :  { %s37_s10 = sshll.u32 %s819_s30, 4  ;;  %p586_p0 = scmp.ne.s32.totalorder %s1018_s1, %s585_s13  ;;  %s38_s10 = int_to_ptr.vmem [resolvable:$true] %s37_s10 }
   0x8   :  { %p589_p1 = scmp.lt.u32.totalorder %s585_s13, %s1018_s1 }
   0xa   :  { %p591_p2 = pnand %p589_p1, %p586_p0 }
   0xc   :  { %594 = shalt.err (!%p591_p2)
}
   0xd   :  { %s595_s18 = scalar_lea.vmem %s38_s10, 512  ;;  %p600_p4 = scmp.lt.s32.totalorder %s38_s10, %s38_s10 }
   0xe   :  { %p596_p3 = scmp.ne.s32.totalorder %s38_s10, %s595_s18  ;;  %p601_p5 = scmp.lt.s32.totalorder %s595_s18, %s595_s18 }
  0x10   :  { %p602_p6 = por %p601_p5, %p600_p4 }
  0x12   :  { %p603_p7 = pnand %p602_p6, %p596_p3 }
  0x14   :  { %606 = shalt.err (!%p603_p7)
}
  0x15   :  { %s820_s19 = smov 64   ;;  %s821_s20 = smov 4  }
  0x16   :  { %43 = dma.hbm_to_vmem [thread:$0]  %s1018_s1, 512, %s38_s10, [#allocation6], %s820_s19, %s820_s19, %s821_s20  }
  0x17   :  { %s822_s23 = smov [#allocation8]   ;;  %s823_s25 = smov [#allocation11]  }
  0x18   :  { %s59_s24 = sshll.u32 %s822_s23, 4  ;;  %s81_s26 = sshll.u32 %s823_s25, 4  ;;  %s60_s24 = int_to_ptr.vmem [resolvable:$true] %s59_s24  ;;  %s82_s26 = int_to_ptr.vmem [resolvable:$true] %s81_s26 }
  0x19   :  { %s607_s29 = scalar_lea.hbm %s1020_s3, 1024 }
  0x1a   :  { %p608_p8 = scmp.ne.s32.totalorder %s1020_s3, %s607_s29  ;;  %p611_p9 = scmp.lt.u32.totalorder %s607_s29, %s1020_s3 }
  0x1c   :  { %p613_p10 = pnand %p611_p9, %p608_p8 }
  0x1e   :  { %616 = shalt.err (!%p613_p10)
}
  0x1f   :  { %s617_s1 = scalar_lea.vmem %s60_s24, 1024  ;;  %p622_p12 = scmp.lt.s32.totalorder %s60_s24, %s60_s24 }
  0x20   :  { %p618_p11 = scmp.ne.s32.totalorder %s60_s24, %s617_s1  ;;  %p623_p13 = scmp.lt.s32.totalorder %s617_s1, %s617_s1 }
  0x22   :  { %p624_p0 = por %p623_p13, %p622_p12 }
  0x24   :  { %p625_p1 = pnand %p624_p0, %p618_p11 }
  0x26   :  { %628 = shalt.err (!%p625_p1)
}
  0x27   :  { %65 = dma.hbm_to_vmem [thread:$0]  %s1020_s3, 1024, %s60_s24, [#allocation9], %s820_s19, %s820_s19, %s821_s20  }
  0x28   :  { %s629_s17 = scalar_lea.hbm %s1022_s5, 512 }
  0x29   :  { %p630_p2 = scmp.ne.s32.totalorder %s1022_s5, %s629_s17  ;;  %p633_p3 = scmp.lt.u32.totalorder %s629_s17, %s1022_s5 }
  0x2b   :  { %p635_p4 = pnand %p633_p3, %p630_p2 }
  0x2d   :  { %638 = shalt.err (!%p635_p4)
}
  0x2e   :  { %s639_s25 = scalar_lea.vmem %s82_s26, 512  ;;  %p644_p6 = scmp.lt.s32.totalorder %s82_s26, %s82_s26 }
  0x2f   :  { %p640_p5 = scmp.ne.s32.totalorder %s82_s26, %s639_s25  ;;  %p645_p7 = scmp.lt.s32.totalorder %s639_s25, %s639_s25 }
  0x31   :  { %p646_p8 = por %p645_p7, %p644_p6 }
  0x33   :  { %p647_p9 = pnand %p646_p8, %p640_p5 }
  0x35   :  { %650 = shalt.err (!%p647_p9)
}
  0x36   :  { %87 = dma.hbm_to_vmem [thread:$0]  %s1022_s5, 512, %s82_s26, [#allocation12], %s820_s19, %s820_s19, %s821_s20  }
  0x37   :  { %s824_s27 = smov [#allocation2]   ;;  %s825_s29 = smov [#allocation7]  }
  0x38   :  { %s28_s28 = sshll.u32 %s824_s27, 4  ;;  %s50_s30 = sshll.u32 %s825_s29, 4  ;;  %s29_s28 = int_to_ptr.vmem [resolvable:$true] %s28_s28  ;;  %s51_s30 = int_to_ptr.vmem [resolvable:$true] %s50_s30 }
  0x39   :  { %s651_s13 = scalar_lea.hbm %s1017_s0, 32 }
  0x3a   :  { %p652_p10 = scmp.ne.s32.totalorder %s1017_s0, %s651_s13  ;;  %p655_p11 = scmp.lt.u32.totalorder %s651_s13, %s1017_s0 }
  0x3c   :  { %p657_p12 = pnand %p655_p11, %p652_p10 }
  0x3e   :  { %660 = shalt.err (!%p657_p12)
}
  0x3f   :  { %s661_s5 = scalar_lea.vmem %s29_s28, 32  ;;  %p666_p0 = scmp.lt.s32.totalorder %s29_s28, %s29_s28 }
  0x40   :  { %p662_p13 = scmp.ne.s32.totalorder %s29_s28, %s661_s5  ;;  %p667_p1 = scmp.lt.s32.totalorder %s661_s5, %s661_s5 }
  0x42   :  { %p668_p2 = por %p667_p1, %p666_p0 }
  0x44   :  { %p669_p3 = pnand %p668_p2, %p662_p13 }
  0x46   :  { %672 = shalt.err (!%p669_p3)
}
  0x47   :  { %31 = dma.hbm_to_vmem [thread:$0]  %s1017_s0, 32, %s29_s28, [#allocation3]  }
  0x48   :  { %s673_s17 = scalar_lea.hbm %s1019_s2, 16 }
  0x49   :  { %p674_p4 = scmp.ne.s32.totalorder %s1019_s2, %s673_s17  ;;  %p677_p5 = scmp.lt.u32.totalorder %s673_s17, %s1019_s2 }
  0x4b   :  { %p679_p6 = pnand %p677_p5, %p674_p4 }
  0x4d   :  { %682 = shalt.err (!%p679_p6)
}
  0x4e   :  { %s683_s25 = scalar_lea.vmem %s51_s30, 16  ;;  %s687_s3 = scalar_lea.vmem %s51_s30, 32 }
  0x4f   :  { %p684_p7 = scmp.ne.s32.totalorder %s51_s30, %s683_s25  ;;  %p688_p8 = scmp.lt.s32.totalorder %s51_s30, %s51_s30 }
  0x50   :  { %p689_p9 = scmp.lt.s32.totalorder %s687_s3, %s683_s25 }
  0x52   :  { %p690_p10 = por %p689_p9, %p688_p8 }
  0x54   :  { %p691_p11 = pnand %p690_p10, %p684_p7 }
  0x56   :  { %694 = shalt.err (!%p691_p11)
}
  0x57   :  { %53 = dma.hbm_to_vmem [thread:$0]  %s1019_s2, 16, %s51_s30, [#allocation6]  }
  0x58   :  { %s826_s27 = smov [#allocation10]   ;;  %s827_s29 = smov [#allocation13]  }
  0x59   :  { %s72_s28 = sshll.u32 %s826_s27, 4  ;;  %s94_s11 = sshll.u32 %s827_s29, 4  ;;  %s73_s28 = int_to_ptr.vmem [resolvable:$true] %s72_s28  ;;  %s95_s11 = int_to_ptr.vmem [resolvable:$true] %s94_s11 }
  0x5a   :  { %s695_s1 = scalar_lea.hbm %s1021_s4, 16 }
  0x5b   :  { %p696_p12 = scmp.ne.s32.totalorder %s1021_s4, %s695_s1  ;;  %p699_p13 = scmp.lt.u32.totalorder %s695_s1, %s1021_s4 }
  0x5d   :  { %p701_p0 = pnand %p699_p13, %p696_p12 }
  0x5f   :  { %704 = shalt.err (!%p701_p0)
}
  0x60   :  { %s705_s2 = scalar_lea.vmem %s73_s28, 16  ;;  %s709_s30 = scalar_lea.vmem %s73_s28, 32 }
  0x61   :  { %p706_p1 = scmp.ne.s32.totalorder %s73_s28, %s705_s2  ;;  %p710_p2 = scmp.lt.s32.totalorder %s73_s28, %s73_s28 }
  0x62   :  { %p711_p3 = scmp.lt.s32.totalorder %s709_s30, %s705_s2 }
  0x64   :  { %p712_p4 = por %p711_p3, %p710_p2 }
  0x66   :  { %p713_p5 = pnand %p712_p4, %p706_p1 }
  0x68   :  { %716 = shalt.err (!%p713_p5)
}
  0x69   :  { %75 = dma.hbm_to_vmem [thread:$0]  %s1021_s4, 16, %s73_s28, [#allocation9]  }
  0x6a   :  { %s717_s17 = scalar_lea.hbm %s1023_s6, 16 }
  0x6b   :  { %p718_p6 = scmp.ne.s32.totalorder %s1023_s6, %s717_s17  ;;  %p721_p7 = scmp.lt.u32.totalorder %s717_s17, %s1023_s6 }
  0x6d   :  { %p723_p8 = pnand %p721_p7, %p718_p6 }
  0x6f   :  { %726 = shalt.err (!%p723_p8)
}
  0x70   :  { %s727_s25 = scalar_lea.vmem %s95_s11, 16  ;;  %s731_s3 = scalar_lea.vmem %s95_s11, 32 }
  0x71   :  { %p728_p9 = scmp.ne.s32.totalorder %s95_s11, %s727_s25  ;;  %p732_p10 = scmp.lt.s32.totalorder %s95_s11, %s95_s11 }
  0x72   :  { %p733_p11 = scmp.lt.s32.totalorder %s731_s3, %s727_s25 }
  0x74   :  { %p734_p12 = por %p733_p11, %p732_p10 }
  0x76   :  { %p735_p13 = pnand %p734_p12, %p728_p9 }
  0x78   :  { %738 = shalt.err (!%p735_p13)
}
  0x79   :  { %97 = dma.hbm_to_vmem [thread:$0]  %s1023_s6, 16, %s95_s11, [#allocation12]  }
  0x7a   :  { %s828_s24 = smov [#allocation14]   ;;  %s739_s12 = scalar_lea.hbm %s1024_s7, 32 }
  0x7b   :  { %s104_s27 = sshll.u32 %s828_s24, 4  ;;  %p740_p0 = scmp.ne.s32.totalorder %s1024_s7, %s739_s12  ;;  %s105_s27 = int_to_ptr.vmem [resolvable:$true] %s104_s27 }
  0x7c   :  { %p743_p1 = scmp.lt.u32.totalorder %s739_s12, %s1024_s7 }
  0x7e   :  { %p745_p2 = pnand %p743_p1, %p740_p0 }
  0x80   :  { %748 = shalt.err (!%p745_p2)
}
  0x81   :  { %s749_s15 = scalar_lea.vmem %s105_s27, 32  ;;  %p754_p4 = scmp.lt.s32.totalorder %s105_s27, %s105_s27 }
  0x82   :  { %p750_p3 = scmp.ne.s32.totalorder %s105_s27, %s749_s15  ;;  %p755_p5 = scmp.lt.s32.totalorder %s749_s15, %s749_s15 }
  0x84   :  { %p756_p6 = por %p755_p5, %p754_p4 }
  0x86   :  { %p757_p7 = pnand %p756_p6, %p750_p3 }
  0x88   :  { %760 = shalt.err (!%p757_p7)
}
  0x89   :  { %107 = dma.hbm_to_vmem [thread:$0]  %s1024_s7, 32, %s105_s27, [#allocation15]  }
  0x8a   :  { %805 = dma.done.wait [#allocation3], 32  }
  0x8b   :  { %806 = vsyncadd [#allocation3], 4294967264 }
  0x8c   :  { %807 = dma.done.wait [#allocation6], 528  }
  0x8d   :  { %808 = vsyncadd [#allocation6], 4294966768 }
  0x8e   :  { %809 = dma.done.wait [#allocation9], 1040  }
  0x8f   :  { %810 = vsyncadd [#allocation9], 4294966256 }
  0x90   :  { %811 = dma.done.wait [#allocation12], 528  }
  0x91   :  { %812 = vsyncadd [#allocation12], 4294966768 }
  0x92   :  { %813 = dma.done.wait [#allocation15], 32  }
  0x93   :  { %814 = vsyncadd [#allocation15], 4294967264  ;;  %v829_v0 = vmov 0.0   ;;  %vm830_vm0 = vmmov 0   ;;  %v569_v1 = vld [vmem:[#allocation5] sm:$0xff]   ;;  %v570_v2 = vld [vmem:[#allocation5 + $0x8] sm:$0xff]  }
  0x94   :  { %509 = vmatprep.subr.bf16.mxu0 %v829_v0  ;;  %517 = vmatprep.mubr.msk.bf16.mxu0 %vm830_vm0, %v829_v0  ;;  %v573_v3 = vld [vmem:[#allocation8] sm:$0xff]   ;;  %v571_v4 = vld [vmem:[#allocation5 + $0x10] sm:$0xff]   ;;  %v572_v6 = vld [vmem:[#allocation5 + $0x18] sm:$0xff]   ;;  %vm174_vm1 = vcmask 523264   ;;  %vm416_vm2 = vcmask 25600   ;;  %s831_s7 = smov [#allocation16]  }
  0x95   :  { %521 = vmatprep.subr.bf16.mxu1 %v829_v0  ;;  %537 = vmatprep.mubr.msk.bf16.mxu1 %vm830_vm0, %v829_v0  ;;  %v574_v5 = vld [vmem:[#allocation8 + $0x8] sm:$0xff]   ;;  %v133_v7 = vld [vmem:[#allocation2] sm:$0x3]  ;;  %v575_v8 = vld [vmem:[#allocation8 + $0x10] sm:$0xff]   ;;  %s442_s5 = sshll.u32 %s831_s7, 4  ;;  %s443_s5 = int_to_ptr.vmem [resolvable:$true] %s442_s5 }
  0x96   :  { %510 = vmatpush3.bf16.msra.mxu0 %v569_v1  ;;  %522 = vmatpush3.bf16.msra.mxu1 %v573_v3  ;;  %v143_v9 = vpack.c.bf16 %v133_v7, %v133_v7  ;;  %v576_v10 = vld [vmem:[#allocation8 + $0x18] sm:$0xff]   ;;  %v577_v11 = vld [vmem:[#allocation8 + $0x20] sm:$0xff]   ;;  %v578_v12 = vld [vmem:[#allocation8 + $0x28] sm:$0xff]   ;;  %s761_s2 = scalar_lea.vmem %s443_s5, 32  ;;  %p766_p9 = scmp.lt.s32.totalorder %s443_s5, %s443_s5 }
  0x97   :  { %511 = vmatprep.subr.bf16.mxu0 %v829_v0  ;;  %523 = vmatprep.subr.bf16.mxu1 %v829_v0  ;;  %v579_v13 = vld [vmem:[#allocation8 + $0x30] sm:$0xff]   ;;  %v580_v14 = vld [vmem:[#allocation8 + $0x38] sm:$0xff]   ;;  %v581_v15 = vld [vmem:[#allocation11] sm:$0xff]   ;;  %p762_p8 = scmp.ne.s32.totalorder %s443_s5, %s761_s2  ;;  %p767_p10 = scmp.lt.s32.totalorder %s761_s2, %s761_s2 }
  0x98   :  { %v582_v16 = vld [vmem:[#allocation11 + $0x8] sm:$0xff]   ;;  %v469_v17 = vld [vmem:[#allocation7] ss:$0 sm:$0xff]  ;;  %v583_v25 = vld [vmem:[#allocation11 + $0x10] sm:$0xff]  }
  0x99   :  { %v584_v26 = vld [vmem:[#allocation11 + $0x18] sm:$0xff]   ;;  %v484_v35 = vld [vmem:[#allocation13] ss:$0 sm:$0xff]  ;;  %v415_v37 = vld [vmem:[#allocation14] sm:$0x3]  ;;  %p768_p11 = por %p767_p10, %p766_p9 }
  0x9a   :  { %512 = vmatpush3.bf16.msra.mxu0 %v570_v2  ;;  %524 = vmatpush3.bf16.msra.mxu1 %v574_v5  ;;  %v475_v27 = vld [vmem:[#allocation10] ss:$0 sm:$0xff] }
  0x9b   :  { %513 = vmatprep.subr.bf16.mxu0 %v829_v0  ;;  %525 = vmatprep.subr.bf16.mxu1 %v829_v0  ;;  %p769_p12 = pnand %p768_p11, %p762_p8 }
  0x9e   :  { %514 = vmatpush3.bf16.msra.mxu0 %v571_v4  ;;  %526 = vmatpush3.bf16.msra.mxu1 %v575_v8 }
  0x9f   :  { %515 = vmatprep.subr.bf16.mxu0 %v829_v0  ;;  %527 = vmatprep.subr.bf16.mxu1 %v829_v0 }
  0xa2   :  { %516 = vmatpush3.bf16.msra.mxu0 %v572_v6  ;;  %528 = vmatpush3.bf16.msra.mxu1 %v576_v10 }
  0xa3   :  { %541 = vmatprep.subr.bf16.mxu0 %v829_v0  ;;  %529 = vmatprep.subr.bf16.mxu1 %v829_v0 }
  0xa5   :  { %518 = vmatmul.mubr.msk.bf16.vlgmr.msra.gmra.mrb[0].mxu0 %vm174_vm1, %v143_v9 }
  0xa6   :  { %549 = vmatprep.mubr.msk.bf16.mxu0 %vm830_vm0, %v829_v0  ;;  %530 = vmatpush3.bf16.msra.mxu1 %v577_v11 }
  0xa7   :  { %531 = vmatprep.subr.bf16.mxu1 %v829_v0  ;;  %542 = vmatpush3.bf16.msra.mxu0 %v581_v15 }
  0xa8   :  { %543 = vmatprep.subr.bf16.mxu0 %v829_v0 }
  0xaa   :  { %532 = vmatpush3.bf16.msra.mxu1 %v578_v12 }
  0xab   :  { %533 = vmatprep.subr.bf16.mxu1 %v829_v0  ;;  %544 = vmatpush3.bf16.msra.mxu0 %v582_v16 }
  0xac   :  { %545 = vmatprep.subr.bf16.mxu0 %v829_v0 }
  0xae   :  { %534 = vmatpush3.bf16.msra.mxu1 %v579_v13 }
  0xaf   :  { %535 = vmatprep.subr.bf16.mxu1 %v829_v0  ;;  %546 = vmatpush3.bf16.msra.mxu0 %v583_v25 }
  0xb0   :  { %547 = vmatprep.subr.bf16.mxu0 %v829_v0 }
  0xb2   :  { %536 = vmatpush3.bf16.msra.mxu1 %v580_v14 }
  0xb3   :  { %548 = vmatpush3.bf16.msra.mxu0 %v584_v26 }
 0x178   :  { %v212_v18 = vpop.f32.mrb[0].mxu0 }
 0x179   :  { %v213_v19 = vadd.f32 %v469_v17, %v212_v18  ;;  %v519_v20 = vpop.f32.mrb[1].mxu0 }
 0x17a   :  { %v215_v21 = vpop.f32.mrb[2].mxu0 }
 0x17b   :  { %v218_v22 = vmax.f32 %v213_v19, 0.0  ;;  %v520_v23 = vpop.f32.mrb[3].mxu0 }
 0x17d   :  { %v236_v24 = vpack.c.bf16 %v218_v22, %v218_v22 }
 0x17f   :  { %538 = vmatmul.mubr.bf16.vlgmr.msra.gmra.mrb[0].mxu1 %v236_v24 }
 0x252   :  { %v325_v28 = vpop.f32.mrb[0].mxu1 }
 0x253   :  { %v326_v29 = vadd.f32 %v475_v27, %v325_v28  ;;  %v539_v30 = vpop.f32.mrb[1].mxu1 }
 0x254   :  { %v328_v31 = vpop.f32.mrb[2].mxu1 }
 0x255   :  { %v331_v32 = vmax.f32 %v326_v29, 0.0  ;;  %v540_v33 = vpop.f32.mrb[3].mxu1 }
 0x257   :  { %v341_v34 = vpack.c.bf16 %v331_v32, %v331_v32 }
 0x259   :  { %550 = vmatmul.mubr.msk.bf16.vlgmr.msra.gmra.mrb[4].mxu0 %vm174_vm1, %v341_v34 }
 0x32c   :  { %v409_v36 = vpop.f32.mrb[4].mxu0 }
 0x32d   :  { %v410_v38 = vadd.f32 %v484_v35, %v409_v36  ;;  %v551_v39 = vpop.f32.mrb[5].mxu0 }
 0x32e   :  { %v412_v40 = vpop.f32.mrb[6].mxu0 }
 0x32f   :  { %v552_v41 = vpop.f32.mrb[7].mxu0  ;;  %v418_v42 = vsub.f32 %v410_v38, %v415_v37  ;;  %417 = vst.msk [vmem:[#allocation16] sm:$0x3] %vm416_vm2, %v410_v38 }
 0x331   :  { %v419_v43 = vmul.f32 %v418_v42, %v418_v42 }
 0x333   :  { %v420_v44 = vsel %vm416_vm2, %v419_v43, 0.0 }
 0x334   :  { %421 = vadd.xlane.f32.xlu0 %v420_v44 }
 0x335   :  { %772 = shalt.err (!%p769_p12)
}
 0x336   :  { %s773_s20 = scalar_lea.hbm %s1025_s8, 32 }
 0x337   :  { %p774_p13 = scmp.ne.s32.totalorder %s1025_s8, %s773_s20  ;;  %p777_p0 = scmp.lt.u32.totalorder %s773_s20, %s1025_s8 }
 0x339   :  { %p779_p1 = pnand %p777_p0, %p774_p13 }
 0x33b   :  { %782 = shalt.err (!%p779_p1)
}
 0x33c   :  { %445 = dma.vmem_to_hbm [thread:$0]  %s443_s5, 32, %s1025_s8, [#allocation4]   ;;  %vm434_vm3 = vcmask 0  }
 0x33d   :  { %s832_s23 = smov [#allocation17]  }
 0x33e   :  { %s452_s25 = sshll.u32 %s832_s23, 4  ;;  %s453_s25 = int_to_ptr.vmem [resolvable:$true] %s452_s25 }
 0x33f   :  { %s783_s0 = scalar_lea.vmem %s453_s25, 16  ;;  %s787_s24 = scalar_lea.vmem %s453_s25, 32 }
 0x340   :  { %p784_p2 = scmp.ne.s32.totalorder %s453_s25, %s783_s0  ;;  %p788_p3 = scmp.lt.s32.totalorder %s453_s25, %s453_s25 }
 0x341   :  { %p789_p4 = scmp.lt.s32.totalorder %s787_s24, %s783_s0 }
 0x343   :  { %p790_p5 = por %p789_p4, %p788_p3 }
 0x345   :  { %p791_p6 = pnand %p790_p5, %p784_p2 }
 0x3c1   :  { %v422_v45 = vpop.xlane.xlu0 %421 }
 0x3c2   :  { %v423_v46 = vrot.slane %v422_v45, 4 }
 0x3c4   :  { %v424_v47 = vadd.f32 %v423_v46, %v422_v45 }
 0x3c6   :  { %v425_v48 = vrot.slane %v424_v47, 2 }
 0x3c8   :  { %v426_v49 = vadd.f32 %v425_v48, %v424_v47 }
 0x3ca   :  { %v427_v50 = vrot.slane %v426_v49, 1 }
 0x3cc   :  { %v428_v51 = vadd.f32 %v427_v50, %v426_v49 }
 0x3ce   :  { %553 = vpush %v428_v51 }
 0x3ff   :  { %s554_s3 = spop %553 }
 0x400   :  { %s432_s4 = smul.f32 0.125, %s554_s3 }
 0x402   :  { %v433_v52 = vstv %s432_s4 }
 0x403   :  { %435 = vst.msk [vmem:[#allocation17] sm:$0x1] %vm434_vm3, %v433_v52 }
 0x404   :  { %794 = shalt.err (!%p791_p6)
}
 0x405   :  { %s795_s28 = scalar_lea.hbm %s1026_s9, 16 }
 0x406   :  { %p796_p7 = scmp.ne.s32.totalorder %s1026_s9, %s795_s28  ;;  %p799_p8 = scmp.lt.u32.totalorder %s795_s28, %s1026_s9 }
 0x408   :  { %p801_p9 = pnand %p799_p8, %p796_p7 }
 0x40a   :  { %804 = shalt.err (!%p801_p9)
}
 0x40b   :  { %455 = dma.vmem_to_hbm [thread:$0]  %s453_s25, 16, %s1026_s9, [#allocation18]  }
 0x40c   :  { %815 = dma.done.wait [#allocation4], 32  }
 0x40d   :  { %816 = vsyncadd [#allocation4], 4294967264 }
 0x40e   :  { %817 = dma.done.wait [#allocation18], 16  }
 0x40f   :  { %818 = vsyncadd [#allocation18], 4294967280 }
 0x410   :  { %462 = vsyncpa [#allocation3], 1 }
 0x411   :  { %463 = vsyncpa [#allocation6], 1 }
 0x412   :  { %464 = vsyncpa [#allocation9], 1 }
 0x413   :  { %465 = vsyncpa [#allocation12], 1 }
 0x414   :  { %466 = vsyncpa [#allocation15], 1 }
 0x415   :  { %467 = vsyncpa [#allocation4], 1 }
 0x416   :  { %468 = vsyncpa [#allocation18], 1 }

</bundles_post_ra>
